<compile_context>
chip_gen: v7x
topology: tpu7x:2x2x1
jax: 0.10.0
libtpu: 0.0.40
codegen_flags: <defaults>
</compile_context>

<pallas_src>
import jax
import jax.numpy as jnp
import numpy as np
from jax.experimental import pallas as pl
from jax.experimental.pallas import tpu as pltpu

BN_EPS = 1e-5
CPAD = 128   # all hidden channel dims padded to 128 (lane-dense, full MXU width)
K1PAD = 32   # conv1 im2col K (3*3*3 = 27) padded to 32


# ---------------------------------------------------------------------------
# Fused whole-network Pallas kernel
# ---------------------------------------------------------------------------
def _make_fused_kernel(H1, W1, cin2, groups2, cin3, groups3):
    """Whole forward pass for one batch element; (H1, W1) = conv1 output size."""
    H2, W2 = H1 // 2, W1 // 2      # after maxpool1 (conv2 keeps spatial size)
    H3, W3 = H2 // 2, W2 // 2      # after maxpool2 (conv3 keeps spatial size)

    def kernel(p1_ref, w1_ref, t1_ref, w2_ref, t2_ref, w3_ref, t3_ref,
               wfc_ref, bfc_ref, out_ref,
               a1p_ref, a2p_ref, row1_ref, row2_ref):

        # ---- conv1 (wrapper-side im2col) + folded BN + ReLU -----------------
        acc1 = jnp.dot(p1_ref[0], w1_ref[...],
                       preferred_element_type=jnp.float32)              # (M1, C)
        y1 = jnp.maximum(acc1 + t1_ref[...], 0.0)
        # single bf16 cast at the scratch store (f32 math above)
        a1p_ref[1:H1 + 1, 1:W1 + 1, :] = (
            y1.reshape(H1, W1, CPAD).astype(jnp.bfloat16))

        # ---- halo-only zeroing (interior is always fully overwritten) -------
        zr1 = jnp.zeros((1, W1 + 2, CPAD), jnp.bfloat16)
        zc1 = jnp.zeros((H1 + 2, 1, CPAD), jnp.bfloat16)
        a1p_ref[0:1, :, :] = zr1
        a1p_ref[H1 + 1:H1 + 2, :, :] = zr1
        a1p_ref[:, 0:1, :] = zc1
        a1p_ref[:, W1 + 1:W1 + 2, :] = zc1

        zr2 = jnp.zeros((1, W2 + 2, CPAD), jnp.bfloat16)
        zc2 = jnp.zeros((H2 + 2, 1, CPAD), jnp.bfloat16)
        a2p_ref[0:1, :, :] = zr2
        a2p_ref[H2 + 1:H2 + 2, :, :] = zr2
        a2p_ref[:, 0:1, :] = zc2
        a2p_ref[:, W2 + 1:W2 + 2, :] = zc2

        def tap_group_patch(src_ref, r0, w_len, cin, taps):
            """K-packed im2col patch for one row pair: concat the taps' shifted
            (2, w_len, cin) slices along the lane dim -> (2*w_len, CPAD)."""
            parts = [src_ref[r0 + kh: r0 + kh + 2, kw: kw + w_len, 0:cin]
                     for (kh, kw) in taps]
            k_used = cin * len(taps)
            if k_used < CPAD:
                parts.append(jnp.zeros((2, w_len, CPAD - k_used), jnp.bfloat16))
            return jnp.concatenate(parts, axis=-1).reshape(2 * w_len, CPAD)

        # ---- conv2 + folded BN + ReLU + maxpool1, row-pair tiled -------------
        for h2 in range(H2):
            acc = jnp.zeros((2 * W1, CPAD), jnp.float32)       # tiny, stays in vregs
            for g, taps in enumerate(groups2):
                patch = tap_group_patch(a1p_ref, 2 * h2, W1, cin2, taps)
                acc = acc + jnp.dot(patch, w2_ref[g],
                                    preferred_element_type=jnp.float32)
            y = jnp.maximum(acc + t2_ref[...], 0.0).reshape(2, W1, CPAD)   # f32
            row1_ref[...] = jnp.maximum(y[0], y[1])                        # H-pool
            wp = jnp.maximum(row1_ref[pl.ds(0, W2, stride=2), :],
                             row1_ref[pl.ds(1, W2, stride=2), :])          # W-pool
            a2p_ref[h2 + 1, 1:W2 + 1, :] = wp.astype(jnp.bfloat16)

        # ---- conv3 + folded BN + ReLU + maxpool2 + running GAP sum -----------
        gap = jnp.zeros((1, CPAD), jnp.float32)
        for h3 in range(H3):
            acc = jnp.zeros((2 * W2, CPAD), jnp.float32)
            for g, taps in enumerate(groups3):
                patch = tap_group_patch(a2p_ref, 2 * h3, W2, cin3, taps)
                acc = acc + jnp.dot(patch, w3_ref[g],
                                    preferred_element_type=jnp.float32)
            y = jnp.maximum(acc + t3_ref[...], 0.0).reshape(2, W2, CPAD)
            row2_ref[...] = jnp.maximum(y[0], y[1])
            wp = jnp.maximum(row2_ref[pl.ds(0, W3, stride=2), :],
                             row2_ref[pl.ds(1, W3, stride=2), :])
            gap = gap + jnp.sum(wp, axis=0, keepdims=True)

        # ---- global average pool + linear head --------------------------------
        gap = gap * (1.0 / float(H3 * W3))
        gap8 = jnp.broadcast_to(gap, (8, CPAD)).astype(jnp.bfloat16)
        logits = jnp.dot(gap8, wfc_ref[...],
                         preferred_element_type=jnp.float32) + bfc_ref[...]
        out_ref[0] = logits                                        # (8, C) lane-dense

    return kernel


def _fused_forward(p1, w1, t1, w2, t2, w3, t3, wfc, bfc,
                   *, H1, W1, cin2, groups2, cin3, groups3):
    N = p1.shape[0]
    M1 = H1 * W1
    H2, W2 = H1 // 2, W1 // 2
    G2, G3 = w2.shape[0], w3.shape[0]
    out = pl.pallas_call(
        _make_fused_kernel(H1, W1, cin2, groups2, cin3, groups3),
        out_shape=jax.ShapeDtypeStruct((N, 8, CPAD), jnp.float32),
        grid_spec=pltpu.PrefetchScalarGridSpec(
            num_scalar_prefetch=0,
            grid=(N,),
            in_specs=[
                pl.BlockSpec((1, M1, K1PAD), lambda n: (n, 0, 0)),    # conv1 patches
                pl.BlockSpec((K1PAD, CPAD), lambda n: (0, 0)),        # w1 (BN folded)
                pl.BlockSpec((1, CPAD), lambda n: (0, 0)),            # t1
                pl.BlockSpec((G2, CPAD, CPAD), lambda n: (0, 0, 0)),  # w2 packed taps
                pl.BlockSpec((1, CPAD), lambda n: (0, 0)),            # t2
                pl.BlockSpec((G3, CPAD, CPAD), lambda n: (0, 0, 0)),  # w3 packed taps
                pl.BlockSpec((1, CPAD), lambda n: (0, 0)),            # t3
                pl.BlockSpec((CPAD, CPAD), lambda n: (0, 0)),         # fc weight
                pl.BlockSpec((1, CPAD), lambda n: (0, 0)),            # fc bias
            ],
            out_specs=pl.BlockSpec((1, 8, CPAD), lambda n: (n, 0, 0)),
            scratch_shapes=[
                pltpu.VMEM((H1 + 2, W1 + 2, CPAD), jnp.bfloat16),  # padded conv1 out
                pltpu.VMEM((H2 + 2, W2 + 2, CPAD), jnp.bfloat16),  # padded pool1 out
                pltpu.VMEM((W1, CPAD), jnp.float32),               # per-row pool buf 1
                pltpu.VMEM((W2, CPAD), jnp.float32),               # per-row pool buf 2
            ],
        ),
        compiler_params=pltpu.CompilerParams(
            # batch across TensorCores (v7x megacore); no-op on v5e/v6e.
            dimension_semantics=("parallel",),
            # NOTE: per-step VMEM footprint is tiny at these shapes; for large
            # inputs raise vmem_limit_bytes / add a spatial grid axis here.
        ),
    )(p1, w1, t1, w2, t2, w3, t3, wfc, bfc)
    return out[:, 0, :]


# ---------------------------------------------------------------------------
# Parameter folding / packing (conv bias + eval-mode BN -> scale & shift)
# ---------------------------------------------------------------------------
def _bn_scale_shift(p):
    s = p["gamma"] / jnp.sqrt(p["var"] + BN_EPS)
    t = (p["b"] - p["mean"]) * s + p["beta"]
    return s, t


def _prep_conv1(p):
    s, t = _bn_scale_shift(p)
    cout = p["w"].shape[0]
    # PyTorch (Cout, Cin, kh, kw) -> (kh*kw*Cin, Cout), BN scale folded into columns.
    w = jnp.transpose(p["w"], (2, 3, 1, 0)).reshape(-1, cout) * s[None, :]
    w = jnp.pad(w, ((0, K1PAD - w.shape[0]), (0, CPAD - cout)))
    t = jnp.pad(t, (0, CPAD - cout)).reshape(1, CPAD)
    return w.astype(jnp.bfloat16), t.astype(jnp.float32)


def _prep_conv_taps_grouped(p):
    """Per-tap (Cin, Cout) matrices packed into K=128 groups along the
    contraction dim (e.g. Cin=32 -> 4 taps per matmul, Cin=64 -> 2 taps)."""
    s, t = _bn_scale_shift(p)
    cout, cin = p["w"].shape[0], p["w"].shape[1]
    gsz = max(1, CPAD // cin)
    w = jnp.transpose(p["w"], (2, 3, 1, 0)).reshape(9, cin, cout) * s[None, None, :]
    w = jnp.pad(w, ((0, 0), (0, 0), (0, CPAD - cout)))           # (9, cin, CPAD)
    groups, packed = [], []
    for i in range(0, 9, gsz):
        idx = list(range(i, min(i + gsz, 9)))
        groups.append(tuple((j // 3, j % 3) for j in idx))       # (kh, kw) per tap
        blk = jnp.concatenate([w[j] for j in idx], axis=0)       # (len*cin, CPAD)
        blk = jnp.pad(blk, ((0, CPAD - blk.shape[0]), (0, 0)))
        packed.append(blk)
    wg = jnp.stack(packed, axis=0).astype(jnp.bfloat16)          # (G, CPAD, CPAD)
    t = jnp.pad(t, (0, CPAD - cout)).reshape(1, CPAD).astype(jnp.float32)
    return wg, t, cin, tuple(groups)


def _conv1_patches(x_nhwc):
    """im2col for the stride-2 3x3 conv1 only (tiny: ~raw-input bytes in bf16)."""
    N, H, W, C = x_nhwc.shape
    H1 = (H - 1) // 2 + 1
    W1 = (W - 1) // 2 + 1
    xp = jnp.pad(x_nhwc, ((0, 0), (1, 1), (1, 1), (0, 0)))
    taps = []
    for kh in range(3):
        for kw in range(3):
            taps.append(xp[:, kh:kh + 2 * H1:2, kw:kw + 2 * W1:2, :])
    p = jnp.stack(taps, axis=3).reshape(N, H1 * W1, 9 * C)   # (kh,kw,cin) order
    p = jnp.pad(p, ((0, 0), (0, 0), (0, K1PAD - 9 * C)))
    return p.astype(jnp.bfloat16), H1, W1


def basic_cnn_forward(params, x_nchw):
    num_classes = params["fc_w"].shape[0]
    assert num_classes <= CPAD, "FC output tiling for >128 classes not implemented"
    x = jnp.transpose(x_nchw, (0, 2, 3, 1)).astype(jnp.float32)   # NCHW -> NHWC
    p1, H1, W1 = _conv1_patches(x)
    assert H1 % 4 == 0 and W1 % 4 == 0, (H1, W1)   # must survive two 2x2 pools
    w1, t1 = _prep_conv1(params["conv1"])
    w2, t2, cin2, groups2 = _prep_conv_taps_grouped(params["conv2"])
    w3, t3, cin3, groups3 = _prep_conv_taps_grouped(params["conv3"])
    cin_fc = params["fc_w"].shape[1]
    wfc = jnp.transpose(params["fc_w"], (1, 0))
    wfc = jnp.pad(wfc, ((0, CPAD - cin_fc), (0, CPAD - num_classes))).astype(jnp.bfloat16)
    bfc = jnp.pad(params["fc_b"], (0, CPAD - num_classes)).reshape(1, CPAD)
    bfc = bfc.astype(jnp.float32)
    out = _fused_forward(p1, w1, t1, w2, t2, w3, t3, wfc, bfc,
                         H1=H1, W1=W1, cin2=cin2, groups2=groups2,
                         cin3=cin3, groups3=groups3)
    return out[:, :num_classes]


# ---------------------------------------------------------------------------
# Parameters (deterministic init)
# ---------------------------------------------------------------------------
def init_params(key, num_classes):
    def conv_p(key, cin, cout):
        k = jax.random.split(key, 6)
        fan_in = cin * 9
        return dict(
            w=jax.random.normal(k[0], (cout, cin, 3, 3), jnp.float32)
            / jnp.sqrt(fan_in),
            b=0.05 * jax.random.normal(k[1], (cout,), jnp.float32),
            gamma=1.0 + 0.1 * jax.random.normal(k[2], (cout,), jnp.float32),
            beta=0.1 * jax.random.normal(k[3], (cout,), jnp.float32),
            mean=0.1 * jax.random.normal(k[4], (cout,), jnp.float32),
            var=1.0 + 0.2 * jax.random.uniform(k[5], (cout,), jnp.float32),
        )

    keys = jax.random.split(key, 4)
    fc_keys = jax.random.split(keys[3], 2)
    return dict(
        conv1=conv_p(keys[0], 3, 32),
        conv2=conv_p(keys[1], 32, 64),
        conv3=conv_p(keys[2], 64, 128),
        fc_w=jax.random.normal(fc_keys[0], (num_classes, 128), jnp.float32)
        / jnp.sqrt(128.0),
        fc_b=0.05 * jax.random.normal(fc_keys[1], (num_classes,), jnp.float32),
    )


# ---------------------------------------------------------------------------
# Pure-JAX reference (mirrors PyTorch eval-mode forward) for validation
# ---------------------------------------------------------------------------
def _ref_conv_bn_relu(x, p, stride):
    w_hwio = jnp.transpose(p["w"], (2, 3, 1, 0))
    y = jax.lax.conv_general_dilated(
        x, w_hwio, window_strides=(stride, stride), padding=((1, 1), (1, 1)),
        dimension_numbers=("NHWC", "HWIO", "NHWC"),
    ) + p["b"]
    y = (y - p["mean"]) / jnp.sqrt(p["var"] + BN_EPS) * p["gamma"] + p["beta"]
    return jnp.maximum(y, 0.0)


def _ref_maxpool(x):
    return jax.lax.reduce_window(
        x, -jnp.inf, jax.lax.max, (1, 2, 2, 1), (1, 2, 2, 1), "VALID"
    )


def reference_forward(params, x_nchw):
    x = jnp.transpose(x_nchw, (0, 2, 3, 1))
    x = _ref_conv_bn_relu(x, params["conv1"], 2)
    x = _ref_conv_bn_relu(x, params["conv2"], 1)
    x = _ref_maxpool(x)
    x = _ref_conv_bn_relu(x, params["conv3"], 1)
    x = _ref_maxpool(x)
    x = jnp.mean(x, axis=(1, 2))
    return x @ params["fc_w"].T + params["fc_b"]


if __name__ == "__main__":
    num_classes = 16
    key = jax.random.PRNGKey(0)
    k_params, k_x = jax.random.split(key)
    params = init_params(k_params, num_classes)
    x = jax.random.normal(k_x, (2, 3, 16, 16), jnp.float32)  # NCHW like PyTorch

    out = jax.jit(basic_cnn_forward)(params, x)
    out = jax.block_until_ready(out)
    assert out.shape == (2, num_classes), out.shape

    ref = jax.block_until_ready(reference_forward(params, x))
    # bf16 MXU operands (f32 accumulation) -> looser tolerance than the f32 ref.
    np.testing.assert_allclose(np.asarray(out), np.asarray(ref), rtol=5e-2, atol=5e-2)

    print("KERNEL_OK")
</pallas_src>

<mosaic_0001>
module attributes {stable_mosaic.version = 11 : i64} {
  func.func @kernel(%arg0: i32, %arg1: memref<1x64x32xbf16, #tpu.memory_space<vmem>>, %arg2: memref<32x128xbf16, #tpu.memory_space<vmem>>, %arg3: memref<1x128xf32, #tpu.memory_space<vmem>>, %arg4: memref<3x128x128xbf16, #tpu.memory_space<vmem>>, %arg5: memref<1x128xf32, #tpu.memory_space<vmem>>, %arg6: memref<5x128x128xbf16, #tpu.memory_space<vmem>>, %arg7: memref<1x128xf32, #tpu.memory_space<vmem>>, %arg8: memref<128x128xbf16, #tpu.memory_space<vmem>>, %arg9: memref<1x128xf32, #tpu.memory_space<vmem>>, %arg10: memref<1x8x128xf32, #tpu.memory_space<vmem>>, %arg11: memref<10x10x128xbf16, #tpu.memory_space<vmem>>, %arg12: memref<6x6x128xbf16, #tpu.memory_space<vmem>>, %arg13: memref<8x128xf32, #tpu.memory_space<vmem>>, %arg14: memref<4x128xf32, #tpu.memory_space<vmem>>) attributes {dimension_semantics = [#tpu.dimension_semantics<parallel>], iteration_bounds = array<i64: 2>, scalar_prefetch = 0 : i64, scratch_operands = 4 : i64, tpu.core_type = #tpu.core_type<tc>, window_params = [{transform_indices = @transform_0, window_bounds = array<i64: 1, 64, 32>}, {pipeline_mode = #tpu.pipeline_mode<synchronous>, transform_indices = @transform_1, window_bounds = array<i64: 32, 128>}, {pipeline_mode = #tpu.pipeline_mode<synchronous>, transform_indices = @transform_2, window_bounds = array<i64: 1, 128>}, {pipeline_mode = #tpu.pipeline_mode<synchronous>, transform_indices = @transform_3, window_bounds = array<i64: 3, 128, 128>}, {pipeline_mode = #tpu.pipeline_mode<synchronous>, transform_indices = @transform_4, window_bounds = array<i64: 1, 128>}, {pipeline_mode = #tpu.pipeline_mode<synchronous>, transform_indices = @transform_5, window_bounds = array<i64: 5, 128, 128>}, {pipeline_mode = #tpu.pipeline_mode<synchronous>, transform_indices = @transform_6, window_bounds = array<i64: 1, 128>}, {pipeline_mode = #tpu.pipeline_mode<synchronous>, transform_indices = @transform_7, window_bounds = array<i64: 128, 128>}, {pipeline_mode = #tpu.pipeline_mode<synchronous>, transform_indices = @transform_8, window_bounds = array<i64: 1, 128>}, {transform_indices = @transform_9, window_bounds = array<i64: 1, 8, 128>}]} {
    %c0 = arith.constant 0 : index
    %c0_0 = arith.constant 0 : index
    %c0_1 = arith.constant 0 : index
    %0 = vector.load %arg1[%c0, %c0_0, %c0_1] : memref<1x64x32xbf16, #tpu.memory_space<vmem>>, vector<1x64x32xbf16>
    %1 = vector.shape_cast %0 : vector<1x64x32xbf16> to vector<64x32xbf16>
    %c0_2 = arith.constant 0 : index
    %c0_3 = arith.constant 0 : index
    %2 = vector.load %arg2[%c0_2, %c0_3] : memref<32x128xbf16, #tpu.memory_space<vmem>>, vector<32x128xbf16>
    %cst = arith.constant dense<0.000000e+00> : vector<64x128xf32>
    %3 = tpu.matmul %1, %2, %cst {dimension_numbers = #tpu.dot_dimension_numbers<[1], [0], [0], [1], [0, 0, 1, 1], [], []>} : vector<64x32xbf16>, vector<32x128xbf16>, vector<64x128xf32> -> vector<64x128xf32>
    %c0_4 = arith.constant 0 : index
    %c0_5 = arith.constant 0 : index
    %4 = vector.load %arg3[%c0_4, %c0_5] : memref<1x128xf32, #tpu.memory_space<vmem>>, vector<1x128xf32>
    %5 = vector.broadcast %4 : vector<1x128xf32> to vector<64x128xf32>
    %6 = arith.addf %3, %5 : vector<64x128xf32>
    %cst_6 = arith.constant 0.000000e+00 : f32
    %7 = vector.broadcast %cst_6 : f32 to vector<64x128xf32>
    %8 = arith.maximumf %6, %7 : vector<64x128xf32>
    %9 = vector.shape_cast %8 : vector<64x128xf32> to vector<8x8x128xf32>
    %10 = arith.truncf %9 : vector<8x8x128xf32> to vector<8x8x128xbf16>
    %c1 = arith.constant 1 : index
    %c1_7 = arith.constant 1 : index
    %c0_8 = arith.constant 0 : index
    %11 = vector.load %arg11[%c1, %c1_7, %c0_8] : memref<10x10x128xbf16, #tpu.memory_space<vmem>>, vector<8x8x128xbf16>
    tpu.vector_store %arg11[%c1, %c1_7, %c0_8], %10 {strides = array<i32>} : memref<10x10x128xbf16, #tpu.memory_space<vmem>>, vector<8x8x128xbf16>,
    %cst_9 = arith.constant 0.000000e+00 : bf16
    %12 = vector.broadcast %cst_9 : bf16 to vector<1x10x128xbf16>
    %cst_10 = arith.constant 0.000000e+00 : bf16
    %13 = vector.broadcast %cst_10 : bf16 to vector<10x1x128xbf16>
    %c0_11 = arith.constant 0 : index
    %c0_12 = arith.constant 0 : index
    %c0_13 = arith.constant 0 : index
    %14 = vector.load %arg11[%c0_11, %c0_12, %c0_13] : memref<10x10x128xbf16, #tpu.memory_space<vmem>>, vector<1x10x128xbf16>
    tpu.vector_store %arg11[%c0_11, %c0_12, %c0_13], %12 {strides = array<i32>} : memref<10x10x128xbf16, #tpu.memory_space<vmem>>, vector<1x10x128xbf16>,
    %c9 = arith.constant 9 : index
    %c0_14 = arith.constant 0 : index
    %c0_15 = arith.constant 0 : index
    %15 = vector.load %arg11[%c9, %c0_14, %c0_15] : memref<10x10x128xbf16, #tpu.memory_space<vmem>>, vector<1x10x128xbf16>
    tpu.vector_store %arg11[%c9, %c0_14, %c0_15], %12 {strides = array<i32>} : memref<10x10x128xbf16, #tpu.memory_space<vmem>>, vector<1x10x128xbf16>,
    %c0_16 = arith.constant 0 : index
    %c0_17 = arith.constant 0 : index
    %c0_18 = arith.constant 0 : index
    %16 = vector.load %arg11[%c0_16, %c0_17, %c0_18] : memref<10x10x128xbf16, #tpu.memory_space<vmem>>, vector<10x1x128xbf16>
    tpu.vector_store %arg11[%c0_16, %c0_17, %c0_18], %13 {strides = array<i32>} : memref<10x10x128xbf16, #tpu.memory_space<vmem>>, vector<10x1x128xbf16>,
    %c0_19 = arith.constant 0 : index
    %c9_20 = arith.constant 9 : index
    %c0_21 = arith.constant 0 : index
    %17 = vector.load %arg11[%c0_19, %c9_20, %c0_21] : memref<10x10x128xbf16, #tpu.memory_space<vmem>>, vector<10x1x128xbf16>
    tpu.vector_store %arg11[%c0_19, %c9_20, %c0_21], %13 {strides = array<i32>} : memref<10x10x128xbf16, #tpu.memory_space<vmem>>, vector<10x1x128xbf16>,
    %cst_22 = arith.constant 0.000000e+00 : bf16
    %18 = vector.broadcast %cst_22 : bf16 to vector<1x6x128xbf16>
    %cst_23 = arith.constant 0.000000e+00 : bf16
    %19 = vector.broadcast %cst_23 : bf16 to vector<6x1x128xbf16>
    %c0_24 = arith.constant 0 : index
    %c0_25 = arith.constant 0 : index
    %c0_26 = arith.constant 0 : index
    %20 = vector.load %arg12[%c0_24, %c0_25, %c0_26] : memref<6x6x128xbf16, #tpu.memory_space<vmem>>, vector<1x6x128xbf16>
    tpu.vector_store %arg12[%c0_24, %c0_25, %c0_26], %18 {strides = array<i32>} : memref<6x6x128xbf16, #tpu.memory_space<vmem>>, vector<1x6x128xbf16>,
    %c5 = arith.constant 5 : index
    %c0_27 = arith.constant 0 : index
    %c0_28 = arith.constant 0 : index
    %21 = vector.load %arg12[%c5, %c0_27, %c0_28] : memref<6x6x128xbf16, #tpu.memory_space<vmem>>, vector<1x6x128xbf16>
    tpu.vector_store %arg12[%c5, %c0_27, %c0_28], %18 {strides = array<i32>} : memref<6x6x128xbf16, #tpu.memory_space<vmem>>, vector<1x6x128xbf16>,
    %c0_29 = arith.constant 0 : index
    %c0_30 = arith.constant 0 : index
    %c0_31 = arith.constant 0 : index
    %22 = vector.load %arg12[%c0_29, %c0_30, %c0_31] : memref<6x6x128xbf16, #tpu.memory_space<vmem>>, vector<6x1x128xbf16>
    tpu.vector_store %arg12[%c0_29, %c0_30, %c0_31], %19 {strides = array<i32>} : memref<6x6x128xbf16, #tpu.memory_space<vmem>>, vector<6x1x128xbf16>,
    %c0_32 = arith.constant 0 : index
    %c5_33 = arith.constant 5 : index
    %c0_34 = arith.constant 0 : index
    %23 = vector.load %arg12[%c0_32, %c5_33, %c0_34] : memref<6x6x128xbf16, #tpu.memory_space<vmem>>, vector<6x1x128xbf16>
    tpu.vector_store %arg12[%c0_32, %c5_33, %c0_34], %19 {strides = array<i32>} : memref<6x6x128xbf16, #tpu.memory_space<vmem>>, vector<6x1x128xbf16>,
    %cst_35 = arith.constant 0.000000e+00 : f32
    %24 = vector.broadcast %cst_35 : f32 to vector<16x128xf32>
    %c0_36 = arith.constant 0 : index
    %c0_37 = arith.constant 0 : index
    %c0_38 = arith.constant 0 : index
    %25 = vector.load %arg11[%c0_36, %c0_37, %c0_38] : memref<10x10x128xbf16, #tpu.memory_space<vmem>>, vector<2x8x32xbf16>
    %c0_39 = arith.constant 0 : index
    %c1_40 = arith.constant 1 : index
    %c0_41 = arith.constant 0 : index
    %26 = vector.load %arg11[%c0_39, %c1_40, %c0_41] : memref<10x10x128xbf16, #tpu.memory_space<vmem>>, vector<2x8x32xbf16>
    %c0_42 = arith.constant 0 : index
    %c2 = arith.constant 2 : index
    %c0_43 = arith.constant 0 : index
    %27 = vector.load %arg11[%c0_42, %c2, %c0_43] : memref<10x10x128xbf16, #tpu.memory_space<vmem>>, vector<2x8x32xbf16>
    %c1_44 = arith.constant 1 : index
    %c0_45 = arith.constant 0 : index
    %c0_46 = arith.constant 0 : index
    %28 = vector.load %arg11[%c1_44, %c0_45, %c0_46] : memref<10x10x128xbf16, #tpu.memory_space<vmem>>, vector<2x8x32xbf16>
    %29 = tpu.concatenate %25, %26, %27, %28 in 2 : vector<2x8x32xbf16>, vector<2x8x32xbf16>, vector<2x8x32xbf16>, vector<2x8x32xbf16> -> vector<2x8x128xbf16>
    %30 = vector.shape_cast %29 : vector<2x8x128xbf16> to vector<16x128xbf16>
    %c0_47 = arith.constant 0 : index
    %c0_48 = arith.constant 0 : index
    %c0_49 = arith.constant 0 : index
    %31 = vector.load %arg4[%c0_47, %c0_48, %c0_49] : memref<3x128x128xbf16, #tpu.memory_space<vmem>>, vector<1x128x128xbf16>
    %32 = vector.shape_cast %31 : vector<1x128x128xbf16> to vector<128x128xbf16>
    %cst_50 = arith.constant dense<0.000000e+00> : vector<16x128xf32>
    %33 = tpu.matmul %30, %32, %cst_50 {dimension_numbers = #tpu.dot_dimension_numbers<[1], [0], [0], [1], [0, 0, 1, 1], [], []>} : vector<16x128xbf16>, vector<128x128xbf16>, vector<16x128xf32> -> vector<16x128xf32>
    %34 = arith.addf %24, %33 : vector<16x128xf32>
    %c1_51 = arith.constant 1 : index
    %c1_52 = arith.constant 1 : index
    %c0_53 = arith.constant 0 : index
    %35 = vector.load %arg11[%c1_51, %c1_52, %c0_53] : memref<10x10x128xbf16, #tpu.memory_space<vmem>>, vector<2x8x32xbf16>
    %c1_54 = arith.constant 1 : index
    %c2_55 = arith.constant 2 : index
    %c0_56 = arith.constant 0 : index
    %36 = vector.load %arg11[%c1_54, %c2_55, %c0_56] : memref<10x10x128xbf16, #tpu.memory_space<vmem>>, vector<2x8x32xbf16>
    %c2_57 = arith.constant 2 : index
    %c0_58 = arith.constant 0 : index
    %c0_59 = arith.constant 0 : index
    %37 = vector.load %arg11[%c2_57, %c0_58, %c0_59] : memref<10x10x128xbf16, #tpu.memory_space<vmem>>, vector<2x8x32xbf16>
    %c2_60 = arith.constant 2 : index
    %c1_61 = arith.constant 1 : index
    %c0_62 = arith.constant 0 : index
    %38 = vector.load %arg11[%c2_60, %c1_61, %c0_62] : memref<10x10x128xbf16, #tpu.memory_space<vmem>>, vector<2x8x32xbf16>
    %39 = tpu.concatenate %35, %36, %37, %38 in 2 : vector<2x8x32xbf16>, vector<2x8x32xbf16>, vector<2x8x32xbf16>, vector<2x8x32xbf16> -> vector<2x8x128xbf16>
    %40 = vector.shape_cast %39 : vector<2x8x128xbf16> to vector<16x128xbf16>
    %c1_63 = arith.constant 1 : index
    %c0_64 = arith.constant 0 : index
    %c0_65 = arith.constant 0 : index
    %41 = vector.load %arg4[%c1_63, %c0_64, %c0_65] : memref<3x128x128xbf16, #tpu.memory_space<vmem>>, vector<1x128x128xbf16>
    %42 = vector.shape_cast %41 : vector<1x128x128xbf16> to vector<128x128xbf16>
    %cst_66 = arith.constant dense<0.000000e+00> : vector<16x128xf32>
    %43 = tpu.matmul %40, %42, %cst_66 {dimension_numbers = #tpu.dot_dimension_numbers<[1], [0], [0], [1], [0, 0, 1, 1], [], []>} : vector<16x128xbf16>, vector<128x128xbf16>, vector<16x128xf32> -> vector<16x128xf32>
    %44 = arith.addf %34, %43 : vector<16x128xf32>
    %c2_67 = arith.constant 2 : index
    %c2_68 = arith.constant 2 : index
    %c0_69 = arith.constant 0 : index
    %45 = vector.load %arg11[%c2_67, %c2_68, %c0_69] : memref<10x10x128xbf16, #tpu.memory_space<vmem>>, vector<2x8x32xbf16>
    %cst_70 = arith.constant 0.000000e+00 : bf16
    %46 = vector.broadcast %cst_70 : bf16 to vector<2x8x96xbf16>
    %47 = tpu.concatenate %45, %46 in 2 : vector<2x8x32xbf16>, vector<2x8x96xbf16> -> vector<2x8x128xbf16>
    %48 = vector.shape_cast %47 : vector<2x8x128xbf16> to vector<16x128xbf16>
    %c2_71 = arith.constant 2 : index
    %c0_72 = arith.constant 0 : index
    %c0_73 = arith.constant 0 : index
    %49 = vector.load %arg4[%c2_71, %c0_72, %c0_73] : memref<3x128x128xbf16, #tpu.memory_space<vmem>>, vector<1x128x128xbf16>
    %50 = vector.shape_cast %49 : vector<1x128x128xbf16> to vector<128x128xbf16>
    %cst_74 = arith.constant dense<0.000000e+00> : vector<16x128xf32>
    %51 = tpu.matmul %48, %50, %cst_74 {dimension_numbers = #tpu.dot_dimension_numbers<[1], [0], [0], [1], [0, 0, 1, 1], [], []>} : vector<16x128xbf16>, vector<128x128xbf16>, vector<16x128xf32> -> vector<16x128xf32>
    %52 = arith.addf %44, %51 : vector<16x128xf32>
    %c0_75 = arith.constant 0 : index
    %c0_76 = arith.constant 0 : index
    %53 = vector.load %arg5[%c0_75, %c0_76] : memref<1x128xf32, #tpu.memory_space<vmem>>, vector<1x128xf32>
    %54 = vector.broadcast %53 : vector<1x128xf32> to vector<16x128xf32>
    %55 = arith.addf %52, %54 : vector<16x128xf32>
    %cst_77 = arith.constant 0.000000e+00 : f32
    %56 = vector.broadcast %cst_77 : f32 to vector<16x128xf32>
    %57 = arith.maximumf %55, %56 : vector<16x128xf32>
    %58 = vector.shape_cast %57 : vector<16x128xf32> to vector<2x8x128xf32>
    %59 = vector.extract_strided_slice %58 {offsets = [0, 0, 0], sizes = [1, 8, 128], strides = [1, 1, 1]} : vector<2x8x128xf32> to vector<1x8x128xf32>
    %60 = vector.shape_cast %59 : vector<1x8x128xf32> to vector<8x128xf32>
    %61 = vector.extract_strided_slice %58 {offsets = [1, 0, 0], sizes = [1, 8, 128], strides = [1, 1, 1]} : vector<2x8x128xf32> to vector<1x8x128xf32>
    %62 = vector.shape_cast %61 : vector<1x8x128xf32> to vector<8x128xf32>
    %63 = arith.maximumf %60, %62 : vector<8x128xf32>
    %c0_78 = arith.constant 0 : index
    %c0_79 = arith.constant 0 : index
    %64 = vector.load %arg13[%c0_78, %c0_79] : memref<8x128xf32, #tpu.memory_space<vmem>>, vector<8x128xf32>
    tpu.vector_store %arg13[%c0_78, %c0_79], %63 {strides = array<i32>} : memref<8x128xf32, #tpu.memory_space<vmem>>, vector<8x128xf32>,
    %c0_80 = arith.constant 0 : index
    %c0_81 = arith.constant 0 : index
    %65 = tpu.strided_load %arg13[%c0_80, %c0_81] {strides = array<i32: 2, 1>} : memref<8x128xf32, #tpu.memory_space<vmem>>, vector<4x128xf32>
    %c1_82 = arith.constant 1 : index
    %c0_83 = arith.constant 0 : index
    %66 = tpu.strided_load %arg13[%c1_82, %c0_83] {strides = array<i32: 2, 1>} : memref<8x128xf32, #tpu.memory_space<vmem>>, vector<4x128xf32>
    %67 = arith.maximumf %65, %66 : vector<4x128xf32>
    %68 = arith.truncf %67 : vector<4x128xf32> to vector<4x128xbf16>
    %c1_84 = arith.constant 1 : index
    %c1_85 = arith.constant 1 : index
    %c0_86 = arith.constant 0 : index
    %69 = vector.load %arg12[%c1_84, %c1_85, %c0_86] : memref<6x6x128xbf16, #tpu.memory_space<vmem>>, vector<1x4x128xbf16>
    %70 = vector.shape_cast %69 : vector<1x4x128xbf16> to vector<4x128xbf16>
    %71 = vector.shape_cast %68 : vector<4x128xbf16> to vector<1x4x128xbf16>
    tpu.vector_store %arg12[%c1_84, %c1_85, %c0_86], %71 {strides = array<i32>} : memref<6x6x128xbf16, #tpu.memory_space<vmem>>, vector<1x4x128xbf16>,
    %cst_87 = arith.constant 0.000000e+00 : f32
    %72 = vector.broadcast %cst_87 : f32 to vector<16x128xf32>
    %c2_88 = arith.constant 2 : index
    %c0_89 = arith.constant 0 : index
    %c0_90 = arith.constant 0 : index
    %73 = vector.load %arg11[%c2_88, %c0_89, %c0_90] : memref<10x10x128xbf16, #tpu.memory_space<vmem>>, vector<2x8x32xbf16>
    %c2_91 = arith.constant 2 : index
    %c1_92 = arith.constant 1 : index
    %c0_93 = arith.constant 0 : index
    %74 = vector.load %arg11[%c2_91, %c1_92, %c0_93] : memref<10x10x128xbf16, #tpu.memory_space<vmem>>, vector<2x8x32xbf16>
    %c2_94 = arith.constant 2 : index
    %c2_95 = arith.constant 2 : index
    %c0_96 = arith.constant 0 : index
    %75 = vector.load %arg11[%c2_94, %c2_95, %c0_96] : memref<10x10x128xbf16, #tpu.memory_space<vmem>>, vector<2x8x32xbf16>
    %c3 = arith.constant 3 : index
    %c0_97 = arith.constant 0 : index
    %c0_98 = arith.constant 0 : index
    %76 = vector.load %arg11[%c3, %c0_97, %c0_98] : memref<10x10x128xbf16, #tpu.memory_space<vmem>>, vector<2x8x32xbf16>
    %77 = tpu.concatenate %73, %74, %75, %76 in 2 : vector<2x8x32xbf16>, vector<2x8x32xbf16>, vector<2x8x32xbf16>, vector<2x8x32xbf16> -> vector<2x8x128xbf16>
    %78 = vector.shape_cast %77 : vector<2x8x128xbf16> to vector<16x128xbf16>
    %c0_99 = arith.constant 0 : index
    %c0_100 = arith.constant 0 : index
    %c0_101 = arith.constant 0 : index
    %79 = vector.load %arg4[%c0_99, %c0_100, %c0_101] : memref<3x128x128xbf16, #tpu.memory_space<vmem>>, vector<1x128x128xbf16>
    %80 = vector.shape_cast %79 : vector<1x128x128xbf16> to vector<128x128xbf16>
    %cst_102 = arith.constant dense<0.000000e+00> : vector<16x128xf32>
    %81 = tpu.matmul %78, %80, %cst_102 {dimension_numbers = #tpu.dot_dimension_numbers<[1], [0], [0], [1], [0, 0, 1, 1], [], []>} : vector<16x128xbf16>, vector<128x128xbf16>, vector<16x128xf32> -> vector<16x128xf32>
    %82 = arith.addf %72, %81 : vector<16x128xf32>
    %c3_103 = arith.constant 3 : index
    %c1_104 = arith.constant 1 : index
    %c0_105 = arith.constant 0 : index
    %83 = vector.load %arg11[%c3_103, %c1_104, %c0_105] : memref<10x10x128xbf16, #tpu.memory_space<vmem>>, vector<2x8x32xbf16>
    %c3_106 = arith.constant 3 : index
    %c2_107 = arith.constant 2 : index
    %c0_108 = arith.constant 0 : index
    %84 = vector.load %arg11[%c3_106, %c2_107, %c0_108] : memref<10x10x128xbf16, #tpu.memory_space<vmem>>, vector<2x8x32xbf16>
    %c4 = arith.constant 4 : index
    %c0_109 = arith.constant 0 : index
    %c0_110 = arith.constant 0 : index
    %85 = vector.load %arg11[%c4, %c0_109, %c0_110] : memref<10x10x128xbf16, #tpu.memory_space<vmem>>, vector<2x8x32xbf16>
    %c4_111 = arith.constant 4 : index
    %c1_112 = arith.constant 1 : index
    %c0_113 = arith.constant 0 : index
    %86 = vector.load %arg11[%c4_111, %c1_112, %c0_113] : memref<10x10x128xbf16, #tpu.memory_space<vmem>>, vector<2x8x32xbf16>
    %87 = tpu.concatenate %83, %84, %85, %86 in 2 : vector<2x8x32xbf16>, vector<2x8x32xbf16>, vector<2x8x32xbf16>, vector<2x8x32xbf16> -> vector<2x8x128xbf16>
    %88 = vector.shape_cast %87 : vector<2x8x128xbf16> to vector<16x128xbf16>
    %c1_114 = arith.constant 1 : index
    %c0_115 = arith.constant 0 : index
    %c0_116 = arith.constant 0 : index
    %89 = vector.load %arg4[%c1_114, %c0_115, %c0_116] : memref<3x128x128xbf16, #tpu.memory_space<vmem>>, vector<1x128x128xbf16>
    %90 = vector.shape_cast %89 : vector<1x128x128xbf16> to vector<128x128xbf16>
    %cst_117 = arith.constant dense<0.000000e+00> : vector<16x128xf32>
    %91 = tpu.matmul %88, %90, %cst_117 {dimension_numbers = #tpu.dot_dimension_numbers<[1], [0], [0], [1], [0, 0, 1, 1], [], []>} : vector<16x128xbf16>, vector<128x128xbf16>, vector<16x128xf32> -> vector<16x128xf32>
    %92 = arith.addf %82, %91 : vector<16x128xf32>
    %c4_118 = arith.constant 4 : index
    %c2_119 = arith.constant 2 : index
    %c0_120 = arith.constant 0 : index
    %93 = vector.load %arg11[%c4_118, %c2_119, %c0_120] : memref<10x10x128xbf16, #tpu.memory_space<vmem>>, vector<2x8x32xbf16>
    %cst_121 = arith.constant 0.000000e+00 : bf16
    %94 = vector.broadcast %cst_121 : bf16 to vector<2x8x96xbf16>
    %95 = tpu.concatenate %93, %94 in 2 : vector<2x8x32xbf16>, vector<2x8x96xbf16> -> vector<2x8x128xbf16>
    %96 = vector.shape_cast %95 : vector<2x8x128xbf16> to vector<16x128xbf16>
    %c2_122 = arith.constant 2 : index
    %c0_123 = arith.constant 0 : index
    %c0_124 = arith.constant 0 : index
    %97 = vector.load %arg4[%c2_122, %c0_123, %c0_124] : memref<3x128x128xbf16, #tpu.memory_space<vmem>>, vector<1x128x128xbf16>
    %98 = vector.shape_cast %97 : vector<1x128x128xbf16> to vector<128x128xbf16>
    %cst_125 = arith.constant dense<0.000000e+00> : vector<16x128xf32>
    %99 = tpu.matmul %96, %98, %cst_125 {dimension_numbers = #tpu.dot_dimension_numbers<[1], [0], [0], [1], [0, 0, 1, 1], [], []>} : vector<16x128xbf16>, vector<128x128xbf16>, vector<16x128xf32> -> vector<16x128xf32>
    %100 = arith.addf %92, %99 : vector<16x128xf32>
    %c0_126 = arith.constant 0 : index
    %c0_127 = arith.constant 0 : index
    %101 = vector.load %arg5[%c0_126, %c0_127] : memref<1x128xf32, #tpu.memory_space<vmem>>, vector<1x128xf32>
    %102 = vector.broadcast %101 : vector<1x128xf32> to vector<16x128xf32>
    %103 = arith.addf %100, %102 : vector<16x128xf32>
    %cst_128 = arith.constant 0.000000e+00 : f32
    %104 = vector.broadcast %cst_128 : f32 to vector<16x128xf32>
    %105 = arith.maximumf %103, %104 : vector<16x128xf32>
    %106 = vector.shape_cast %105 : vector<16x128xf32> to vector<2x8x128xf32>
    %107 = vector.extract_strided_slice %106 {offsets = [0, 0, 0], sizes = [1, 8, 128], strides = [1, 1, 1]} : vector<2x8x128xf32> to vector<1x8x128xf32>
    %108 = vector.shape_cast %107 : vector<1x8x128xf32> to vector<8x128xf32>
    %109 = vector.extract_strided_slice %106 {offsets = [1, 0, 0], sizes = [1, 8, 128], strides = [1, 1, 1]} : vector<2x8x128xf32> to vector<1x8x128xf32>
    %110 = vector.shape_cast %109 : vector<1x8x128xf32> to vector<8x128xf32>
    %111 = arith.maximumf %108, %110 : vector<8x128xf32>
    %c0_129 = arith.constant 0 : index
    %c0_130 = arith.constant 0 : index
    %112 = vector.load %arg13[%c0_129, %c0_130] : memref<8x128xf32, #tpu.memory_space<vmem>>, vector<8x128xf32>
    tpu.vector_store %arg13[%c0_129, %c0_130], %111 {strides = array<i32>} : memref<8x128xf32, #tpu.memory_space<vmem>>, vector<8x128xf32>,
    %c0_131 = arith.constant 0 : index
    %c0_132 = arith.constant 0 : index
    %113 = tpu.strided_load %arg13[%c0_131, %c0_132] {strides = array<i32: 2, 1>} : memref<8x128xf32, #tpu.memory_space<vmem>>, vector<4x128xf32>
    %c1_133 = arith.constant 1 : index
    %c0_134 = arith.constant 0 : index
    %114 = tpu.strided_load %arg13[%c1_133, %c0_134] {strides = array<i32: 2, 1>} : memref<8x128xf32, #tpu.memory_space<vmem>>, vector<4x128xf32>
    %115 = arith.maximumf %113, %114 : vector<4x128xf32>
    %116 = arith.truncf %115 : vector<4x128xf32> to vector<4x128xbf16>
    %c2_135 = arith.constant 2 : index
    %c1_136 = arith.constant 1 : index
    %c0_137 = arith.constant 0 : index
    %117 = vector.load %arg12[%c2_135, %c1_136, %c0_137] : memref<6x6x128xbf16, #tpu.memory_space<vmem>>, vector<1x4x128xbf16>
    %118 = vector.shape_cast %117 : vector<1x4x128xbf16> to vector<4x128xbf16>
    %119 = vector.shape_cast %116 : vector<4x128xbf16> to vector<1x4x128xbf16>
    tpu.vector_store %arg12[%c2_135, %c1_136, %c0_137], %119 {strides = array<i32>} : memref<6x6x128xbf16, #tpu.memory_space<vmem>>, vector<1x4x128xbf16>,
    %cst_138 = arith.constant 0.000000e+00 : f32
    %120 = vector.broadcast %cst_138 : f32 to vector<16x128xf32>
    %c4_139 = arith.constant 4 : index
    %c0_140 = arith.constant 0 : index
    %c0_141 = arith.constant 0 : index
    %121 = vector.load %arg11[%c4_139, %c0_140, %c0_141] : memref<10x10x128xbf16, #tpu.memory_space<vmem>>, vector<2x8x32xbf16>
    %c4_142 = arith.constant 4 : index
    %c1_143 = arith.constant 1 : index
    %c0_144 = arith.constant 0 : index
    %122 = vector.load %arg11[%c4_142, %c1_143, %c0_144] : memref<10x10x128xbf16, #tpu.memory_space<vmem>>, vector<2x8x32xbf16>
    %c4_145 = arith.constant 4 : index
    %c2_146 = arith.constant 2 : index
    %c0_147 = arith.constant 0 : index
    %123 = vector.load %arg11[%c4_145, %c2_146, %c0_147] : memref<10x10x128xbf16, #tpu.memory_space<vmem>>, vector<2x8x32xbf16>
    %c5_148 = arith.constant 5 : index
    %c0_149 = arith.constant 0 : index
    %c0_150 = arith.constant 0 : index
    %124 = vector.load %arg11[%c5_148, %c0_149, %c0_150] : memref<10x10x128xbf16, #tpu.memory_space<vmem>>, vector<2x8x32xbf16>
    %125 = tpu.concatenate %121, %122, %123, %124 in 2 : vector<2x8x32xbf16>, vector<2x8x32xbf16>, vector<2x8x32xbf16>, vector<2x8x32xbf16> -> vector<2x8x128xbf16>
    %126 = vector.shape_cast %125 : vector<2x8x128xbf16> to vector<16x128xbf16>
    %c0_151 = arith.constant 0 : index
    %c0_152 = arith.constant 0 : index
    %c0_153 = arith.constant 0 : index
    %127 = vector.load %arg4[%c0_151, %c0_152, %c0_153] : memref<3x128x128xbf16, #tpu.memory_space<vmem>>, vector<1x128x128xbf16>
    %128 = vector.shape_cast %127 : vector<1x128x128xbf16> to vector<128x128xbf16>
    %cst_154 = arith.constant dense<0.000000e+00> : vector<16x128xf32>
    %129 = tpu.matmul %126, %128, %cst_154 {dimension_numbers = #tpu.dot_dimension_numbers<[1], [0], [0], [1], [0, 0, 1, 1], [], []>} : vector<16x128xbf16>, vector<128x128xbf16>, vector<16x128xf32> -> vector<16x128xf32>
    %130 = arith.addf %120, %129 : vector<16x128xf32>
    %c5_155 = arith.constant 5 : index
    %c1_156 = arith.constant 1 : index
    %c0_157 = arith.constant 0 : index
    %131 = vector.load %arg11[%c5_155, %c1_156, %c0_157] : memref<10x10x128xbf16, #tpu.memory_space<vmem>>, vector<2x8x32xbf16>
    %c5_158 = arith.constant 5 : index
    %c2_159 = arith.constant 2 : index
    %c0_160 = arith.constant 0 : index
    %132 = vector.load %arg11[%c5_158, %c2_159, %c0_160] : memref<10x10x128xbf16, #tpu.memory_space<vmem>>, vector<2x8x32xbf16>
    %c6 = arith.constant 6 : index
    %c0_161 = arith.constant 0 : index
    %c0_162 = arith.constant 0 : index
    %133 = vector.load %arg11[%c6, %c0_161, %c0_162] : memref<10x10x128xbf16, #tpu.memory_space<vmem>>, vector<2x8x32xbf16>
    %c6_163 = arith.constant 6 : index
    %c1_164 = arith.constant 1 : index
    %c0_165 = arith.constant 0 : index
    %134 = vector.load %arg11[%c6_163, %c1_164, %c0_165] : memref<10x10x128xbf16, #tpu.memory_space<vmem>>, vector<2x8x32xbf16>
    %135 = tpu.concatenate %131, %132, %133, %134 in 2 : vector<2x8x32xbf16>, vector<2x8x32xbf16>, vector<2x8x32xbf16>, vector<2x8x32xbf16> -> vector<2x8x128xbf16>
    %136 = vector.shape_cast %135 : vector<2x8x128xbf16> to vector<16x128xbf16>
    %c1_166 = arith.constant 1 : index
    %c0_167 = arith.constant 0 : index
    %c0_168 = arith.constant 0 : index
    %137 = vector.load %arg4[%c1_166, %c0_167, %c0_168] : memref<3x128x128xbf16, #tpu.memory_space<vmem>>, vector<1x128x128xbf16>
    %138 = vector.shape_cast %137 : vector<1x128x128xbf16> to vector<128x128xbf16>
    %cst_169 = arith.constant dense<0.000000e+00> : vector<16x128xf32>
    %139 = tpu.matmul %136, %138, %cst_169 {dimension_numbers = #tpu.dot_dimension_numbers<[1], [0], [0], [1], [0, 0, 1, 1], [], []>} : vector<16x128xbf16>, vector<128x128xbf16>, vector<16x128xf32> -> vector<16x128xf32>
    %140 = arith.addf %130, %139 : vector<16x128xf32>
    %c6_170 = arith.constant 6 : index
    %c2_171 = arith.constant 2 : index
    %c0_172 = arith.constant 0 : index
    %141 = vector.load %arg11[%c6_170, %c2_171, %c0_172] : memref<10x10x128xbf16, #tpu.memory_space<vmem>>, vector<2x8x32xbf16>
    %cst_173 = arith.constant 0.000000e+00 : bf16
    %142 = vector.broadcast %cst_173 : bf16 to vector<2x8x96xbf16>
    %143 = tpu.concatenate %141, %142 in 2 : vector<2x8x32xbf16>, vector<2x8x96xbf16> -> vector<2x8x128xbf16>
    %144 = vector.shape_cast %143 : vector<2x8x128xbf16> to vector<16x128xbf16>
    %c2_174 = arith.constant 2 : index
    %c0_175 = arith.constant 0 : index
    %c0_176 = arith.constant 0 : index
    %145 = vector.load %arg4[%c2_174, %c0_175, %c0_176] : memref<3x128x128xbf16, #tpu.memory_space<vmem>>, vector<1x128x128xbf16>
    %146 = vector.shape_cast %145 : vector<1x128x128xbf16> to vector<128x128xbf16>
    %cst_177 = arith.constant dense<0.000000e+00> : vector<16x128xf32>
    %147 = tpu.matmul %144, %146, %cst_177 {dimension_numbers = #tpu.dot_dimension_numbers<[1], [0], [0], [1], [0, 0, 1, 1], [], []>} : vector<16x128xbf16>, vector<128x128xbf16>, vector<16x128xf32> -> vector<16x128xf32>
    %148 = arith.addf %140, %147 : vector<16x128xf32>
    %c0_178 = arith.constant 0 : index
    %c0_179 = arith.constant 0 : index
    %149 = vector.load %arg5[%c0_178, %c0_179] : memref<1x128xf32, #tpu.memory_space<vmem>>, vector<1x128xf32>
    %150 = vector.broadcast %149 : vector<1x128xf32> to vector<16x128xf32>
    %151 = arith.addf %148, %150 : vector<16x128xf32>
    %cst_180 = arith.constant 0.000000e+00 : f32
    %152 = vector.broadcast %cst_180 : f32 to vector<16x128xf32>
    %153 = arith.maximumf %151, %152 : vector<16x128xf32>
    %154 = vector.shape_cast %153 : vector<16x128xf32> to vector<2x8x128xf32>
    %155 = vector.extract_strided_slice %154 {offsets = [0, 0, 0], sizes = [1, 8, 128], strides = [1, 1, 1]} : vector<2x8x128xf32> to vector<1x8x128xf32>
    %156 = vector.shape_cast %155 : vector<1x8x128xf32> to vector<8x128xf32>
    %157 = vector.extract_strided_slice %154 {offsets = [1, 0, 0], sizes = [1, 8, 128], strides = [1, 1, 1]} : vector<2x8x128xf32> to vector<1x8x128xf32>
    %158 = vector.shape_cast %157 : vector<1x8x128xf32> to vector<8x128xf32>
    %159 = arith.maximumf %156, %158 : vector<8x128xf32>
    %c0_181 = arith.constant 0 : index
    %c0_182 = arith.constant 0 : index
    %160 = vector.load %arg13[%c0_181, %c0_182] : memref<8x128xf32, #tpu.memory_space<vmem>>, vector<8x128xf32>
    tpu.vector_store %arg13[%c0_181, %c0_182], %159 {strides = array<i32>} : memref<8x128xf32, #tpu.memory_space<vmem>>, vector<8x128xf32>,
    %c0_183 = arith.constant 0 : index
    %c0_184 = arith.constant 0 : index
    %161 = tpu.strided_load %arg13[%c0_183, %c0_184] {strides = array<i32: 2, 1>} : memref<8x128xf32, #tpu.memory_space<vmem>>, vector<4x128xf32>
    %c1_185 = arith.constant 1 : index
    %c0_186 = arith.constant 0 : index
    %162 = tpu.strided_load %arg13[%c1_185, %c0_186] {strides = array<i32: 2, 1>} : memref<8x128xf32, #tpu.memory_space<vmem>>, vector<4x128xf32>
    %163 = arith.maximumf %161, %162 : vector<4x128xf32>
    %164 = arith.truncf %163 : vector<4x128xf32> to vector<4x128xbf16>
    %c3_187 = arith.constant 3 : index
    %c1_188 = arith.constant 1 : index
    %c0_189 = arith.constant 0 : index
    %165 = vector.load %arg12[%c3_187, %c1_188, %c0_189] : memref<6x6x128xbf16, #tpu.memory_space<vmem>>, vector<1x4x128xbf16>
    %166 = vector.shape_cast %165 : vector<1x4x128xbf16> to vector<4x128xbf16>
    %167 = vector.shape_cast %164 : vector<4x128xbf16> to vector<1x4x128xbf16>
    tpu.vector_store %arg12[%c3_187, %c1_188, %c0_189], %167 {strides = array<i32>} : memref<6x6x128xbf16, #tpu.memory_space<vmem>>, vector<1x4x128xbf16>,
    %cst_190 = arith.constant 0.000000e+00 : f32
    %168 = vector.broadcast %cst_190 : f32 to vector<16x128xf32>
    %c6_191 = arith.constant 6 : index
    %c0_192 = arith.constant 0 : index
    %c0_193 = arith.constant 0 : index
    %169 = vector.load %arg11[%c6_191, %c0_192, %c0_193] : memref<10x10x128xbf16, #tpu.memory_space<vmem>>, vector<2x8x32xbf16>
    %c6_194 = arith.constant 6 : index
    %c1_195 = arith.constant 1 : index
    %c0_196 = arith.constant 0 : index
    %170 = vector.load %arg11[%c6_194, %c1_195, %c0_196] : memref<10x10x128xbf16, #tpu.memory_space<vmem>>, vector<2x8x32xbf16>
    %c6_197 = arith.constant 6 : index
    %c2_198 = arith.constant 2 : index
    %c0_199 = arith.constant 0 : index
    %171 = vector.load %arg11[%c6_197, %c2_198, %c0_199] : memref<10x10x128xbf16, #tpu.memory_space<vmem>>, vector<2x8x32xbf16>
    %c7 = arith.constant 7 : index
    %c0_200 = arith.constant 0 : index
    %c0_201 = arith.constant 0 : index
    %172 = vector.load %arg11[%c7, %c0_200, %c0_201] : memref<10x10x128xbf16, #tpu.memory_space<vmem>>, vector<2x8x32xbf16>
    %173 = tpu.concatenate %169, %170, %171, %172 in 2 : vector<2x8x32xbf16>, vector<2x8x32xbf16>, vector<2x8x32xbf16>, vector<2x8x32xbf16> -> vector<2x8x128xbf16>
    %174 = vector.shape_cast %173 : vector<2x8x128xbf16> to vector<16x128xbf16>
    %c0_202 = arith.constant 0 : index
    %c0_203 = arith.constant 0 : index
    %c0_204 = arith.constant 0 : index
    %175 = vector.load %arg4[%c0_202, %c0_203, %c0_204] : memref<3x128x128xbf16, #tpu.memory_space<vmem>>, vector<1x128x128xbf16>
    %176 = vector.shape_cast %175 : vector<1x128x128xbf16> to vector<128x128xbf16>
    %cst_205 = arith.constant dense<0.000000e+00> : vector<16x128xf32>
    %177 = tpu.matmul %174, %176, %cst_205 {dimension_numbers = #tpu.dot_dimension_numbers<[1], [0], [0], [1], [0, 0, 1, 1], [], []>} : vector<16x128xbf16>, vector<128x128xbf16>, vector<16x128xf32> -> vector<16x128xf32>
    %178 = arith.addf %168, %177 : vector<16x128xf32>
    %c7_206 = arith.constant 7 : index
    %c1_207 = arith.constant 1 : index
    %c0_208 = arith.constant 0 : index
    %179 = vector.load %arg11[%c7_206, %c1_207, %c0_208] : memref<10x10x128xbf16, #tpu.memory_space<vmem>>, vector<2x8x32xbf16>
    %c7_209 = arith.constant 7 : index
    %c2_210 = arith.constant 2 : index
    %c0_211 = arith.constant 0 : index
    %180 = vector.load %arg11[%c7_209, %c2_210, %c0_211] : memref<10x10x128xbf16, #tpu.memory_space<vmem>>, vector<2x8x32xbf16>
    %c8 = arith.constant 8 : index
    %c0_212 = arith.constant 0 : index
    %c0_213 = arith.constant 0 : index
    %181 = vector.load %arg11[%c8, %c0_212, %c0_213] : memref<10x10x128xbf16, #tpu.memory_space<vmem>>, vector<2x8x32xbf16>
    %c8_214 = arith.constant 8 : index
    %c1_215 = arith.constant 1 : index
    %c0_216 = arith.constant 0 : index
    %182 = vector.load %arg11[%c8_214, %c1_215, %c0_216] : memref<10x10x128xbf16, #tpu.memory_space<vmem>>, vector<2x8x32xbf16>
    %183 = tpu.concatenate %179, %180, %181, %182 in 2 : vector<2x8x32xbf16>, vector<2x8x32xbf16>, vector<2x8x32xbf16>, vector<2x8x32xbf16> -> vector<2x8x128xbf16>
    %184 = vector.shape_cast %183 : vector<2x8x128xbf16> to vector<16x128xbf16>
    %c1_217 = arith.constant 1 : index
    %c0_218 = arith.constant 0 : index
    %c0_219 = arith.constant 0 : index
    %185 = vector.load %arg4[%c1_217, %c0_218, %c0_219] : memref<3x128x128xbf16, #tpu.memory_space<vmem>>, vector<1x128x128xbf16>
    %186 = vector.shape_cast %185 : vector<1x128x128xbf16> to vector<128x128xbf16>
    %cst_220 = arith.constant dense<0.000000e+00> : vector<16x128xf32>
    %187 = tpu.matmul %184, %186, %cst_220 {dimension_numbers = #tpu.dot_dimension_numbers<[1], [0], [0], [1], [0, 0, 1, 1], [], []>} : vector<16x128xbf16>, vector<128x128xbf16>, vector<16x128xf32> -> vector<16x128xf32>
    %188 = arith.addf %178, %187 : vector<16x128xf32>
    %c8_221 = arith.constant 8 : index
    %c2_222 = arith.constant 2 : index
    %c0_223 = arith.constant 0 : index
    %189 = vector.load %arg11[%c8_221, %c2_222, %c0_223] : memref<10x10x128xbf16, #tpu.memory_space<vmem>>, vector<2x8x32xbf16>
    %cst_224 = arith.constant 0.000000e+00 : bf16
    %190 = vector.broadcast %cst_224 : bf16 to vector<2x8x96xbf16>
    %191 = tpu.concatenate %189, %190 in 2 : vector<2x8x32xbf16>, vector<2x8x96xbf16> -> vector<2x8x128xbf16>
    %192 = vector.shape_cast %191 : vector<2x8x128xbf16> to vector<16x128xbf16>
    %c2_225 = arith.constant 2 : index
    %c0_226 = arith.constant 0 : index
    %c0_227 = arith.constant 0 : index
    %193 = vector.load %arg4[%c2_225, %c0_226, %c0_227] : memref<3x128x128xbf16, #tpu.memory_space<vmem>>, vector<1x128x128xbf16>
    %194 = vector.shape_cast %193 : vector<1x128x128xbf16> to vector<128x128xbf16>
    %cst_228 = arith.constant dense<0.000000e+00> : vector<16x128xf32>
    %195 = tpu.matmul %192, %194, %cst_228 {dimension_numbers = #tpu.dot_dimension_numbers<[1], [0], [0], [1], [0, 0, 1, 1], [], []>} : vector<16x128xbf16>, vector<128x128xbf16>, vector<16x128xf32> -> vector<16x128xf32>
    %196 = arith.addf %188, %195 : vector<16x128xf32>
    %c0_229 = arith.constant 0 : index
    %c0_230 = arith.constant 0 : index
    %197 = vector.load %arg5[%c0_229, %c0_230] : memref<1x128xf32, #tpu.memory_space<vmem>>, vector<1x128xf32>
    %198 = vector.broadcast %197 : vector<1x128xf32> to vector<16x128xf32>
    %199 = arith.addf %196, %198 : vector<16x128xf32>
    %cst_231 = arith.constant 0.000000e+00 : f32
    %200 = vector.broadcast %cst_231 : f32 to vector<16x128xf32>
    %201 = arith.maximumf %199, %200 : vector<16x128xf32>
    %202 = vector.shape_cast %201 : vector<16x128xf32> to vector<2x8x128xf32>
    %203 = vector.extract_strided_slice %202 {offsets = [0, 0, 0], sizes = [1, 8, 128], strides = [1, 1, 1]} : vector<2x8x128xf32> to vector<1x8x128xf32>
    %204 = vector.shape_cast %203 : vector<1x8x128xf32> to vector<8x128xf32>
    %205 = vector.extract_strided_slice %202 {offsets = [1, 0, 0], sizes = [1, 8, 128], strides = [1, 1, 1]} : vector<2x8x128xf32> to vector<1x8x128xf32>
    %206 = vector.shape_cast %205 : vector<1x8x128xf32> to vector<8x128xf32>
    %207 = arith.maximumf %204, %206 : vector<8x128xf32>
    %c0_232 = arith.constant 0 : index
    %c0_233 = arith.constant 0 : index
    %208 = vector.load %arg13[%c0_232, %c0_233] : memref<8x128xf32, #tpu.memory_space<vmem>>, vector<8x128xf32>
    tpu.vector_store %arg13[%c0_232, %c0_233], %207 {strides = array<i32>} : memref<8x128xf32, #tpu.memory_space<vmem>>, vector<8x128xf32>,
    %c0_234 = arith.constant 0 : index
    %c0_235 = arith.constant 0 : index
    %209 = tpu.strided_load %arg13[%c0_234, %c0_235] {strides = array<i32: 2, 1>} : memref<8x128xf32, #tpu.memory_space<vmem>>, vector<4x128xf32>
    %c1_236 = arith.constant 1 : index
    %c0_237 = arith.constant 0 : index
    %210 = tpu.strided_load %arg13[%c1_236, %c0_237] {strides = array<i32: 2, 1>} : memref<8x128xf32, #tpu.memory_space<vmem>>, vector<4x128xf32>
    %211 = arith.maximumf %209, %210 : vector<4x128xf32>
    %212 = arith.truncf %211 : vector<4x128xf32> to vector<4x128xbf16>
    %c4_238 = arith.constant 4 : index
    %c1_239 = arith.constant 1 : index
    %c0_240 = arith.constant 0 : index
    %213 = vector.load %arg12[%c4_238, %c1_239, %c0_240] : memref<6x6x128xbf16, #tpu.memory_space<vmem>>, vector<1x4x128xbf16>
    %214 = vector.shape_cast %213 : vector<1x4x128xbf16> to vector<4x128xbf16>
    %215 = vector.shape_cast %212 : vector<4x128xbf16> to vector<1x4x128xbf16>
    tpu.vector_store %arg12[%c4_238, %c1_239, %c0_240], %215 {strides = array<i32>} : memref<6x6x128xbf16, #tpu.memory_space<vmem>>, vector<1x4x128xbf16>,
    %cst_241 = arith.constant 0.000000e+00 : f32
    %216 = vector.broadcast %cst_241 : f32 to vector<1x128xf32>
    %cst_242 = arith.constant 0.000000e+00 : f32
    %217 = vector.broadcast %cst_242 : f32 to vector<8x128xf32>
    %c0_243 = arith.constant 0 : index
    %c0_244 = arith.constant 0 : index
    %c0_245 = arith.constant 0 : index
    %218 = vector.load %arg12[%c0_243, %c0_244, %c0_245] : memref<6x6x128xbf16, #tpu.memory_space<vmem>>, vector<2x4x64xbf16>
    %c0_246 = arith.constant 0 : index
    %c1_247 = arith.constant 1 : index
    %c0_248 = arith.constant 0 : index
    %219 = vector.load %arg12[%c0_246, %c1_247, %c0_248] : memref<6x6x128xbf16, #tpu.memory_space<vmem>>, vector<2x4x64xbf16>
    %220 = tpu.concatenate %218, %219 in 2 : vector<2x4x64xbf16>, vector<2x4x64xbf16> -> vector<2x4x128xbf16>
    %221 = vector.shape_cast %220 : vector<2x4x128xbf16> to vector<8x128xbf16>
    %c0_249 = arith.constant 0 : index
    %c0_250 = arith.constant 0 : index
    %c0_251 = arith.constant 0 : index
    %222 = vector.load %arg6[%c0_249, %c0_250, %c0_251] : memref<5x128x128xbf16, #tpu.memory_space<vmem>>, vector<1x128x128xbf16>
    %223 = vector.shape_cast %222 : vector<1x128x128xbf16> to vector<128x128xbf16>
    %cst_252 = arith.constant dense<0.000000e+00> : vector<8x128xf32>
    %224 = tpu.matmul %221, %223, %cst_252 {dimension_numbers = #tpu.dot_dimension_numbers<[1], [0], [0], [1], [0, 0, 1, 1], [], []>} : vector<8x128xbf16>, vector<128x128xbf16>, vector<8x128xf32> -> vector<8x128xf32>
    %225 = arith.addf %217, %224 : vector<8x128xf32>
    %c0_253 = arith.constant 0 : index
    %c2_254 = arith.constant 2 : index
    %c0_255 = arith.constant 0 : index
    %226 = vector.load %arg12[%c0_253, %c2_254, %c0_255] : memref<6x6x128xbf16, #tpu.memory_space<vmem>>, vector<2x4x64xbf16>
    %c1_256 = arith.constant 1 : index
    %c0_257 = arith.constant 0 : index
    %c0_258 = arith.constant 0 : index
    %227 = vector.load %arg12[%c1_256, %c0_257, %c0_258] : memref<6x6x128xbf16, #tpu.memory_space<vmem>>, vector<2x4x64xbf16>
    %228 = tpu.concatenate %226, %227 in 2 : vector<2x4x64xbf16>, vector<2x4x64xbf16> -> vector<2x4x128xbf16>
    %229 = vector.shape_cast %228 : vector<2x4x128xbf16> to vector<8x128xbf16>
    %c1_259 = arith.constant 1 : index
    %c0_260 = arith.constant 0 : index
    %c0_261 = arith.constant 0 : index
    %230 = vector.load %arg6[%c1_259, %c0_260, %c0_261] : memref<5x128x128xbf16, #tpu.memory_space<vmem>>, vector<1x128x128xbf16>
    %231 = vector.shape_cast %230 : vector<1x128x128xbf16> to vector<128x128xbf16>
    %cst_262 = arith.constant dense<0.000000e+00> : vector<8x128xf32>
    %232 = tpu.matmul %229, %231, %cst_262 {dimension_numbers = #tpu.dot_dimension_numbers<[1], [0], [0], [1], [0, 0, 1, 1], [], []>} : vector<8x128xbf16>, vector<128x128xbf16>, vector<8x128xf32> -> vector<8x128xf32>
    %233 = arith.addf %225, %232 : vector<8x128xf32>
    %c1_263 = arith.constant 1 : index
    %c1_264 = arith.constant 1 : index
    %c0_265 = arith.constant 0 : index
    %234 = vector.load %arg12[%c1_263, %c1_264, %c0_265] : memref<6x6x128xbf16, #tpu.memory_space<vmem>>, vector<2x4x64xbf16>
    %c1_266 = arith.constant 1 : index
    %c2_267 = arith.constant 2 : index
    %c0_268 = arith.constant 0 : index
    %235 = vector.load %arg12[%c1_266, %c2_267, %c0_268] : memref<6x6x128xbf16, #tpu.memory_space<vmem>>, vector<2x4x64xbf16>
    %236 = tpu.concatenate %234, %235 in 2 : vector<2x4x64xbf16>, vector<2x4x64xbf16> -> vector<2x4x128xbf16>
    %237 = vector.shape_cast %236 : vector<2x4x128xbf16> to vector<8x128xbf16>
    %c2_269 = arith.constant 2 : index
    %c0_270 = arith.constant 0 : index
    %c0_271 = arith.constant 0 : index
    %238 = vector.load %arg6[%c2_269, %c0_270, %c0_271] : memref<5x128x128xbf16, #tpu.memory_space<vmem>>, vector<1x128x128xbf16>
    %239 = vector.shape_cast %238 : vector<1x128x128xbf16> to vector<128x128xbf16>
    %cst_272 = arith.constant dense<0.000000e+00> : vector<8x128xf32>
    %240 = tpu.matmul %237, %239, %cst_272 {dimension_numbers = #tpu.dot_dimension_numbers<[1], [0], [0], [1], [0, 0, 1, 1], [], []>} : vector<8x128xbf16>, vector<128x128xbf16>, vector<8x128xf32> -> vector<8x128xf32>
    %241 = arith.addf %233, %240 : vector<8x128xf32>
    %c2_273 = arith.constant 2 : index
    %c0_274 = arith.constant 0 : index
    %c0_275 = arith.constant 0 : index
    %242 = vector.load %arg12[%c2_273, %c0_274, %c0_275] : memref<6x6x128xbf16, #tpu.memory_space<vmem>>, vector<2x4x64xbf16>
    %c2_276 = arith.constant 2 : index
    %c1_277 = arith.constant 1 : index
    %c0_278 = arith.constant 0 : index
    %243 = vector.load %arg12[%c2_276, %c1_277, %c0_278] : memref<6x6x128xbf16, #tpu.memory_space<vmem>>, vector<2x4x64xbf16>
    %244 = tpu.concatenate %242, %243 in 2 : vector<2x4x64xbf16>, vector<2x4x64xbf16> -> vector<2x4x128xbf16>
    %245 = vector.shape_cast %244 : vector<2x4x128xbf16> to vector<8x128xbf16>
    %c3_279 = arith.constant 3 : index
    %c0_280 = arith.constant 0 : index
    %c0_281 = arith.constant 0 : index
    %246 = vector.load %arg6[%c3_279, %c0_280, %c0_281] : memref<5x128x128xbf16, #tpu.memory_space<vmem>>, vector<1x128x128xbf16>
    %247 = vector.shape_cast %246 : vector<1x128x128xbf16> to vector<128x128xbf16>
    %cst_282 = arith.constant dense<0.000000e+00> : vector<8x128xf32>
    %248 = tpu.matmul %245, %247, %cst_282 {dimension_numbers = #tpu.dot_dimension_numbers<[1], [0], [0], [1], [0, 0, 1, 1], [], []>} : vector<8x128xbf16>, vector<128x128xbf16>, vector<8x128xf32> -> vector<8x128xf32>
    %249 = arith.addf %241, %248 : vector<8x128xf32>
    %c2_283 = arith.constant 2 : index
    %c2_284 = arith.constant 2 : index
    %c0_285 = arith.constant 0 : index
    %250 = vector.load %arg12[%c2_283, %c2_284, %c0_285] : memref<6x6x128xbf16, #tpu.memory_space<vmem>>, vector<2x4x64xbf16>
    %cst_286 = arith.constant 0.000000e+00 : bf16
    %251 = vector.broadcast %cst_286 : bf16 to vector<2x4x64xbf16>
    %252 = tpu.concatenate %250, %251 in 2 : vector<2x4x64xbf16>, vector<2x4x64xbf16> -> vector<2x4x128xbf16>
    %253 = vector.shape_cast %252 : vector<2x4x128xbf16> to vector<8x128xbf16>
    %c4_287 = arith.constant 4 : index
    %c0_288 = arith.constant 0 : index
    %c0_289 = arith.constant 0 : index
    %254 = vector.load %arg6[%c4_287, %c0_288, %c0_289] : memref<5x128x128xbf16, #tpu.memory_space<vmem>>, vector<1x128x128xbf16>
    %255 = vector.shape_cast %254 : vector<1x128x128xbf16> to vector<128x128xbf16>
    %cst_290 = arith.constant dense<0.000000e+00> : vector<8x128xf32>
    %256 = tpu.matmul %253, %255, %cst_290 {dimension_numbers = #tpu.dot_dimension_numbers<[1], [0], [0], [1], [0, 0, 1, 1], [], []>} : vector<8x128xbf16>, vector<128x128xbf16>, vector<8x128xf32> -> vector<8x128xf32>
    %257 = arith.addf %249, %256 : vector<8x128xf32>
    %c0_291 = arith.constant 0 : index
    %c0_292 = arith.constant 0 : index
    %258 = vector.load %arg7[%c0_291, %c0_292] : memref<1x128xf32, #tpu.memory_space<vmem>>, vector<1x128xf32>
    %259 = vector.broadcast %258 : vector<1x128xf32> to vector<8x128xf32>
    %260 = arith.addf %257, %259 : vector<8x128xf32>
    %cst_293 = arith.constant 0.000000e+00 : f32
    %261 = vector.broadcast %cst_293 : f32 to vector<8x128xf32>
    %262 = arith.maximumf %260, %261 : vector<8x128xf32>
    %263 = vector.shape_cast %262 : vector<8x128xf32> to vector<2x4x128xf32>
    %264 = vector.extract_strided_slice %263 {offsets = [0, 0, 0], sizes = [1, 4, 128], strides = [1, 1, 1]} : vector<2x4x128xf32> to vector<1x4x128xf32>
    %265 = vector.shape_cast %264 : vector<1x4x128xf32> to vector<4x128xf32>
    %266 = vector.extract_strided_slice %263 {offsets = [1, 0, 0], sizes = [1, 4, 128], strides = [1, 1, 1]} : vector<2x4x128xf32> to vector<1x4x128xf32>
    %267 = vector.shape_cast %266 : vector<1x4x128xf32> to vector<4x128xf32>
    %268 = arith.maximumf %265, %267 : vector<4x128xf32>
    %c0_294 = arith.constant 0 : index
    %c0_295 = arith.constant 0 : index
    %269 = vector.load %arg14[%c0_294, %c0_295] : memref<4x128xf32, #tpu.memory_space<vmem>>, vector<4x128xf32>
    tpu.vector_store %arg14[%c0_294, %c0_295], %268 {strides = array<i32>} : memref<4x128xf32, #tpu.memory_space<vmem>>, vector<4x128xf32>,
    %c0_296 = arith.constant 0 : index
    %c0_297 = arith.constant 0 : index
    %270 = tpu.strided_load %arg14[%c0_296, %c0_297] {strides = array<i32: 2, 1>} : memref<4x128xf32, #tpu.memory_space<vmem>>, vector<2x128xf32>
    %c1_298 = arith.constant 1 : index
    %c0_299 = arith.constant 0 : index
    %271 = tpu.strided_load %arg14[%c1_298, %c0_299] {strides = array<i32: 2, 1>} : memref<4x128xf32, #tpu.memory_space<vmem>>, vector<2x128xf32>
    %272 = arith.maximumf %270, %271 : vector<2x128xf32>
    %cst_300 = arith.constant dense<0.000000e+00> : vector<128xf32>
    %273 = vector.multi_reduction <add>, %272, %cst_300 [0] : vector<2x128xf32> to vector<128xf32>
    %274 = vector.shape_cast %273 : vector<128xf32> to vector<1x128xf32>
    %275 = arith.addf %216, %274 : vector<1x128xf32>
    %cst_301 = arith.constant 0.000000e+00 : f32
    %276 = vector.broadcast %cst_301 : f32 to vector<8x128xf32>
    %c2_302 = arith.constant 2 : index
    %c0_303 = arith.constant 0 : index
    %c0_304 = arith.constant 0 : index
    %277 = vector.load %arg12[%c2_302, %c0_303, %c0_304] : memref<6x6x128xbf16, #tpu.memory_space<vmem>>, vector<2x4x64xbf16>
    %c2_305 = arith.constant 2 : index
    %c1_306 = arith.constant 1 : index
    %c0_307 = arith.constant 0 : index
    %278 = vector.load %arg12[%c2_305, %c1_306, %c0_307] : memref<6x6x128xbf16, #tpu.memory_space<vmem>>, vector<2x4x64xbf16>
    %279 = tpu.concatenate %277, %278 in 2 : vector<2x4x64xbf16>, vector<2x4x64xbf16> -> vector<2x4x128xbf16>
    %280 = vector.shape_cast %279 : vector<2x4x128xbf16> to vector<8x128xbf16>
    %c0_308 = arith.constant 0 : index
    %c0_309 = arith.constant 0 : index
    %c0_310 = arith.constant 0 : index
    %281 = vector.load %arg6[%c0_308, %c0_309, %c0_310] : memref<5x128x128xbf16, #tpu.memory_space<vmem>>, vector<1x128x128xbf16>
    %282 = vector.shape_cast %281 : vector<1x128x128xbf16> to vector<128x128xbf16>
    %cst_311 = arith.constant dense<0.000000e+00> : vector<8x128xf32>
    %283 = tpu.matmul %280, %282, %cst_311 {dimension_numbers = #tpu.dot_dimension_numbers<[1], [0], [0], [1], [0, 0, 1, 1], [], []>} : vector<8x128xbf16>, vector<128x128xbf16>, vector<8x128xf32> -> vector<8x128xf32>
    %284 = arith.addf %276, %283 : vector<8x128xf32>
    %c2_312 = arith.constant 2 : index
    %c2_313 = arith.constant 2 : index
    %c0_314 = arith.constant 0 : index
    %285 = vector.load %arg12[%c2_312, %c2_313, %c0_314] : memref<6x6x128xbf16, #tpu.memory_space<vmem>>, vector<2x4x64xbf16>
    %c3_315 = arith.constant 3 : index
    %c0_316 = arith.constant 0 : index
    %c0_317 = arith.constant 0 : index
    %286 = vector.load %arg12[%c3_315, %c0_316, %c0_317] : memref<6x6x128xbf16, #tpu.memory_space<vmem>>, vector<2x4x64xbf16>
    %287 = tpu.concatenate %285, %286 in 2 : vector<2x4x64xbf16>, vector<2x4x64xbf16> -> vector<2x4x128xbf16>
    %288 = vector.shape_cast %287 : vector<2x4x128xbf16> to vector<8x128xbf16>
    %c1_318 = arith.constant 1 : index
    %c0_319 = arith.constant 0 : index
    %c0_320 = arith.constant 0 : index
    %289 = vector.load %arg6[%c1_318, %c0_319, %c0_320] : memref<5x128x128xbf16, #tpu.memory_space<vmem>>, vector<1x128x128xbf16>
    %290 = vector.shape_cast %289 : vector<1x128x128xbf16> to vector<128x128xbf16>
    %cst_321 = arith.constant dense<0.000000e+00> : vector<8x128xf32>
    %291 = tpu.matmul %288, %290, %cst_321 {dimension_numbers = #tpu.dot_dimension_numbers<[1], [0], [0], [1], [0, 0, 1, 1], [], []>} : vector<8x128xbf16>, vector<128x128xbf16>, vector<8x128xf32> -> vector<8x128xf32>
    %292 = arith.addf %284, %291 : vector<8x128xf32>
    %c3_322 = arith.constant 3 : index
    %c1_323 = arith.constant 1 : index
    %c0_324 = arith.constant 0 : index
    %293 = vector.load %arg12[%c3_322, %c1_323, %c0_324] : memref<6x6x128xbf16, #tpu.memory_space<vmem>>, vector<2x4x64xbf16>
    %c3_325 = arith.constant 3 : index
    %c2_326 = arith.constant 2 : index
    %c0_327 = arith.constant 0 : index
    %294 = vector.load %arg12[%c3_325, %c2_326, %c0_327] : memref<6x6x128xbf16, #tpu.memory_space<vmem>>, vector<2x4x64xbf16>
    %295 = tpu.concatenate %293, %294 in 2 : vector<2x4x64xbf16>, vector<2x4x64xbf16> -> vector<2x4x128xbf16>
    %296 = vector.shape_cast %295 : vector<2x4x128xbf16> to vector<8x128xbf16>
    %c2_328 = arith.constant 2 : index
    %c0_329 = arith.constant 0 : index
    %c0_330 = arith.constant 0 : index
    %297 = vector.load %arg6[%c2_328, %c0_329, %c0_330] : memref<5x128x128xbf16, #tpu.memory_space<vmem>>, vector<1x128x128xbf16>
    %298 = vector.shape_cast %297 : vector<1x128x128xbf16> to vector<128x128xbf16>
    %cst_331 = arith.constant dense<0.000000e+00> : vector<8x128xf32>
    %299 = tpu.matmul %296, %298, %cst_331 {dimension_numbers = #tpu.dot_dimension_numbers<[1], [0], [0], [1], [0, 0, 1, 1], [], []>} : vector<8x128xbf16>, vector<128x128xbf16>, vector<8x128xf32> -> vector<8x128xf32>
    %300 = arith.addf %292, %299 : vector<8x128xf32>
    %c4_332 = arith.constant 4 : index
    %c0_333 = arith.constant 0 : index
    %c0_334 = arith.constant 0 : index
    %301 = vector.load %arg12[%c4_332, %c0_333, %c0_334] : memref<6x6x128xbf16, #tpu.memory_space<vmem>>, vector<2x4x64xbf16>
    %c4_335 = arith.constant 4 : index
    %c1_336 = arith.constant 1 : index
    %c0_337 = arith.constant 0 : index
    %302 = vector.load %arg12[%c4_335, %c1_336, %c0_337] : memref<6x6x128xbf16, #tpu.memory_space<vmem>>, vector<2x4x64xbf16>
    %303 = tpu.concatenate %301, %302 in 2 : vector<2x4x64xbf16>, vector<2x4x64xbf16> -> vector<2x4x128xbf16>
    %304 = vector.shape_cast %303 : vector<2x4x128xbf16> to vector<8x128xbf16>
    %c3_338 = arith.constant 3 : index
    %c0_339 = arith.constant 0 : index
    %c0_340 = arith.constant 0 : index
    %305 = vector.load %arg6[%c3_338, %c0_339, %c0_340] : memref<5x128x128xbf16, #tpu.memory_space<vmem>>, vector<1x128x128xbf16>
    %306 = vector.shape_cast %305 : vector<1x128x128xbf16> to vector<128x128xbf16>
    %cst_341 = arith.constant dense<0.000000e+00> : vector<8x128xf32>
    %307 = tpu.matmul %304, %306, %cst_341 {dimension_numbers = #tpu.dot_dimension_numbers<[1], [0], [0], [1], [0, 0, 1, 1], [], []>} : vector<8x128xbf16>, vector<128x128xbf16>, vector<8x128xf32> -> vector<8x128xf32>
    %308 = arith.addf %300, %307 : vector<8x128xf32>
    %c4_342 = arith.constant 4 : index
    %c2_343 = arith.constant 2 : index
    %c0_344 = arith.constant 0 : index
    %309 = vector.load %arg12[%c4_342, %c2_343, %c0_344] : memref<6x6x128xbf16, #tpu.memory_space<vmem>>, vector<2x4x64xbf16>
    %cst_345 = arith.constant 0.000000e+00 : bf16
    %310 = vector.broadcast %cst_345 : bf16 to vector<2x4x64xbf16>
    %311 = tpu.concatenate %309, %310 in 2 : vector<2x4x64xbf16>, vector<2x4x64xbf16> -> vector<2x4x128xbf16>
    %312 = vector.shape_cast %311 : vector<2x4x128xbf16> to vector<8x128xbf16>
    %c4_346 = arith.constant 4 : index
    %c0_347 = arith.constant 0 : index
    %c0_348 = arith.constant 0 : index
    %313 = vector.load %arg6[%c4_346, %c0_347, %c0_348] : memref<5x128x128xbf16, #tpu.memory_space<vmem>>, vector<1x128x128xbf16>
    %314 = vector.shape_cast %313 : vector<1x128x128xbf16> to vector<128x128xbf16>
    %cst_349 = arith.constant dense<0.000000e+00> : vector<8x128xf32>
    %315 = tpu.matmul %312, %314, %cst_349 {dimension_numbers = #tpu.dot_dimension_numbers<[1], [0], [0], [1], [0, 0, 1, 1], [], []>} : vector<8x128xbf16>, vector<128x128xbf16>, vector<8x128xf32> -> vector<8x128xf32>
    %316 = arith.addf %308, %315 : vector<8x128xf32>
    %c0_350 = arith.constant 0 : index
    %c0_351 = arith.constant 0 : index
    %317 = vector.load %arg7[%c0_350, %c0_351] : memref<1x128xf32, #tpu.memory_space<vmem>>, vector<1x128xf32>
    %318 = vector.broadcast %317 : vector<1x128xf32> to vector<8x128xf32>
    %319 = arith.addf %316, %318 : vector<8x128xf32>
    %cst_352 = arith.constant 0.000000e+00 : f32
    %320 = vector.broadcast %cst_352 : f32 to vector<8x128xf32>
    %321 = arith.maximumf %319, %320 : vector<8x128xf32>
    %322 = vector.shape_cast %321 : vector<8x128xf32> to vector<2x4x128xf32>
    %323 = vector.extract_strided_slice %322 {offsets = [0, 0, 0], sizes = [1, 4, 128], strides = [1, 1, 1]} : vector<2x4x128xf32> to vector<1x4x128xf32>
    %324 = vector.shape_cast %323 : vector<1x4x128xf32> to vector<4x128xf32>
    %325 = vector.extract_strided_slice %322 {offsets = [1, 0, 0], sizes = [1, 4, 128], strides = [1, 1, 1]} : vector<2x4x128xf32> to vector<1x4x128xf32>
    %326 = vector.shape_cast %325 : vector<1x4x128xf32> to vector<4x128xf32>
    %327 = arith.maximumf %324, %326 : vector<4x128xf32>
    %c0_353 = arith.constant 0 : index
    %c0_354 = arith.constant 0 : index
    %328 = vector.load %arg14[%c0_353, %c0_354] : memref<4x128xf32, #tpu.memory_space<vmem>>, vector<4x128xf32>
    tpu.vector_store %arg14[%c0_353, %c0_354], %327 {strides = array<i32>} : memref<4x128xf32, #tpu.memory_space<vmem>>, vector<4x128xf32>,
    %c0_355 = arith.constant 0 : index
    %c0_356 = arith.constant 0 : index
    %329 = tpu.strided_load %arg14[%c0_355, %c0_356] {strides = array<i32: 2, 1>} : memref<4x128xf32, #tpu.memory_space<vmem>>, vector<2x128xf32>
    %c1_357 = arith.constant 1 : index
    %c0_358 = arith.constant 0 : index
    %330 = tpu.strided_load %arg14[%c1_357, %c0_358] {strides = array<i32: 2, 1>} : memref<4x128xf32, #tpu.memory_space<vmem>>, vector<2x128xf32>
    %331 = arith.maximumf %329, %330 : vector<2x128xf32>
    %cst_359 = arith.constant dense<0.000000e+00> : vector<128xf32>
    %332 = vector.multi_reduction <add>, %331, %cst_359 [0] : vector<2x128xf32> to vector<128xf32>
    %333 = vector.shape_cast %332 : vector<128xf32> to vector<1x128xf32>
    %334 = arith.addf %275, %333 : vector<1x128xf32>
    %cst_360 = arith.constant 2.500000e-01 : f32
    %335 = vector.broadcast %cst_360 : f32 to vector<1x128xf32>
    %336 = arith.mulf %334, %335 : vector<1x128xf32>
    %337 = vector.shape_cast %336 : vector<1x128xf32> to vector<1x128xf32>
    %338 = vector.broadcast %337 : vector<1x128xf32> to vector<8x128xf32>
    %339 = arith.truncf %338 : vector<8x128xf32> to vector<8x128xbf16>
    %c0_361 = arith.constant 0 : index
    %c0_362 = arith.constant 0 : index
    %340 = vector.load %arg8[%c0_361, %c0_362] : memref<128x128xbf16, #tpu.memory_space<vmem>>, vector<128x128xbf16>
    %cst_363 = arith.constant dense<0.000000e+00> : vector<8x128xf32>
    %341 = tpu.matmul %339, %340, %cst_363 {dimension_numbers = #tpu.dot_dimension_numbers<[1], [0], [0], [1], [0, 0, 1, 1], [], []>} : vector<8x128xbf16>, vector<128x128xbf16>, vector<8x128xf32> -> vector<8x128xf32>
    %c0_364 = arith.constant 0 : index
    %c0_365 = arith.constant 0 : index
    %342 = vector.load %arg9[%c0_364, %c0_365] : memref<1x128xf32, #tpu.memory_space<vmem>>, vector<1x128xf32>
    %343 = vector.broadcast %342 : vector<1x128xf32> to vector<8x128xf32>
    %344 = arith.addf %341, %343 : vector<8x128xf32>
    %c0_366 = arith.constant 0 : index
    %c0_367 = arith.constant 0 : index
    %c0_368 = arith.constant 0 : index
    %345 = vector.load %arg10[%c0_366, %c0_367, %c0_368] : memref<1x8x128xf32, #tpu.memory_space<vmem>>, vector<1x8x128xf32>
    %346 = vector.shape_cast %345 : vector<1x8x128xf32> to vector<8x128xf32>
    %347 = vector.shape_cast %344 : vector<8x128xf32> to vector<1x8x128xf32>
    tpu.vector_store %arg10[%c0_366, %c0_367, %c0_368], %347 {strides = array<i32>} : memref<1x8x128xf32, #tpu.memory_space<vmem>>, vector<1x8x128xf32>,
    return
  }
  func.func @transform_0(%arg0: i32) -> (i32, i32, i32) {
    %c0_i32 = arith.constant 0 : i32
    %c0_i32_0 = arith.constant 0 : i32
    %c0_i32_1 = arith.constant 0 : i32
    return %arg0, %c0_i32, %c0_i32_0 : i32, i32, i32
  }
  func.func @transform_1(%arg0: i32) -> (i32, i32) {
    %c0_i32 = arith.constant 0 : i32
    %c0_i32_0 = arith.constant 0 : i32
    %c0_i32_1 = arith.constant 0 : i32
    return %c0_i32, %c0_i32_0 : i32, i32
  }
  func.func @transform_2(%arg0: i32) -> (i32, i32) {
    %c0_i32 = arith.constant 0 : i32
    %c0_i32_0 = arith.constant 0 : i32
    %c0_i32_1 = arith.constant 0 : i32
    return %c0_i32, %c0_i32_0 : i32, i32
  }
  func.func @transform_3(%arg0: i32) -> (i32, i32, i32) {
    %c0_i32 = arith.constant 0 : i32
    %c0_i32_0 = arith.constant 0 : i32
    %c0_i32_1 = arith.constant 0 : i32
    %c0_i32_2 = arith.constant 0 : i32
    return %c0_i32, %c0_i32_0, %c0_i32_1 : i32, i32, i32
  }
  func.func @transform_4(%arg0: i32) -> (i32, i32) {
    %c0_i32 = arith.constant 0 : i32
    %c0_i32_0 = arith.constant 0 : i32
    %c0_i32_1 = arith.constant 0 : i32
    return %c0_i32, %c0_i32_0 : i32, i32
  }
  func.func @transform_5(%arg0: i32) -> (i32, i32, i32) {
    %c0_i32 = arith.constant 0 : i32
    %c0_i32_0 = arith.constant 0 : i32
    %c0_i32_1 = arith.constant 0 : i32
    %c0_i32_2 = arith.constant 0 : i32
    return %c0_i32, %c0_i32_0, %c0_i32_1 : i32, i32, i32
  }
  func.func @transform_6(%arg0: i32) -> (i32, i32) {
    %c0_i32 = arith.constant 0 : i32
    %c0_i32_0 = arith.constant 0 : i32
    %c0_i32_1 = arith.constant 0 : i32
    return %c0_i32, %c0_i32_0 : i32, i32
  }
  func.func @transform_7(%arg0: i32) -> (i32, i32) {
    %c0_i32 = arith.constant 0 : i32
    %c0_i32_0 = arith.constant 0 : i32
    %c0_i32_1 = arith.constant 0 : i32
    return %c0_i32, %c0_i32_0 : i32, i32
  }
  func.func @transform_8(%arg0: i32) -> (i32, i32) {
    %c0_i32 = arith.constant 0 : i32
    %c0_i32_0 = arith.constant 0 : i32
    %c0_i32_1 = arith.constant 0 : i32
    return %c0_i32, %c0_i32_0 : i32, i32
  }
  func.func @transform_9(%arg0: i32) -> (i32, i32, i32) {
    %c0_i32 = arith.constant 0 : i32
    %c0_i32_0 = arith.constant 0 : i32
    %c0_i32_1 = arith.constant 0 : i32
    return %arg0, %c0_i32, %c0_i32_0 : i32, i32, i32
  }
}

</mosaic_0001>

<bundles_post_ra>
// kernel: basic_cnn_forward.1
= control target key start
LH: loop header
LB: loop body
LE: loop exit
PB: predicated region body
PF: predicated region fallthrough
CT: control target
= control target key end

     0   :  { %s6623_s30 = smov 0   ;;  %s8178_s0 = inlined_call_operand.vmem [shape: bf16[2,64,32], index: 0, kind: input, shape index: {}]   ;;  %s8179_s1 = inlined_call_operand.vmem [shape: bf16[32,128], index: 1, kind: input, shape index: {}]   ;;  %s8180_s2 = inlined_call_operand.vmem [shape: f32[1,128], index: 2, kind: input, shape index: {}]   ;;  %s8181_s3 = inlined_call_operand.vmem [shape: bf16[3,128,128], index: 3, kind: input, shape index: {}]   ;;  %s8182_s4 = inlined_call_operand.vmem [shape: f32[1,128], index: 4, kind: input, shape index: {}]   ;;  %s8183_s5 = inlined_call_operand.vmem [shape: bf16[5,128,128], index: 5, kind: input, shape index: {}]   ;;  %s8184_s6 = inlined_call_operand.vmem [shape: f32[1,128], index: 6, kind: input, shape index: {}]   ;;  %s8185_s7 = inlined_call_operand.vmem [shape: bf16[128,128], index: 7, kind: input, shape index: {}]   ;;  %s8186_s8 = inlined_call_operand.vmem [shape: f32[1,128], index: 8, kind: input, shape index: {}]   ;;  %s8187_s9 = inlined_call_operand.vmem [shape: f32[2,8,128], index: 9, kind: output, shape index: {}]  }
   0x1 LB: > { %s4956_s10 = sadd.s32 4294967295, %s6564_s30   ;;  %p4960_p0 = scmp.ge.s32.totalorder %s6564_s30, 1  ;;  %s6564_s30 = sphi %s6623_s30, %s19_s30  }
   0x2   : > { %p287_p1 = scmp.lt.s32.totalorder %s6564_s30, 3 }
   0x4   : > { %p288_p2 = pnand %p4960_p0, %p287_p1 }
   0x6   : > { %291 = sbr.rel (%p288_p2) target bundleno = 1485 (0x5cd), region = 56 }
   0xd   : > { %v6289_v0 = vld [vmem:[%s8179_s1] sm:$0xff]   ;;  %p322_p3 = scmp.lt.s32.totalorder %s4956_s10, 1  ;;  %v6290_v1 = vld [vmem:[%s8179_s1 + $0x8] sm:$0xff]   ;;  %vm383_vm0 = vcmask 261120   ;;  %vm589_vm1 = vsmask.f32 256 }
   0xe   : > { %5802 = vmatprep.subr.bf16.mxu0 %v6289_v0  ;;  %vm588_vm2 = vcmask 1040384   ;;  %v6566_v6 = vmov 0   ;;  %vm583_vm3 = vsmask.f32 7938  ;;  %v8193_v7 = vmov 0  ;;  %v6358_v32 = vld [vmem:[%s8181_s3 + $0x40] sm:$0xff]  }
   0xf   : > { %s8224_s10 = smov (!%p322_p3, %s4956_s10), 1  ;;  %5803 = vmatpush3.bf16.msra.mxu0 %v6289_v0  ;;  %636 = vst [vmem:[#allocation2] sm:$0xf] %v6566_v6  ;;  %637 = vst [vmem:[#allocation2 + $0x4] sm:$0x1] %v6566_v6  ;;  %v6359_v33 = vld [vmem:[%s8181_s3] sm:$0xff]  }
  0x10   : > { %5804 = vmatprep.subr.bf16.mxu0 %v6290_v1  ;;  %s5576_s15 = sshll.u32 %s8224_s10, 5  ;;  %639 = vst [vmem:[#allocation2 + $0x48] sm:$0xf] %v6566_v6  ;;  %640 = vst [vmem:[#allocation2 + $0x4c] sm:$0x1] %v6566_v6  ;;  %vm582_vm6 = vcmask 1043456  }
  0x11   : > { %s326_s18 = scalar_lea.vmem %s8178_s0, %s5576_s15  ;;  %702 = vst [vmem:[#allocation3] sm:$0x7] %v6566_v6  ;;  %704 = vst [vmem:[#allocation3 + $0x14] sm:$0x7] %v6566_v6  ;;  %v6669_v17 = vld [vmem:[%s8180_s2] ss:$0 sm:$0xff] }
  0x12   : > { %v6291_v2 = vld [vmem:[%s326_s18] sm:$0xff]   ;;  %v6292_v3 = vld [vmem:[%s326_s18 + $0x8] sm:$0xff]   ;;  %v6293_v4 = vld [vmem:[%s326_s18 + $0x10] sm:$0xff]   ;;  %v8188_v36 = vmov 0.0   ;;  %s6568_s20 = smov 64   ;;  %s6569_s21 = smov 32  }
  0x13   : > { %5805 = vmatpush3.bf16.msra.mxu0 %v6290_v1  ;;  %5806 = vmatprep.mubr.msk.bf16.mxu0 %vm383_vm0, %v6291_v2  ;;  %v6294_v5 = vld [vmem:[%s326_s18 + $0x18] sm:$0xff]   ;;  %vm6648_vm4 = vmand %vm588_vm2, %vm589_vm1  ;;  %v6360_v44 = vld [vmem:[%s8181_s3 + $0x48] sm:$0xff]   ;;  %s6570_s24 = smov 96   ;;  %vm1190_vm8 = vcmask 1042432   ;;  %vm1191_vm9 = vcmask 1046532   ;;  %vm6571_vm11 = vmmov 0  }
  0x14   : > { %v8194_v7 = vsel %vm6648_vm4, 4294967295, %v8193_v7  ;;  %vm6654_vm5 = vmand %vm588_vm2, %vm583_vm3  ;;  %5814 = vmatprep.subr.bf16.mxu1 %v8188_v36  ;;  %5834 = vmatprep.subr.bf16.mxu0 %v8188_v36  ;;  %v600_v38 = vld [vmem:[#allocation2 + $0x18] sm:$0xf]  ;;  %v603_v39 = vld [vmem:[#allocation2 + $0x1c] sm:$0x1]  ;;  %vm813_vm12 = vcmask 785408  }
  0x15   : > { %8195 = vst [vmem:[#allocation6_spill] sm:$0xff] %v8194_v7  ;;  %5815 = vmatpush3.bf16.msra.mxu1 %v6358_v32  ;;  %v6361_v45 = vld [vmem:[%s8181_s3 + $0x8] sm:$0xff]   ;;  %vm6694_vm7 = vmand %vm582_vm6, %vm583_vm3  ;;  %v606_v62 = vld [vmem:[#allocation2 + $0x20] sm:$0xf]  ;;  %vm808_vm13 = vcmask 523264   ;;  %s4963_s27 = sshll.u32 %s8224_s10, 3 }
  0x16   : > { %5807 = vmatmul.mubr.msk.bf16.vlgmr.msra.gmra.mrb[0].mxu0 %vm383_vm0, %v6292_v3  ;;  %v641_v9 = vld [vmem:[#allocation2] sm:$0x1]  ;;  %v672_v10 = vld [vmem:[#allocation2 + $0x4] sm:$0x1]  ;;  %v585_v47 = vld [vmem:[#allocation2 + $0x8] sm:$0xf]  ;;  %5816 = vmatprep.subr.bf16.mxu1 %v8188_v36  ;;  %s330_s13 = scalar_lea.vmem %s8187_s9, %s4963_s27 }
  0x17   : > { %5810 = vmatprep.mubr.msk.bf16.mxu0 %vm383_vm0, %v6293_v4  ;;  %v642_v11 = vsel %vm6648_vm4, 0, %v641_v9  ;;  %v673_v12 = vsel %vm6654_vm5, 0, %v672_v10  ;;  %v699_v13 = vld [vmem:[#allocation2 + $0x4c] sm:$0x1]  ;;  %v668_v15 = vld [vmem:[#allocation2 + $0x48] sm:$0x1]  ;;  %5835 = vmatpush3.bf16.msra.mxu0 %v6359_v33  ;;  %vm6967_vm10 = vmor %vm1190_vm8, %vm1191_vm9 }
  0x18   : > { %643 = vst [vmem:[#allocation2] sm:$0x1] %v642_v11  ;;  %674 = vst [vmem:[#allocation2 + $0x4] sm:$0x1] %v673_v12  ;;  %v700_v14 = vsel %vm6654_vm5, 0, %v699_v13  ;;  %v669_v16 = vsel %vm6648_vm4, 0, %v668_v15  ;;  %5836 = vmatprep.subr.bf16.mxu0 %v8188_v36 }
  0x19   : > { %701 = vst [vmem:[#allocation2 + $0x4c] sm:$0x1] %v700_v14  ;;  %670 = vst [vmem:[#allocation2 + $0x48] sm:$0x1] %v669_v16  ;;  %v591_v54 = vld [vmem:[#allocation2 + $0xc] sm:$0x1]  ;;  %5817 = vmatpush3.bf16.msra.mxu1 %v6360_v44 }
  0x1a   : > { %v609_v3 = vld [vmem:[#allocation2 + $0x24] sm:$0x1]  ;;  %v6362_v6 = vld [vmem:[%s8181_s3 + $0x50] sm:$0xff]   ;;  %5818 = vmatprep.subr.bf16.mxu1 %v8188_v36  ;;  %vm931_vm14 = vsmask.f32 3328 }
  0x1b   : > { %5837 = vmatpush3.bf16.msra.mxu0 %v6361_v45  ;;  %v594_v13 = vld [vmem:[#allocation2 + $0x10] sm:$0xf]  ;;  %v597_v14 = vld [vmem:[#allocation2 + $0x14] sm:$0x1]  ;;  %vm932_vm15 = vsmask.f32 7440 }
  0x1c   : > { %5838 = vmatprep.subr.bf16.mxu0 %v8188_v36  ;;  %vm7158_vm1 = vmor %vm931_vm14, %vm932_vm15  ;;  %vm724_vm3 = vsmask.f32 7946  ;;  %vm1343_vm6 = vsmask.f32 2306  ;;  %vm3490_vm14 = vsmask.f32 3336 }
  0x1d   : > { %5819 = vmatpush3.bf16.msra.mxu1 %v6362_v6 }
  0x1e   : > { %5811 = vmatmul.mubr.msk.bf16.gmra.mrb[4].mxu0 %vm383_vm0, %v6294_v5  ;;  %5820 = vmatprep.subr.bf16.mxu1 %v8188_v36 }
  0xe9   : > { %v5808_v18 = vpop.f32.mrb[0].mxu0 }
  0xea   : > { %v439_v19 = vadd.f32 %v5808_v18, %v6669_v17  ;;  %v430_v20 = vpop.f32.mrb[1].mxu0 }
  0xeb   : > { %v431_v21 = vadd.f32 %v6669_v17, %v430_v20  ;;  %v5809_v22 = vpop.f32.mrb[2].mxu0 }
  0xec   : > { %v463_v23 = vmax.f32 %v439_v19, 0.0  ;;  %v442_v24 = vadd.f32 %v5809_v22, %v6669_v17  ;;  %v433_v25 = vpop.f32.mrb[3].mxu0 }
  0xed   : > { %v461_v26 = vmax.f32 %v431_v21, 0.0  ;;  %v434_v27 = vadd.f32 %v6669_v17, %v433_v25 }
  0xee   : > { %v5579_v28 = vpack.c.bf16 %v463_v23, %v463_v23  ;;  %v464_v29 = vmax.f32 %v442_v24, 0.0 }
  0xef   : > { %v5577_v30 = vpack.c.bf16 %v461_v26, %v461_v26  ;;  %v462_v31 = vmax.f32 %v434_v27, 0.0 }
  0xf0   : > { %v518_v34 = vshrl.u32 %v5579_v28, 16  ;;  %v5580_v35 = vpack.c.bf16 %v464_v29, %v464_v29  ;;  %v521_v37 = vshll.u32 %v5579_v28, 16 }
  0xf1   : > { %v502_v40 = vshrl.u32 %v5577_v30, 16  ;;  %v505_v41 = vshll.u32 %v5577_v30, 16  ;;  %v5578_v42 = vpack.c.bf16 %v462_v31, %v462_v31  ;;  %v5812_v43 = vpop.f32.mrb[4].mxu0 }
  0xf2   : > { %v520_v46 = vrot.slane %v518_v34, 7  ;;  %v526_v48 = vshrl.u32 %v5580_v35, 16  ;;  %v529_v49 = vshll.u32 %v5580_v35, 16  ;;  %v455_v50 = vadd.f32 %v5812_v43, %v6669_v17  ;;  %v446_v51 = vpop.f32.mrb[5].mxu0 }
  0xf3   : > { %v504_v53 = vrot.slane %v502_v40, 7  ;;  %v510_v55 = vshrl.u32 %v5578_v42, 16  ;;  %v513_v56 = vshll.u32 %v5578_v42, 16  ;;  %v447_v57 = vadd.f32 %v6669_v17, %v446_v51  ;;  %v5813_v58 = vpop.f32.mrb[6].mxu0  ;;  %v612_v40 = vld [vmem:[#allocation2 + $0x28] sm:$0xf] }
  0xf4   : > { %v523_v59 = vor.u32 %v521_v37, %v520_v46  ;;  %v524_v60 = vrot.slane %v520_v46, 4  ;;  %v528_v61 = vrot.slane %v526_v48, 7  ;;  %v467_v63 = vmax.f32 %v455_v50, 0.0  ;;  %v449_v0 = vpop.f32.mrb[7].mxu0  ;;  %v615_v37 = vld [vmem:[#allocation2 + $0x2c] sm:$0x1] }
  0xf5   : > { %v507_v1 = vor.u32 %v505_v41, %v504_v53  ;;  %v508_v2 = vrot.slane %v504_v53, 4  ;;  %v512_v4 = vrot.slane %v510_v55, 7  ;;  %v465_v5 = vmax.f32 %v447_v57, 0.0 }
  0xf6   : > { %v601_v9 = vsel %vm6694_vm7, %v523_v59, %v600_v38  ;;  %v604_v10 = vsel %vm6648_vm4, %v524_v60, %v603_v39  ;;  %v531_v11 = vor.u32 %v529_v49, %v528_v61  ;;  %v532_v12 = vrot.slane %v528_v61, 4  ;;  %v624_v38 = vld [vmem:[#allocation2 + $0x38] sm:$0xf]  ;;  %v627_v39 = vld [vmem:[#allocation2 + $0x3c] sm:$0x1] }
  0xf7   : > { %602 = vst [vmem:[#allocation2 + $0x18] sm:$0xf] %v601_v9  ;;  %605 = vst [vmem:[#allocation2 + $0x1c] sm:$0x1] %v604_v10  ;;  %v586_v15 = vsel %vm6694_vm7, %v507_v1, %v585_v47  ;;  %v592_v16 = vsel %vm6648_vm4, %v508_v2, %v591_v54  ;;  %v515_v18 = vor.u32 %v513_v56, %v512_v4  ;;  %v516_v19 = vrot.slane %v512_v4, 4  ;;  %v6363_v10 = vld [vmem:[%s8181_s3 + $0x10] sm:$0xff]  }
  0xf8   : > { %587 = vst [vmem:[#allocation2 + $0x8] sm:$0xf] %v586_v15  ;;  %593 = vst [vmem:[#allocation2 + $0xc] sm:$0x1] %v592_v16  ;;  %v607_v20 = vsel %vm6694_vm7, %v531_v11, %v606_v62  ;;  %v610_v21 = vsel %vm6648_vm4, %v532_v12, %v609_v3  ;;  %v5583_v22 = vpack.c.bf16 %v467_v63, %v467_v63  ;;  %v630_v11 = vld [vmem:[#allocation2 + $0x40] sm:$0xf]  ;;  %5839 = vmatpush3.bf16.msra.mxu0 %v6363_v10 }
  0xf9   : > { %v5581_v23 = vpack.c.bf16 %v465_v5, %v465_v5  ;;  %608 = vst [vmem:[#allocation2 + $0x20] sm:$0xf] %v607_v20  ;;  %611 = vst [vmem:[#allocation2 + $0x24] sm:$0x1] %v610_v21  ;;  %v595_v24 = vsel %vm6694_vm7, %v515_v18, %v594_v13  ;;  %v598_v25 = vsel %vm6648_vm4, %v516_v19, %v597_v14  ;;  %v633_v12 = vld [vmem:[#allocation2 + $0x44] sm:$0x1]  ;;  %5840 = vmatprep.subr.bf16.mxu0 %v8188_v36 }
  0xfa   : > { %v458_v26 = vadd.f32 %v5813_v58, %v6669_v17  ;;  %v450_v27 = vadd.f32 %v6669_v17, %v449_v0  ;;  %596 = vst [vmem:[#allocation2 + $0x10] sm:$0xf] %v595_v24  ;;  %599 = vst [vmem:[#allocation2 + $0x14] sm:$0x1] %v598_v25  ;;  %v550_v28 = vshrl.u32 %v5583_v22, 16  ;;  %v553_v29 = vshll.u32 %v5583_v22, 16 }
  0xfb   : > { %v534_v30 = vshrl.u32 %v5581_v23, 16  ;;  %v537_v31 = vshll.u32 %v5581_v23, 16  ;;  %v618_v16 = vld [vmem:[#allocation2 + $0x30] sm:$0xf]  ;;  %v621_v18 = vld [vmem:[#allocation2 + $0x34] sm:$0x1] }
  0xfc   : > { %v468_v32 = vmax.f32 %v458_v26, 0.0  ;;  %v466_v33 = vmax.f32 %v450_v27, 0.0  ;;  %v552_v34 = vrot.slane %v550_v28, 7  ;;  %v6364_v19 = vld [vmem:[%s8181_s3 + $0x58] sm:$0xff]  }
  0xfd   : > { %v536_v35 = vrot.slane %v534_v30, 7  ;;  %5821 = vmatpush3.bf16.msra.mxu1 %v6364_v19 }
  0xfe   : > { %v5584_v41 = vpack.c.bf16 %v468_v32, %v468_v32  ;;  %v650_v42 = vld [vmem:[#allocation2 + $0x18] sm:$0x1]  ;;  %v681_v17 = vld [vmem:[#allocation2 + $0x1c] sm:$0x1]  ;;  %v555_v43 = vor.u32 %v553_v29, %v552_v34  ;;  %v556_v44 = vrot.slane %v552_v34, 4  ;;  %v5582_v51 = vpack.c.bf16 %v466_v33, %v466_v33  ;;  %5822 = vmatprep.subr.bf16.mxu1 %v8188_v36 }
  0xff   : > { %v539_v45 = vor.u32 %v537_v31, %v536_v35  ;;  %v540_v46 = vrot.slane %v536_v35, 4  ;;  %v651_v47 = vsel %vm6648_vm4, 0, %v650_v42  ;;  %v682_v48 = vsel %vm6654_vm5, 0, %v681_v17  ;;  %v644_v49 = vld [vmem:[#allocation2 + $0x8] sm:$0x1] }
 0x100   : > { %v675_v50 = vld [vmem:[#allocation2 + $0xc] sm:$0x1]  ;;  %652 = vst [vmem:[#allocation2 + $0x18] sm:$0x1] %v651_v47  ;;  %683 = vst [vmem:[#allocation2 + $0x1c] sm:$0x1] %v682_v48  ;;  %v625_v57 = vsel %vm6694_vm7, %v555_v43, %v624_v38  ;;  %v628_v58 = vsel %vm6648_vm4, %v556_v44, %v627_v39 }
 0x101   : > { %v645_v53 = vsel %vm6648_vm4, 0, %v644_v49  ;;  %v676_v54 = vsel %vm6654_vm5, 0, %v675_v50  ;;  %v653_v55 = vld [vmem:[#allocation2 + $0x20] sm:$0x1]  ;;  %v684_v56 = vld [vmem:[#allocation2 + $0x24] sm:$0x1]  ;;  %v613_v63 = vsel %vm6694_vm7, %v539_v45, %v612_v40  ;;  %v616_v0 = vsel %vm6648_vm4, %v540_v46, %v615_v37 }
 0x102   : > { %646 = vst [vmem:[#allocation2 + $0x8] sm:$0x1] %v645_v53  ;;  %677 = vst [vmem:[#allocation2 + $0xc] sm:$0x1] %v676_v54  ;;  %v654_v59 = vsel %vm6648_vm4, 0, %v653_v55  ;;  %v685_v60 = vsel %vm6654_vm5, 0, %v684_v56 }
 0x103   : > { %v647_v61 = vld [vmem:[#allocation2 + $0x10] sm:$0x1]  ;;  %v678_v62 = vld [vmem:[#allocation2 + $0x14] sm:$0x1]  ;;  %626 = vst [vmem:[#allocation2 + $0x38] sm:$0xf] %v625_v57 }
 0x104   : > { %629 = vst [vmem:[#allocation2 + $0x3c] sm:$0x1] %v628_v58  ;;  %655 = vst [vmem:[#allocation2 + $0x20] sm:$0x1] %v654_v59  ;;  %v648_v1 = vsel %vm6648_vm4, 0, %v647_v61  ;;  %v679_v2 = vsel %vm6654_vm5, 0, %v678_v62 }
 0x105   : > { %686 = vst [vmem:[#allocation2 + $0x24] sm:$0x1] %v685_v60  ;;  %614 = vst [vmem:[#allocation2 + $0x28] sm:$0xf] %v613_v63  ;;  %v558_v3 = vshrl.u32 %v5584_v41, 16  ;;  %v561_v4 = vshll.u32 %v5584_v41, 16 }
 0x106   : > { %617 = vst [vmem:[#allocation2 + $0x2c] sm:$0x1] %v616_v0  ;;  %649 = vst [vmem:[#allocation2 + $0x10] sm:$0x1] %v648_v1  ;;  %v542_v5 = vshrl.u32 %v5582_v51, 16  ;;  %v545_v6 = vshll.u32 %v5582_v51, 16 }
 0x107   : > { %680 = vst [vmem:[#allocation2 + $0x14] sm:$0x1] %v679_v2  ;;  %v560_v9 = vrot.slane %v558_v3, 7  ;;  %v6753_v22 = vld [vmem:[#allocation2 + $0x18] sm:$0xf]  ;;  %v6366_v57 = vld [vmem:[%s8181_s3 + $0x60] sm:$0xff]  }
 0x108   : > { %v544_v13 = vrot.slane %v542_v5, 7  ;;  %v4994_v27 = vcombine.low %v6753_v22, %v6753_v22  ;;  %v836_v29 = vld [vmem:[#allocation2 + $0x8] sm:$0xe]  ;;  %v6772_v37 = vld [vmem:[#allocation2] sm:$0xf]  ;;  %v6365_v48 = vld [vmem:[%s8181_s3 + $0x18] sm:$0xff]   ;;  %5823 = vmatpush3.bf16.msra.mxu1 %v6366_v57 }
 0x109   : > { %v563_v14 = vor.u32 %v561_v4, %v560_v9  ;;  %v564_v15 = vrot.slane %v560_v9, 4  ;;  %v6762_v28 = vld [vmem:[#allocation2 + $0xc] sm:$0x1]  ;;  %v837_v43 = vld [vmem:[#allocation2 + $0x10] sm:$0xe]  ;;  %5841 = vmatpush3.bf16.msra.mxu0 %v6365_v48  ;;  %5824 = vmatprep.subr.bf16.mxu1 %v8188_v36 }
 0x10a   : > { %v547_v20 = vor.u32 %v545_v6, %v544_v13  ;;  %v548_v21 = vrot.slane %v544_v13, 4  ;;  %v662_v23 = vld [vmem:[#allocation2 + $0x38] sm:$0x1]  ;;  %v887_v40 = vshrl.u32 %v4994_v27, 16  ;;  %v4991_v41 = vcombine.low %v836_v29, %v6762_v28  ;;  %v6786_v44 = vld [vmem:[#allocation2 + $0x4] sm:$0x1]  ;;  %5842 = vmatprep.subr.bf16.mxu0 %v8188_v36 }
 0x10b   : > { %v693_v24 = vld [vmem:[#allocation2 + $0x3c] sm:$0x1]  ;;  %v631_v25 = vsel %vm6694_vm7, %v563_v14, %v630_v11  ;;  %v634_v26 = vsel %vm6648_vm4, %v564_v15, %v633_v12  ;;  %v663_v30 = vsel %vm6648_vm4, 0, %v662_v23  ;;  %v890_v46 = vshll.u32 %v4994_v27, 16  ;;  %v6792_v51 = vld [vmem:[#allocation2 + $0x8] sm:$0xf] }
 0x10c   : > { %v694_v31 = vsel %vm6654_vm5, 0, %v693_v24  ;;  %v656_v32 = vld [vmem:[#allocation2 + $0x28] sm:$0x1]  ;;  %632 = vst [vmem:[#allocation2 + $0x40] sm:$0xf] %v631_v25  ;;  %v619_v34 = vsel %vm6694_vm7, %v547_v20, %v618_v16  ;;  %v622_v35 = vsel %vm6648_vm4, %v548_v21, %v621_v18  ;;  %v889_v45 = vrot.slane %v887_v40, 7  ;;  %vm7677_vm7 = vmand %vm1190_vm8, %vm1343_vm6 }
 0x10d   : > { %v687_v33 = vld [vmem:[#allocation2 + $0x2c] sm:$0x1]  ;;  %635 = vst [vmem:[#allocation2 + $0x44] sm:$0x1] %v634_v26  ;;  %664 = vst [vmem:[#allocation2 + $0x38] sm:$0x1] %v663_v30  ;;  %v6798_v56 = vcombine.low %v6772_v37, %v6786_v44 }
 0x10e   : > { %695 = vst [vmem:[#allocation2 + $0x3c] sm:$0x1] %v694_v31  ;;  %v657_v38 = vsel %vm6648_vm4, 0, %v656_v32  ;;  %v688_v39 = vsel %vm6654_vm5, 0, %v687_v33  ;;  %620 = vst [vmem:[#allocation2 + $0x30] sm:$0xf] %v619_v34  ;;  %v892_v54 = vor.u32 %v890_v46, %v889_v45 }
 0x10f   : > { %623 = vst [vmem:[#allocation2 + $0x34] sm:$0x1] %v622_v35  ;;  %v6779_v52 = vld [vmem:[#allocation2 + $0x10] sm:$0xf]  ;;  %658 = vst [vmem:[#allocation2 + $0x28] sm:$0x1] %v657_v38 }
 0x110   : > { %689 = vst [vmem:[#allocation2 + $0x2c] sm:$0x1] %v688_v39  ;;  %v4993_v42 = vcombine.low %v6779_v52, %v6779_v52  ;;  %v6784_v17 = vld [vmem:[#allocation2 + $0x14] sm:$0x1]  ;;  %v858_v49 = vshll.u32 %v4991_v41, 16  ;;  %v856_v58 = vshrl.u32 %v4991_v41, 16  ;;  %895 = vrot.lane.b32.xlu1 %v892_v54, %s6568_s20 }
 0x111   : > { %v4992_v47 = vcombine.low %v837_v43, %v6784_v17  ;;  %v6794_v53 = vld [vmem:[#allocation2 + $0xc] sm:$0x1]  ;;  %v6803_v62 = vld [vmem:[#allocation2 + $0x10] sm:$0xf]  ;;  %v6818_v13 = vld [vmem:[#allocation2 + $0x8] sm:$0xf] }
 0x112   : > { %v880_v50 = vshrl.u32 %v4993_v42, 16  ;;  %v860_v59 = vrot.slane %v858_v49, 1  ;;  %v883_v61 = vshll.u32 %v4993_v42, 16  ;;  %v4984_v2 = vcombine.low %v6792_v51, %v6794_v53  ;;  %v6821_v15 = vld [vmem:[#allocation2 + $0x1c] sm:$0x1]  ;;  %v6367_v25 = vld [vmem:[%s8181_s3 + $0x20] sm:$0xff]  }
 0x113   : > { %v865_v55 = vshll.u32 %v4992_v47, 16  ;;  %v665_v63 = vld [vmem:[#allocation2 + $0x40] sm:$0x1]  ;;  %v863_v14 = vshrl.u32 %v4992_v47, 16  ;;  %v765_v16 = vshll.u32 %v6798_v56, 16  ;;  %v4996_v21 = vcombine.low %v6753_v22, %v6821_v15  ;;  %5843 = vmatpush3.bf16.msra.mxu0 %v6367_v25  ;;  %v6368_v32 = vld [vmem:[%s8181_s3 + $0x68] sm:$0xff]  }
 0x114   : > { %v882_v60 = vrot.slane %v880_v50, 7  ;;  %v696_v0 = vld [vmem:[#allocation2 + $0x44] sm:$0x1]  ;;  %v666_v3 = vsel %vm6648_vm4, 0, %v665_v63  ;;  %v861_v9 = vor.u32 %v860_v59, %v856_v58  ;;  %v772_v18 = vshll.u32 %v4984_v2, 16  ;;  %5844 = vmatprep.subr.bf16.mxu0 %v8188_v36  ;;  %5825 = vmatpush3.bf16.msra.mxu1 %v6368_v32  ;;  %v6369_v43 = vld [vmem:[%s8181_s3 + $0x28] sm:$0xff]  }
 0x115   : > { %v867_v1 = vrot.slane %v865_v55, 1  ;;  %v697_v4 = vsel %vm6654_vm5, 0, %v696_v0  ;;  %v659_v5 = vld [vmem:[#allocation2 + $0x30] sm:$0x1]  ;;  %667 = vst [vmem:[#allocation2 + $0x40] sm:$0x1] %v666_v3  ;;  %5826 = vmatprep.subr.bf16.mxu1 %v8188_v36 }
 0x116   : > { %v690_v6 = vld [vmem:[#allocation2 + $0x34] sm:$0x1]  ;;  %v885_v10 = vor.u32 %v883_v61, %v882_v60  ;;  %698 = vst [vmem:[#allocation2 + $0x44] sm:$0x1] %v697_v4  ;;  %v660_v11 = vsel %vm6648_vm4, 0, %v659_v5  ;;  %869 = vrot.lane.b32.xlu0 %v861_v9, %s6569_s21  ;;  %v774_v24 = vrot.slane %v772_v18, 1 }
 0x117   : > { %v691_v12 = vsel %vm6654_vm5, 0, %v690_v6  ;;  %661 = vst [vmem:[#allocation2 + $0x30] sm:$0x1] %v660_v11  ;;  %v868_v8 = vor.u32 %v867_v1, %v863_v14  ;;  %v6831_v23 = vld [vmem:[#allocation2 + $0x14] sm:$0x1]  ;;  %v763_v26 = vshrl.u32 %v6798_v56, 16  ;;  %5845 = vmatpush3.bf16.msra.mxu0 %v6369_v43 }
 0x118   : > { %692 = vst [vmem:[#allocation2 + $0x34] sm:$0x1] %v691_v12  ;;  %893 = vrot.lane.b32.xlu1 %v885_v10, %s6568_s20  ;;  %v767_v27 = vrot.slane %v765_v16, 1  ;;  %v6838_v29 = vld [vmem:[#allocation2 + $0x24] sm:$0x1]  ;;  %v770_v30 = vshrl.u32 %v4984_v2, 16  ;;  %v4995_v33 = vcombine.low %v6779_v52, %v6831_v23  ;;  %5846 = vmatprep.subr.bf16.mxu0 %v8188_v36  ;;  %v4988_v10 = vcombine.low %v6803_v62, %v6803_v62 }
 0x119   : > { %v748_v31 = vld [vmem:[#allocation2] sm:$0xe]  ;;  %v6841_v22 = vld [vmem:[#allocation2 + $0x4c] sm:$0x1]  ;;  %v749_v34 = vld [vmem:[#allocation2 + $0x8] sm:$0xe] }
 0x11a   : > { %871 = vrot.lane.b32.xlu0 %v868_v8, %s6569_s21  ;;  %v1440_v35 = vld [vmem:[#allocation2 + $0x20] sm:$0xe]  ;;  %v2949_v38 = vld [vmem:[#allocation2 + $0x48] sm:$0xe]  ;;  %v775_v39 = vor.u32 %v774_v24, %v770_v30  ;;  %v4986_v40 = vcombine.low %v749_v34, %v6794_v53  ;;  %v6853_v42 = vld [vmem:[#allocation2 + $0x1c] sm:$0x1]  ;;  %v768_v52 = vor.u32 %v767_v27, %v763_v26  ;;  %v4985_v45 = vcombine.low %v748_v31, %v6786_v44 }
 0x11b   : > { %v6851_v41 = vcombine.low %v1440_v35, %v6838_v29  ;;  %v6860_v46 = vld [vmem:[#allocation2 + $0x28] sm:$0xf]  ;;  %v6370_v47 = vld [vmem:[%s8181_s3 + $0x70] sm:$0xff]   ;;  %v1168_v48 = vld [vmem:[#allocation2 + $0x18] sm:$0xe]  ;;  %v5297_v50 = vcombine.low %v2949_v38, %v6841_v22  ;;  %v4987_v27 = vcombine.low %v6818_v13, %v6818_v13  ;;  %vm3212_vm8 = vcmask 1044484  }
 0x11c   : > { %905 = vrot.lane.b32.xlu1 %v4996_v21, %s6570_s24  ;;  %v1439_v49 = vld [vmem:[#allocation2 + $0x18] sm:$0xe]  ;;  %v6371_v53 = vld [vmem:[%s8181_s3 + $0x30] sm:$0xff]   ;;  %v5036_v44 = vcombine.low %v1168_v48, %v6821_v15  ;;  %v6875_v55 = vld [vmem:[#allocation2 + $0x20] sm:$0xf]  ;;  %v787_v56 = vrot.slane %v4986_v40, 1  ;;  %v6881_v58 = vcombine.low %v6860_v46, %v6860_v46  ;;  %5827 = vmatpush3.bf16.msra.mxu1 %v6370_v47 }
 0x11d   : > { %v6873_v54 = vcombine.low %v1439_v49, %v6853_v42  ;;  %v1468_v57 = vshll.u32 %v6851_v41, 16  ;;  %v6883_v59 = vld [vmem:[#allocation2 + $0x20] sm:$0xf]  ;;  %v6372_v60 = vld [vmem:[%s8181_s3 + $0x78] sm:$0xff]   ;;  %v1167_v61 = vld [vmem:[#allocation2 + $0x10] sm:$0xe]  ;;  %5828 = vmatprep.subr.bf16.mxu1 %v8188_v36  ;;  %5847 = vmatpush3.bf16.msra.mxu0 %v6371_v53 }
 0x11e   : > { %903 = vrot.lane.b32.xlu0 %v4995_v33, %s6570_s24  ;;  %v786_v63 = vrot.slane %v4985_v45, 1  ;;  %v6889_v0 = vld [vmem:[#allocation2 + $0x18] sm:$0xf]  ;;  %v5035_v1 = vcombine.low %v1167_v61, %v6831_v23  ;;  %v2959_v3 = vsel %vm383_vm0, %v5297_v50, 0  ;;  %v6901_v5 = vsel %vm383_vm0, %v5036_v44, 0  ;;  %5848 = vmatprep.subr.bf16.mxu0 %v8188_v36 }
 0x11f   : > { %v6373_v4 = vld [vmem:[%s8181_s3 + $0x38] sm:$0xff]   ;;  %v1461_v6 = vshll.u32 %v6873_v54, 16  ;;  %v6906_v9 = vcombine.low %v6883_v59, %v6883_v59  ;;  %v1470_v11 = vrot.slane %v1468_v57, 1  ;;  %v1490_v12 = vshrl.u32 %v6881_v58, 16  ;;  %v6912_v14 = vld [vmem:[#allocation2 + $0x2c] sm:$0x1] }
 0x120   : > { %778 = vrot.lane.b32.xlu1 %v775_v39, %s6569_s21  ;;  %v1767_v15 = vld [vmem:[#allocation2 + $0x28] sm:$0xe]  ;;  %5829 = vmatpush3.bf16.msra.mxu1 %v6372_v60  ;;  %v6917_v18 = vld [vmem:[#allocation2 + $0x24] sm:$0x1]  ;;  %v6919_v8 = vld [vmem:[#allocation2 + $0x18] sm:$0xf]  ;;  %v5300_v23 = vcombine.low %v2959_v3, %v2959_v3  ;;  %v5301_v24 = vcombine.high %v2959_v3, %v2959_v3  ;;  %v5039_v25 = vcombine.low %v6901_v5, %v6901_v5 }
 0x121   : > { %v6921_v21 = vld [vmem:[#allocation2 + $0x1c] sm:$0x1]  ;;  %5854 = vmatprep.subr.bf16.mxu1 %v8188_v36  ;;  %v1177_v26 = vsel %vm383_vm0, %v5035_v1, 0  ;;  %v1466_v30 = vshrl.u32 %v6851_v41, 16  ;;  %5849 = vmatpush3.bf16.msra.mxu0 %v6373_v4  ;;  %v1463_v31 = vrot.slane %v1461_v6, 1  ;;  %v1493_v32 = vshll.u32 %v6881_v58, 16 }
 0x122   : > { %776 = vrot.lane.b32.xlu0 %v768_v52, %s6569_s21  ;;  %v1483_v33 = vshrl.u32 %v6906_v9, 16  ;;  %v5123_v34 = vcombine.low %v1767_v15, %v6912_v14  ;;  %v1766_v35 = vld [vmem:[#allocation2 + $0x20] sm:$0xe]  ;;  %5874 = vmatprep.subr.bf16.mxu0 %v8188_v36  ;;  %v1492_v39 = vrot.slane %v1490_v12, 7  ;;  %v6938_v43 = vcombine.low %v6919_v8, %v6921_v21  ;;  %v6940_v41 = vld [vmem:[#allocation2 + $0x10] sm:$0xf] }
 0x123   : > { %v1471_v38 = vor.u32 %v1470_v11, %v1466_v30  ;;  %v5122_v40 = vcombine.low %v1766_v35, %v6917_v18  ;;  %8200 = vst [vmem:[#allocation7_spill] sm:$0xff] %v6940_v41  ;;  %v6942_v52 = vld [vmem:[#allocation2 + $0x14] sm:$0x1]  ;;  %v1459_v45 = vshrl.u32 %v6873_v54, 16  ;;  %v6946_v47 = vrot.slane %v5300_v23, 9 }
 0x124   : > { %790 = vrot.lane.b32.xlu1 %v787_v56, %s6568_s20  ;;  %v6948_v48 = vrot.slane %v5301_v24, 5  ;;  %v5040_v49 = vcombine.high %v6901_v5, %v6901_v5  ;;  %v6952_v50 = vrot.slane %v5039_v25, 9  ;;  %v5037_v53 = vcombine.low %v1177_v26, %v1177_v26  ;;  %v6963_v1 = vld [vmem:[#allocation2 + $0x3c] sm:$0x1]  ;;  %v2358_v3 = vld [vmem:[#allocation2 + $0x38] sm:$0xe] }
 0x125   : > { %v1486_v44 = vshll.u32 %v6906_v9, 16  ;;  %v1464_v56 = vor.u32 %v1463_v31, %v1459_v45  ;;  %v1485_v57 = vrot.slane %v1483_v33, 7  ;;  %v1777_v58 = vsel %vm383_vm0, %v5123_v34, 0  ;;  %v6972_v6 = vld [vmem:[#allocation2 + $0x34] sm:$0x1] }
 0x126   : > { %788 = vrot.lane.b32.xlu0 %v786_v63, %s6568_s20  ;;  %v6959_v54 = vcombine.low %v6940_v41, %v6942_v52  ;;  %v1495_v60 = vor.u32 %v1493_v32, %v1492_v39  ;;  %v1775_v61 = vsel %vm383_vm0, %v5122_v40, 0  ;;  %v1377_v63 = vshll.u32 %v6938_v43, 16  ;;  %v2357_v9 = vld [vmem:[#allocation2 + $0x30] sm:$0xe]  ;;  %v6987_v25 = vld [vmem:[#allocation2 + $0x38] sm:$0xf] }
 0x127   : > { %v5038_v5 = vcombine.high %v1177_v26, %v1177_v26  ;;  %v6980_v12 = vrot.slane %v5040_v49, 5  ;;  %v6982_v15 = vrot.slane %v5037_v53, 9  ;;  %v5083_v23 = vcombine.low %v6860_v46, %v6912_v14  ;;  %v6989_v26 = vld [vmem:[#allocation2 + $0x28] sm:$0xf]  ;;  %v6992_v32 = vld [vmem:[#allocation2 + $0x2c] sm:$0x1] }
 0x128   : > { %800 = vrot.lane.b32.xlu1 %v4988_v10, %s6570_s24  ;;  %v6974_v10 = vld [vmem:[#allocation2 + $0x30] sm:$0xf]  ;;  %v5126_v24 = vcombine.low %v1777_v58, %v1777_v58  ;;  %v5127_v30 = vcombine.high %v1777_v58, %v1777_v58  ;;  %v1370_v31 = vshll.u32 %v6959_v54, 16  ;;  %v6994_v33 = vld [vmem:[#allocation2 + $0x34] sm:$0x1]  ;;  %v5210_v34 = vcombine.low %v2358_v3, %v6963_v1 }
 0x129   : > { %v5124_v35 = vcombine.low %v1775_v61, %v1775_v61  ;;  %v5209_v39 = vcombine.low %v2357_v9, %v6972_v6  ;;  %v7000_v14 = vld [vmem:[#allocation2 + $0x44] sm:$0x1]  ;;  %v2948_v40 = vld [vmem:[#allocation2 + $0x40] sm:$0xe]  ;;  %v7002_v45 = vrot.slane %v5038_v5, 5  ;;  %v5082_v49 = vcombine.low %v6883_v59, %v6917_v18 }
 0x12a   : > { %798 = vrot.lane.b32.xlu0 %v4987_v27, %s6570_s24  ;;  %v1488_v27 = vor.u32 %v1486_v44, %v1485_v57  ;;  %v5125_v53 = vcombine.high %v1775_v61, %v1775_v61  ;;  %v1353_v44 = vld [vmem:[#allocation2 + $0x18] sm:$0xe]  ;;  %v7009_v57 = vrot.slane %v5126_v24, 9  ;;  %v1375_v58 = vshrl.u32 %v6938_v43, 16  ;;  %v2030_v18 = vld [vmem:[#allocation2 + $0x28] sm:$0xe] }
 0x12b   : > { %v7016_v3 = vcombine.low %v6987_v25, %v6987_v25  ;;  %v7018_v5 = vrot.slane %v5127_v30, 5  ;;  %v1372_v59 = vrot.slane %v1370_v31, 1  ;;  %v2368_v61 = vsel %vm383_vm0, %v5210_v34, 0  ;;  %v2031_v31 = vld [vmem:[#allocation2 + $0x30] sm:$0xe] }
 0x12c   : > { %1474 = vrot.lane.b32.xlu1 %v1471_v38, %s6569_s21  ;;  %v1379_v38 = vrot.slane %v1377_v63, 1  ;;  %v1352_v63 = vld [vmem:[#allocation2 + $0x10] sm:$0xe]  ;;  %v5296_v9 = vcombine.low %v2948_v40, %v7000_v14  ;;  %v5128_v24 = vrot.slane %v5124_v35, 9  ;;  %v2366_v43 = vsel %vm383_vm0, %v5209_v39, 0 }
 0x12d   : > { %v5075_v30 = vcombine.low %v6875_v55, %v6875_v55  ;;  %v2081_v35 = vshrl.u32 %v7016_v3, 16  ;;  %v5213_v39 = vcombine.low %v2368_v61, %v2368_v61  ;;  %v5166_v46 = vcombine.low %v2031_v31, %v6994_v33  ;;  %v7048_v31 = vld [vmem:[#allocation2 + $0x3c] sm:$0x1] }
 0x12e   : > { %1472 = vrot.lane.b32.xlu0 %v1464_v56, %s6569_s21  ;;  %v2957_v56 = vsel %vm383_vm0, %v5296_v9, 0  ;;  %v8203_v41 = vmov 0.0  }
 0x12f   : > { %v5298_v9 = vcombine.low %v2957_v56, %v2957_v56  ;;  %v5299_v16 = vcombine.high %v2957_v56, %v2957_v56  ;;  %v5216_v56 = vrot.slane %v5213_v39, 9  ;;  %v2059_v11 = vshll.u32 %v5166_v46, 16  ;;  %v1942_v39 = vld [vmem:[#allocation2 + $0x2c] sm:$0x1]  ;;  %5830 = vmatprep.mubr.msk.bf16.mxu1 %vm6571_vm11, %v8203_v41  ;;  %5850 = vmatprep.mubr.msk.bf16.mxu0 %vm6571_vm11, %v8203_v41 }
 0x130   : > { %1498 = vrot.lane.b32.xlu1 %v1495_v60, %s6568_s20  ;;  %v5073_v60 = vcombine.low %v1353_v44, %v6921_v21  ;;  %v1790_v21 = vrot.slane %v5125_v53, 5  ;;  %v1368_v44 = vshrl.u32 %v6959_v54, 16  ;;  %v5211_v53 = vcombine.low %v2366_v43, %v2366_v43 }
 0x131   : > { %v5212_v54 = vcombine.high %v2366_v43, %v2366_v43  ;;  %v7045_v43 = vld [vmem:[#allocation2 + $0x44] sm:$0x1]  ;;  %v5302_v36 = vrot.slane %v5298_v9, 9  ;;  %v2972_v7 = vrot.slane %v5299_v16, 5  ;;  %v1200_v16 = vsel %vm6967_vm10, %v6952_v50, %v6980_v12 }
 0x132   : > { %1496 = vrot.lane.b32.xlu0 %v1488_v27, %s6568_s20  ;;  %v1380_v27 = vor.u32 %v1379_v38, %v1375_v58  ;;  %v1392_v34 = vrot.slane %v5073_v60, 1  ;;  %v7032_v38 = vld [vmem:[#allocation2 + $0x30] sm:$0xf]  ;;  %v1373_v40 = vor.u32 %v1372_v59, %v1368_v44  ;;  %v7034_v58 = vld [vmem:[#allocation2 + $0x40] sm:$0xf]  ;;  %v5074_v60 = vcombine.low %v6889_v0, %v6889_v0 }
 0x133   : > { %v5215_v20 = vrot.slane %v5211_v53, 9  ;;  %v2381_v19 = vrot.slane %v5212_v54, 5  ;;  %v1791_v54 = vsel %vm6967_vm10, %v5128_v24, %v1790_v21  ;;  %v1941_v24 = vld [vmem:[#allocation2 + $0x24] sm:$0x1] }
 0x134   : > { %1508 = vrot.lane.b32.xlu1 %v5083_v23, %s6570_s24  ;;  %v5072_v23 = vcombine.low %v1352_v63, %v6942_v52  ;;  %v5165_v52 = vcombine.low %v2030_v18, %v6992_v32  ;;  %v2084_v18 = vshll.u32 %v7016_v3, 16 }
 0x135   : > { %v2382_v50 = vsel %vm6967_vm10, %v5215_v20, %v2381_v19  ;;  %v8204_v19 = vsel %vm6967_vm10, %v6946_v47, %v6948_v48  ;;  %v5170_v47 = vcombine.low %v6987_v25, %v6963_v1  ;;  %v1943_v25 = vld [vmem:[#allocation2 + $0x20] sm:$0xe] }
 0x136   : > { %1506 = vrot.lane.b32.xlu0 %v5082_v49, %s6570_s24  ;;  %v5214_v49 = vcombine.high %v2368_v61, %v2368_v61  ;;  %v1391_v63 = vrot.slane %v5072_v23, 1  ;;  %v2050_v59 = vshrl.u32 %v5165_v52, 16  ;;  %v5167_v61 = vcombine.low %v7032_v38, %v7032_v38 }
 0x137   : > { %v2083_v23 = vrot.slane %v2081_v35, 7  ;;  %v2052_v44 = vshll.u32 %v5165_v52, 16  ;;  %v7055_v52 = vld [vmem:[#allocation2 + $0x28] sm:$0xf] }
 0x138   : > { %1383 = vrot.lane.b32.xlu1 %v1380_v27, %s6569_s21  ;;  %v7037_v27 = vld [vmem:[#allocation2 + $0x38] sm:$0xf]  ;;  %v2385_v2 = vrot.slane %v5214_v49, 5  ;;  %v2074_v35 = vshrl.u32 %v5167_v61, 16  ;;  %v1196_v49 = vsel %vm6967_vm10, %v6982_v15, %v7002_v45  ;;  %v1795_v15 = vsel %vm6967_vm10, %v7009_v57, %v7018_v5 }
 0x139   : > { %v5250_v3 = vcombine.low %v7037_v27, %v7048_v31  ;;  %v7070_v53 = vcombine.low %v1196_v49, %v1200_v16  ;;  %v2086_v45 = vor.u32 %v2084_v18, %v2083_v23  ;;  %v5158_v9 = vcombine.low %v7055_v52, %v1942_v39 }
 0x13a   : > { %1381 = vrot.lane.b32.xlu0 %v1373_v40, %s6569_s21  ;;  %v5251_v40 = vcombine.low %v7034_v58, %v7045_v43  ;;  %v2386_v12 = vsel %vm6967_vm10, %v5216_v56, %v2385_v2  ;;  %v2973_v57 = vsel %vm6967_vm10, %v5302_v36, %v2972_v7  ;;  %v2077_v5 = vshll.u32 %v5167_v61, 16 }
 0x13b   : > { %v7087_v21 = vcombine.low %v2382_v50, %v2386_v12  ;;  %v7097_v20 = vcombine.low %v2973_v57, %v8204_v19  ;;  %v1968_v56 = vshll.u32 %v5158_v9, 16  ;;  %v1966_v48 = vshrl.u32 %v5158_v9, 16 }
 0x13c   : > { %1395 = vrot.lane.b32.xlu1 %v1392_v34, %s6568_s20  ;;  %v2057_v34 = vshrl.u32 %v5166_v46, 16  ;;  %v2054_v46 = vrot.slane %v2052_v44, 1  ;;  %v7085_v44 = vld [vmem:[#allocation2 + $0x20] sm:$0xf]  ;;  %v5169_v61 = vcombine.low %v7032_v38, %v6972_v6  ;;  %v5159_v50 = vcombine.low %v1943_v25, %v1941_v24 }
 0x13d   : > { %v5157_v18 = vcombine.low %v7085_v44, %v1941_v24  ;;  %v1970_v4 = vrot.slane %v1968_v56, 1  ;;  %v2624_v38 = vld [vmem:[#allocation2 + $0x40] sm:$0xf]  ;;  %v7118_v24 = vld [vmem:[#allocation2 + $0x38] sm:$0xf]  ;;  %vm3214_vm10 = vcmask 1046534  }
 0x13e   : > { %1393 = vrot.lane.b32.xlu0 %v1391_v63, %s6568_s20  ;;  %v7078_v63 = vcombine.low %v1791_v54, %v1795_v15  ;;  %v2055_v2 = vor.u32 %v2054_v46, %v2050_v59  ;;  %v2622_v59 = vld [vmem:[#allocation2 + $0x40] sm:$0xe]  ;;  %v2621_v54 = vld [vmem:[#allocation2 + $0x38] sm:$0xe]  ;;  %v1982_v9 = vrot.slane %v5159_v50, 1  ;;  %v5254_v19 = vcombine.low %v2624_v38, %v2624_v38 }
 0x13f   : > { %v1961_v36 = vshll.u32 %v5157_v18, 16  ;;  %v1971_v49 = vor.u32 %v1970_v4, %v1966_v48  ;;  %v5253_v46 = vcombine.low %v2622_v59, %v7045_v43  ;;  %v1959_v1 = vshrl.u32 %v5157_v18, 16  ;;  %v2533_v18 = vld [vmem:[#allocation2 + $0x3c] sm:$0x1] }
 0x140   : > { %1405 = vrot.lane.b32.xlu1 %v5075_v30, %s6570_s24  ;;  %v2061_v30 = vrot.slane %v2059_v11, 1  ;;  %v2076_v11 = vrot.slane %v2074_v35, 7  ;;  %v2625_v35 = vld [vmem:[#allocation2 + $0x48] sm:$0xf]  ;;  %v5252_v12 = vcombine.low %v2621_v54, %v7048_v31  ;;  %v2665_v48 = vshrl.u32 %v5254_v19, 16 }
 0x141   : > { %v5255_v15 = vcombine.low %v2625_v35, %v2625_v35  ;;  %v2650_v6 = vshll.u32 %v5253_v46, 16  ;;  %v2532_v54 = vld [vmem:[#allocation2 + $0x34] sm:$0x1] }
 0x142   : > { %1403 = vrot.lane.b32.xlu0 %v5074_v60, %s6570_s24  ;;  %v2062_v23 = vor.u32 %v2061_v30, %v2057_v34  ;;  %v2079_v7 = vor.u32 %v2077_v5, %v2076_v11  ;;  %v1944_v60 = vld [vmem:[#allocation2 + $0x28] sm:$0xe]  ;;  %v1963_v34 = vrot.slane %v1961_v36, 1  ;;  %v2643_v57 = vshll.u32 %v5252_v12, 16 }
 0x143   : > { %v5160_v16 = vcombine.low %v1944_v60, %v1942_v39  ;;  %v2672_v39 = vshrl.u32 %v5255_v15, 16  ;;  %v2648_v11 = vshrl.u32 %v5253_v46, 16  ;;  %v2652_v5 = vrot.slane %v2650_v6, 1  ;;  %v7126_v46 = vld [vmem:[#allocation2 + $0x30] sm:$0xf] }
 0x144   : > { %2089 = vrot.lane.b32.xlu1 %v2086_v45, %s6568_s20  ;;  %v1964_v45 = vor.u32 %v1963_v34, %v1959_v1  ;;  %v2675_v56 = vshll.u32 %v5255_v15, 16  ;;  %v2641_v36 = vshrl.u32 %v5252_v12, 16  ;;  %v5245_v60 = vcombine.low %v7118_v24, %v2533_v18  ;;  %v2534_v12 = vld [vmem:[#allocation2 + $0x30] sm:$0xe] }
 0x145   : > { %v1983_v30 = vrot.slane %v5160_v16, 1  ;;  %v2653_v4 = vor.u32 %v2652_v5, %v2648_v11  ;;  %v2667_v34 = vrot.slane %v2665_v48, 7  ;;  %v5257_v1 = vcombine.low %v2625_v35, %v6841_v22 }
 0x146   : > { %2063 = vrot.lane.b32.xlu0 %v2055_v2, %s6569_s21  ;;  %v5162_v2 = vcombine.low %v6974_v10, %v6974_v10  ;;  %v2559_v16 = vshll.u32 %v5245_v60, 16  ;;  %v5244_v15 = vcombine.low %v7126_v46, %v2532_v54  ;;  %v5256_v6 = vcombine.low %v2624_v38, %v7000_v14 }
 0x147   : > { %v5249_v14 = vcombine.low %v7034_v58, %v7034_v58  ;;  %v5248_v38 = vcombine.low %v7037_v27, %v7037_v27 }
 0x148   : > { %2065 = vrot.lane.b32.xlu1 %v2062_v23, %s6569_s21  ;;  %v2674_v23 = vrot.slane %v2672_v39, 7  ;;  %v2561_v50 = vrot.slane %v2559_v16, 1  ;;  %v5246_v39 = vcombine.low %v2534_v12, %v2532_v54  ;;  %v2550_v35 = vshrl.u32 %v5244_v15, 16 }
 0x14a   : > { %2087 = vrot.lane.b32.xlu0 %v2079_v7, %s6568_s20  ;;  %v5161_v7 = vcombine.low %v6989_v26, %v6989_v26  ;;  %v2677_v59 = vor.u32 %v2675_v56, %v2674_v23  ;;  %v2573_v22 = vrot.slane %v5246_v39, 1 }
 0x14c   : > { %2099 = vrot.lane.b32.xlu1 %v5170_v47, %s6570_s24  ;;  %v2645_v47 = vrot.slane %v2643_v57, 1 }
 0x14e   : > { %2097 = vrot.lane.b32.xlu0 %v5169_v61, %s6570_s24  ;;  %v2646_v61 = vor.u32 %v2645_v47, %v2641_v36  ;;  %v8205_v36 = vcombine.low %v6803_v62, %v6784_v17 }
 0x150   : > { %1974 = vrot.lane.b32.xlu1 %v1971_v49, %s6569_s21  ;;  %v2668_v49 = vshll.u32 %v5254_v19, 16 }
 0x152   : > { %1972 = vrot.lane.b32.xlu0 %v1964_v45, %s6569_s21  ;;  %v2670_v25 = vor.u32 %v2668_v49, %v2667_v34  ;;  %v2557_v45 = vshrl.u32 %v5245_v60, 16  ;;  %v8206_v60 = vcombine.low %v6818_v13, %v6762_v28 }
 0x154   : > { %1986 = vrot.lane.b32.xlu1 %v1983_v30, %s6568_s20  ;;  %v2535_v30 = vld [vmem:[#allocation2 + $0x38] sm:$0xe]  ;;  %v2562_v57 = vor.u32 %v2561_v50, %v2557_v45 }
 0x155   : > { %v5247_v19 = vcombine.low %v2535_v30, %v2533_v18 }
 0x156   : > { %1984 = vrot.lane.b32.xlu0 %v1982_v9, %s6568_s20  ;;  %v2552_v9 = vshll.u32 %v5244_v15, 16 }
 0x157   : > { %v2574_v11 = vrot.slane %v5247_v19, 1 }
 0x158   : > { %1996 = vrot.lane.b32.xlu1 %v5162_v2, %s6570_s24  ;;  %v2554_v2 = vrot.slane %v2552_v9, 1 }
 0x15a   : > { %1994 = vrot.lane.b32.xlu0 %v5161_v7, %s6570_s24  ;;  %v2555_v5 = vor.u32 %v2554_v2, %v2550_v35 }
 0x15c   : > { %2656 = vrot.lane.b32.xlu1 %v2653_v4, %s6569_s21 }
 0x15e   : > { %2654 = vrot.lane.b32.xlu0 %v2646_v61, %s6569_s21 }
 0x160   : > { %2680 = vrot.lane.b32.xlu1 %v2677_v59, %s6568_s20 }
 0x162   : > { %2678 = vrot.lane.b32.xlu0 %v2670_v25, %s6568_s20 }
 0x164   : > { %2690 = vrot.lane.b32.xlu1 %v5257_v1, %s6570_s24 }
 0x166   : > { %2688 = vrot.lane.b32.xlu0 %v5256_v6, %s6570_s24 }
 0x168   : > { %2565 = vrot.lane.b32.xlu1 %v2562_v57, %s6569_s21 }
 0x16a   : > { %2575 = vrot.lane.b32.xlu0 %v2573_v22, %s6568_s20 }
 0x16c   : > { %2577 = vrot.lane.b32.xlu1 %v2574_v11, %s6568_s20  ;;  %v6412_v11 = vld [vmem:[%s8181_s3 + $0x58] sm:$0xff]  }
 0x16e   : > { %2563 = vrot.lane.b32.xlu0 %v2555_v5, %s6569_s21 }
 0x170   : > { %2587 = vrot.lane.b32.xlu1 %v5249_v14, %s6570_s24 }
 0x172   : > { %2585 = vrot.lane.b32.xlu0 %v5248_v38, %s6570_s24 }
 0x182   : > { %v896_v18 = vpop.permute.xlu1 %895 }
 0x188   : > { %v870_v23 = vpop.permute.xlu0 %869 }
 0x189   : > { %v909_v59 = vsel %vm383_vm0, %v8206_v60, %v870_v23 }
 0x18a   : > { %v894_v56 = vpop.permute.xlu1 %893 }
 0x18b   : > { %v914_v34 = vsel %vm808_vm13, %v909_v59, %v894_v56 }
 0x18c   : > { %v872_v7 = vpop.permute.xlu0 %871 }
 0x18d   : > { %v912_v47 = vsel %vm383_vm0, %v8205_v36, %v872_v7 }
 0x18e   : > { %v906_v48 = vpop.permute.xlu1 %905  ;;  %v916_v4 = vsel %vm808_vm13, %v912_v47, %v896_v18 }
 0x18f   : > { %v920_v61 = vsel %vm813_vm12, %v916_v4, %v906_v48 }
 0x190   : > { %v4999_v49 = vcombine.low %v920_v61, %v920_v61  ;;  %v904_v16 = vpop.permute.xlu0 %903  ;;  %v5000_v54 = vcombine.high %v920_v61, %v920_v61 }
 0x191   : > { %v918_v1 = vsel %vm813_vm12, %v914_v34, %v904_v16  ;;  %v6375_v34 = vld [vmem:[%s8181_s3 + $0x40] sm:$0xff]  }
 0x192   : > { %v779_v17 = vpop.permute.xlu1 %778  ;;  %v949_v62 = vshrl.u32 %v4999_v49, 16  ;;  %v952_v25 = vshll.u32 %v4999_v49, 16  ;;  %v4997_v15 = vcombine.low %v918_v1, %v918_v1  ;;  %v4998_v45 = vcombine.high %v918_v1, %v918_v1  ;;  %v6376_v1 = vld [vmem:[%s8181_s3 + $0x88] sm:$0xff]  }
 0x193   : > { %v958_v13 = vshll.u32 %v5000_v54, 16  ;;  %v807_v38 = vsel %vm383_vm0, %v6792_v51, %v779_v17 }
 0x194   : > { %v951_v50 = vrot.slane %v949_v62, 4  ;;  %v954_v12 = vrot.slane %v952_v25, 5  ;;  %v935_v30 = vshrl.u32 %v4997_v15, 16  ;;  %v777_v28 = vpop.permute.xlu0 %776  ;;  %v938_v6 = vshll.u32 %v4997_v15, 16  ;;  %v6377_v62 = vld [vmem:[%s8181_s3 + $0x48] sm:$0xff]  }
 0x195   : > { %v944_v22 = vshll.u32 %v4998_v45, 16  ;;  %v960_v5 = vrot.slane %v958_v13, 5  ;;  %v804_v23 = vsel %vm383_vm0, %v6772_v37, %v777_v28  ;;  %v6374_v37 = vld [vmem:[%s8181_s3 + $0x80] sm:$0xff]   ;;  %v8209_v25 = vcombine.low %v6875_v55, %v6838_v29  ;;  %v6379_v28 = vld [vmem:[%s8181_s3 + $0x50] sm:$0xff]  }
 0x196   : > { %v791_v39 = vpop.permute.xlu1 %790  ;;  %v955_v9 = vor.u32 %v954_v12, %v951_v50  ;;  %v937_v57 = vrot.slane %v935_v30, 4  ;;  %v940_v19 = vrot.slane %v938_v6, 5  ;;  %v6378_v12 = vld [vmem:[%s8181_s3 + $0x90] sm:$0xff]   ;;  %v8210_v55 = vcombine.low %v6889_v0, %v6853_v42  ;;  %v6381_v42 = vld [vmem:[%s8181_s3 + $0x58] sm:$0xff]  }
 0x197   : > { %v812_v56 = vsel %vm808_vm13, %v807_v38, %v791_v39  ;;  %v946_v36 = vrot.slane %v944_v22, 5 }
 0x198   : > { %v956_v35 = vrot.slane %v955_v9, 4  ;;  %v789_v2 = vpop.permute.xlu0 %788  ;;  %v941_v14 = vor.u32 %v940_v19, %v937_v57 }
 0x199   : > { %v810_v4 = vsel %vm808_vm13, %v804_v23, %v789_v2  ;;  %v6380_v2 = vld [vmem:[%s8181_s3 + $0x98] sm:$0xff]  }
 0x19a   : > { %v801_v18 = vpop.permute.xlu1 %800  ;;  %v942_v7 = vrot.slane %v941_v14, 4  ;;  %v961_v48 = vsel %vm7158_vm1, %v956_v35, %v960_v5 }
 0x19b   : > { %v817_v47 = vsel %vm813_vm12, %v812_v56, %v801_v18 }
 0x19c   : > { %v799_v60 = vpop.permute.xlu0 %798  ;;  %v947_v51 = vsel %vm7158_vm1, %v942_v7, %v946_v36 }
 0x19d   : > { %v815_v59 = vsel %vm813_vm12, %v810_v4, %v799_v60  ;;  %v5017_v16 = vcombine.low %v947_v51, %v961_v48  ;;  %v6382_v48 = vld [vmem:[%s8181_s3 + $0xa0] sm:$0xff]  }
 0x19e   : > { %v1475_v61 = vpop.permute.xlu1 %1474  ;;  %v5026_v49 = vcombine.low %v815_v59, %v817_v47  ;;  %v6383_v60 = vld [vmem:[%s8181_s3 + $0x60] sm:$0xff]  }
 0x19f   : > { %5831 = vmatmul.mubr.bf16.vlgmr.msra.gmra.mrb[0].mxu1 %v5017_v16  ;;  %v1515_v15 = vsel %vm383_vm0, %v8209_v25, %v1475_v61 }
 0x1a0   : > { %v1473_v54 = vpop.permute.xlu0 %1472  ;;  %5851 = vmatmul.mubr.bf16.vlgmr.msra.gmra.mrb[8].mxu0 %v5026_v49  ;;  %5855 = vmatpush3.bf16.msra.mxu1 %v6374_v37 }
 0x1a1   : > { %5875 = vmatpush3.bf16.msra.mxu0 %v6375_v34  ;;  %5856 = vmatprep.subr.bf16.mxu1 %v8203_v41  ;;  %v1512_v13 = vsel %vm383_vm0, %v8210_v55, %v1473_v54  ;;  %v6384_v54 = vld [vmem:[%s8181_s3 + $0xa8] sm:$0xff]  }
 0x1a2   : > { %v1499_v17 = vpop.permute.xlu1 %1498  ;;  %5876 = vmatprep.subr.bf16.mxu0 %v8203_v41  ;;  %5870 = vmatprep.mubr.msk.bf16.mxu1 %vm6571_vm11, %v8203_v41 }
 0x1a3   : > { %5890 = vmatprep.mubr.msk.bf16.mxu0 %vm6571_vm11, %v8203_v41  ;;  %v1519_v50 = vsel %vm808_vm13, %v1515_v15, %v1499_v17  ;;  %v6385_v17 = vld [vmem:[%s8181_s3 + $0x68] sm:$0xff]  }
 0x1a4   : > { %v1497_v45 = vpop.permute.xlu0 %1496  ;;  %5857 = vmatpush3.bf16.msra.mxu1 %v6376_v1 }
 0x1a5   : > { %5877 = vmatpush3.bf16.msra.mxu0 %v6377_v62  ;;  %5858 = vmatprep.subr.bf16.mxu1 %v8203_v41  ;;  %v1517_v39 = vsel %vm808_vm13, %v1512_v13, %v1497_v45  ;;  %v6388_v13 = vld [vmem:[%s8181_s3 + $0xb8] sm:$0xff]  }
 0x1a6   : > { %v1509_v30 = vpop.permute.xlu1 %1508  ;;  %5878 = vmatprep.subr.bf16.mxu0 %v8203_v41 }
 0x1a7   : > { %v1523_v29 = vsel %vm813_vm12, %v1519_v50, %v1509_v30 }
 0x1a8   : > { %v5086_v6 = vcombine.low %v1523_v29, %v1523_v29  ;;  %v5087_v9 = vcombine.high %v1523_v29, %v1523_v29  ;;  %v1507_v57 = vpop.permute.xlu0 %1506  ;;  %5859 = vmatpush3.bf16.msra.mxu1 %v6378_v12  ;;  %v6386_v12 = vld [vmem:[%s8181_s3 + $0xb0] sm:$0xff]  }
 0x1a9   : > { %v1521_v35 = vsel %vm813_vm12, %v1517_v39, %v1507_v57  ;;  %5879 = vmatpush3.bf16.msra.mxu0 %v6379_v28  ;;  %5860 = vmatprep.subr.bf16.mxu1 %v8203_v41  ;;  %v6387_v28 = vld [vmem:[%s8181_s3 + $0x70] sm:$0xff]   ;;  %v6389_v39 = vld [vmem:[%s8181_s3 + $0x78] sm:$0xff]  }
 0x1aa   : > { %v1549_v19 = vshrl.u32 %v5086_v6, 16  ;;  %v1552_v22 = vshll.u32 %v5086_v6, 16  ;;  %v7215_v5 = vpop.permute.xlu1 %1383  ;;  %v5084_v0 = vcombine.low %v1521_v35, %v1521_v35  ;;  %v5085_v14 = vcombine.high %v1521_v35, %v1521_v35  ;;  %5880 = vmatprep.subr.bf16.mxu0 %v8203_v41 }
 0x1ab   : > { %v1558_v23 = vshll.u32 %v5087_v9, 16  ;;  %v8211_v9 = vcombine.low %v6974_v10, %v6994_v33  ;;  %v8212_v33 = vcombine.low %v6989_v26, %v6992_v32  ;;  %v6392_v26 = vld [vmem:[%s8181_s3 + $0x8] sm:$0xff]  }
 0x1ac   : > { %v1551_v38 = vrot.slane %v1549_v19, 4  ;;  %v1554_v18 = vrot.slane %v1552_v22, 5  ;;  %v1535_v56 = vshrl.u32 %v5084_v0, 16  ;;  %v1538_v7 = vshll.u32 %v5084_v0, 16  ;;  %v7222_v36 = vpop.permute.xlu0 %1381  ;;  %5861 = vmatpush3.bf16.msra.mxu1 %v6380_v2  ;;  %v6390_v22 = vld [vmem:[%s8181_s3] sm:$0xff]  }
 0x1ad   : > { %5881 = vmatpush3.bf16.msra.mxu0 %v6381_v42  ;;  %v1544_v37 = vshll.u32 %v5085_v14, 16  ;;  %5862 = vmatprep.subr.bf16.mxu1 %v8203_v41  ;;  %v1560_v34 = vrot.slane %v1558_v23, 5  ;;  %v6391_v42 = vld [vmem:[%s8181_s3 + $0x80] sm:$0xff]  }
 0x1ae   : > { %v1555_v47 = vor.u32 %v1554_v18, %v1551_v38  ;;  %v7227_v4 = vpop.permute.xlu1 %1395  ;;  %v1537_v59 = vrot.slane %v1535_v56, 4  ;;  %v1540_v51 = vrot.slane %v1538_v7, 5  ;;  %5882 = vmatprep.subr.bf16.mxu0 %v8203_v41 }
 0x1af   : > { %v1546_v15 = vrot.slane %v1544_v37, 5 }
 0x1b0   : > { %v1556_v61 = vrot.slane %v1555_v47, 4  ;;  %v1541_v49 = vor.u32 %v1540_v51, %v1537_v59  ;;  %v7234_v16 = vpop.permute.xlu0 %1393  ;;  %5863 = vmatpush3.bf16.msra.mxu1 %v6382_v48  ;;  %v6393_v48 = vld [vmem:[%s8181_s3 + $0x88] sm:$0xff]  }
 0x1b1   : > { %5883 = vmatpush3.bf16.msra.mxu0 %v6383_v60  ;;  %5864 = vmatprep.subr.bf16.mxu1 %v8203_v41 }
 0x1b2   : > { %v7239_v1 = vpop.permute.xlu1 %1405  ;;  %v1561_v62 = vsel %vm7158_vm1, %v1556_v61, %v1560_v34  ;;  %v1542_v25 = vrot.slane %v1541_v49, 4  ;;  %5884 = vmatprep.subr.bf16.mxu0 %v8203_v41 }
 0x1b4   : > { %v1547_v45 = vsel %vm7158_vm1, %v1542_v25, %v1546_v15  ;;  %v7250_v50 = vpop.permute.xlu0 %1403  ;;  %5865 = vmatpush3.bf16.msra.mxu1 %v6384_v54  ;;  %v6395_v25 = vld [vmem:[%s8181_s3 + $0x90] sm:$0xff]  }
 0x1b5   : > { %5885 = vmatpush3.bf16.msra.mxu0 %v6385_v17  ;;  %v5104_v29 = vcombine.low %v1547_v45, %v1561_v62  ;;  %5866 = vmatprep.subr.bf16.mxu1 %v8203_v41  ;;  %v6394_v17 = vld [vmem:[%s8181_s3 + $0x10] sm:$0xff]  }
 0x1b6   : > { %v2090_v30 = vpop.permute.xlu1 %2089  ;;  %5886 = vmatprep.subr.bf16.mxu0 %v8203_v41 }
 0x1b8   : > { %v2064_v55 = vpop.permute.xlu0 %2063  ;;  %5867 = vmatpush3.bf16.msra.mxu1 %v6386_v12 }
 0x1b9   : > { %5887 = vmatpush3.bf16.msra.mxu0 %v6387_v28  ;;  %5868 = vmatprep.subr.bf16.mxu1 %v8203_v41  ;;  %v2103_v0 = vsel %vm383_vm0, %v8212_v33, %v2064_v55 }
 0x1ba   : > { %v2066_v6 = vpop.permute.xlu1 %2065  ;;  %5888 = vmatprep.subr.bf16.mxu0 %v8203_v41 }
 0x1bb   : > { %v2106_v57 = vsel %vm383_vm0, %v8211_v9, %v2066_v6 }
 0x1bc   : > { %v2088_v19 = vpop.permute.xlu0 %2087  ;;  %5869 = vmatpush3.bf16.msra.mxu1 %v6388_v13  ;;  %v2110_v35 = vsel %vm808_vm13, %v2106_v57, %v2090_v30  ;;  %v6396_v13 = vld [vmem:[%s8181_s3 + $0x18] sm:$0xff]  }
 0x1bd   : > { %5889 = vmatpush3.bf16.msra.mxu0 %v6389_v39  ;;  %5894 = vmatprep.subr.bf16.mxu1 %v8203_v41  ;;  %v2108_v38 = vsel %vm808_vm13, %v2103_v0, %v2088_v19  ;;  %v6397_v39 = vld [vmem:[%s8181_s3 + $0x98] sm:$0xff]  }
 0x1be   : > { %v2100_v2 = vpop.permute.xlu1 %2099  ;;  %5914 = vmatprep.subr.bf16.mxu0 %v8203_v41 }
 0x1bf   : > { %v2114_v10 = vsel %vm813_vm12, %v2110_v35, %v2100_v2  ;;  %5871 = vmatmul.mubr.bf16.vlgmr.msra.gmra.mrb[4].mxu1 %v7070_v53  ;;  %v6398_v2 = vld [vmem:[%s8181_s3 + $0x20] sm:$0xff]  }
 0x1c0   : > { %v5173_v14 = vcombine.low %v2114_v10, %v2114_v10  ;;  %5891 = vmatmul.mubr.bf16.vlgmr.msra.gmra.mrb[12].mxu0 %v5104_v29  ;;  %v5174_v18 = vcombine.high %v2114_v10, %v2114_v10  ;;  %v2098_v23 = vpop.permute.xlu0 %2097  ;;  %5895 = vmatpush3.bf16.msra.mxu1 %v6390_v22  ;;  %v6399_v10 = vld [vmem:[%s8181_s3 + $0xa0] sm:$0xff]  }
 0x1c1   : > { %v2112_v47 = vsel %vm813_vm12, %v2108_v38, %v2098_v23  ;;  %5915 = vmatpush3.bf16.msra.mxu0 %v6391_v42  ;;  %5896 = vmatprep.subr.bf16.mxu1 %v8203_v41 }
 0x1c2   : > { %v2140_v56 = vshrl.u32 %v5173_v14, 16  ;;  %v2143_v7 = vshll.u32 %v5173_v14, 16  ;;  %v7292_v32 = vpop.permute.xlu1 %1974  ;;  %v5171_v53 = vcombine.low %v2112_v47, %v2112_v47  ;;  %v5172_v60 = vcombine.high %v2112_v47, %v2112_v47  ;;  %5916 = vmatprep.subr.bf16.mxu0 %v8203_v41  ;;  %5910 = vmatprep.mubr.msk.bf16.mxu1 %vm6571_vm11, %v8203_v41  ;;  %v6400_v14 = vld [vmem:[%s8181_s3 + $0x28] sm:$0xff]   ;;  %v6402_v47 = vld [vmem:[%s8181_s3 + $0x30] sm:$0xff]  }
 0x1c3   : > { %5930 = vmatprep.mubr.msk.bf16.mxu0 %vm6571_vm11, %v8203_v41  ;;  %v2149_v37 = vshll.u32 %v5174_v18, 16  ;;  %v6401_v18 = vld [vmem:[%s8181_s3 + $0xa8] sm:$0xff]  }
 0x1c4   : > { %v2142_v59 = vrot.slane %v2140_v56, 4  ;;  %v2145_v51 = vrot.slane %v2143_v7, 5  ;;  %v2126_v61 = vshrl.u32 %v5171_v53, 16  ;;  %v2129_v34 = vshll.u32 %v5171_v53, 16  ;;  %v7303_v49 = vpop.permute.xlu0 %1972  ;;  %5897 = vmatpush3.bf16.msra.mxu1 %v6392_v26 }
 0x1c5   : > { %5917 = vmatpush3.bf16.msra.mxu0 %v6393_v48  ;;  %v2135_v12 = vshll.u32 %v5172_v60, 16  ;;  %5898 = vmatprep.subr.bf16.mxu1 %v8203_v41  ;;  %v2151_v28 = vrot.slane %v2149_v37, 5  ;;  %v6403_v48 = vld [vmem:[%s8181_s3 + $0xb0] sm:$0xff]   ;;  %v1412_v53 = vsel %vm383_vm0, %v6919_v8, %v7215_v5  ;;  %v8213_v60 = vld [vmem:[#allocation7_spill] sm:$0xff] }
 0x1c6   : > { %v2146_v54 = vor.u32 %v2145_v51, %v2142_v59  ;;  %v7308_v62 = vpop.permute.xlu1 %1986  ;;  %v2128_v15 = vrot.slane %v2126_v61, 4  ;;  %v2131_v45 = vrot.slane %v2129_v34, 5  ;;  %5918 = vmatprep.subr.bf16.mxu0 %v8203_v41  ;;  %v1409_v59 = vsel %vm383_vm0, %v8213_v60, %v7222_v36  ;;  %v6404_v8 = vld [vmem:[%s8181_s3 + $0x38] sm:$0xff]  }
 0x1c7   : > { %v2137_v19 = vrot.slane %v2135_v12, 5  ;;  %v1416_v34 = vsel %vm808_vm13, %v1412_v53, %v7227_v4  ;;  %v6405_v5 = vld [vmem:[%s8181_s3 + $0xb8] sm:$0xff]   ;;  %v1414_v36 = vsel %vm808_vm13, %v1409_v59, %v7234_v16  ;;  %v6406_v16 = vld [vmem:[%s8181_s3 + $0x40] sm:$0xff]   ;;  %v6419_v53 = vld [vmem:[%s8181_s3 + $0x30] sm:$0xff]   ;;  %v2003_v60 = vsel %vm383_vm0, %v7055_v52, %v7292_v32 }
 0x1c8   : > { %v2147_v30 = vrot.slane %v2146_v54, 4  ;;  %v2132_v29 = vor.u32 %v2131_v45, %v2128_v15  ;;  %v7315_v55 = vpop.permute.xlu0 %1984  ;;  %5899 = vmatpush3.bf16.msra.mxu1 %v6394_v17  ;;  %v1420_v4 = vsel %vm813_vm12, %v1416_v34, %v7239_v1  ;;  %v2000_v59 = vsel %vm383_vm0, %v7085_v44, %v7303_v49  ;;  %v6422_v49 = vld [vmem:[%s8181_s3 + $0x80] sm:$0xff]   ;;  %v6429_v34 = vld [vmem:[%s8181_s3 + $0x58] sm:$0xff]  }
 0x1c9   : > { %5919 = vmatpush3.bf16.msra.mxu0 %v6395_v25  ;;  %5900 = vmatprep.subr.bf16.mxu1 %v8203_v41  ;;  %v1418_v25 = vsel %vm813_vm12, %v1414_v36, %v7250_v50  ;;  %v2005_v52 = vsel %vm808_vm13, %v2000_v59, %v7315_v55  ;;  %v6435_v36 = vld [vmem:[%s8181_s3 + $0x70] sm:$0xff]  }
 0x1ca   : > { %v7320_v6 = vpop.permute.xlu1 %1996  ;;  %v7327_v9 = vsel %vm7158_vm1, %v2147_v30, %v2151_v28  ;;  %v2133_v57 = vrot.slane %v2132_v29, 4  ;;  %5920 = vmatprep.subr.bf16.mxu0 %v8203_v41  ;;  %v5113_v1 = vcombine.low %v1418_v25, %v1420_v4  ;;  %v6438_v4 = vld [vmem:[%s8181_s3] sm:$0xff]  }
 0x1cb   : > { %v6439_v25 = vld [vmem:[%s8181_s3 + $0x80] sm:$0xff]  }
 0x1cc   : > { %v7333_v22 = vsel %vm7158_vm1, %v2133_v57, %v2137_v19  ;;  %v7335_v35 = vpop.permute.xlu0 %1994  ;;  %5901 = vmatpush3.bf16.msra.mxu1 %v6396_v13  ;;  %v6407_v13 = vld [vmem:[%s8181_s3] sm:$0xff]  }
 0x1cd   : > { %5921 = vmatpush3.bf16.msra.mxu0 %v6397_v39  ;;  %v5191_v33 = vcombine.low %v7333_v22, %v7327_v9  ;;  %5902 = vmatprep.subr.bf16.mxu1 %v8203_v41  ;;  %v2009_v32 = vsel %vm813_vm12, %v2005_v52, %v7335_v35  ;;  %v6425_v35 = vld [vmem:[%s8181_s3 + $0x48] sm:$0xff]   ;;  %v6426_v9 = vld [vmem:[%s8181_s3 + $0x90] sm:$0xff]  }
 0x1ce   : > { %v2657_v42 = vpop.permute.xlu1 %2656  ;;  %5922 = vmatprep.subr.bf16.mxu0 %v8203_v41  ;;  %v6427_v22 = vld [vmem:[%s8181_s3 + $0x50] sm:$0xff]  }
 0x1cf   : > { %v2697_v23 = vsel %vm383_vm0, %v5251_v40, %v2657_v42 }
 0x1d0   : > { %v2655_v0 = vpop.permute.xlu0 %2654  ;;  %5903 = vmatpush3.bf16.msra.mxu1 %v6398_v2 }
 0x1d1   : > { %5923 = vmatpush3.bf16.msra.mxu0 %v6399_v10  ;;  %5904 = vmatprep.subr.bf16.mxu1 %v8203_v41  ;;  %v2694_v43 = vsel %vm383_vm0, %v5250_v3, %v2655_v0  ;;  %v6408_v10 = vld [vmem:[%s8181_s3 + $0x48] sm:$0xff]  }
 0x1d2   : > { %v2681_v38 = vpop.permute.xlu1 %2680  ;;  %5924 = vmatprep.subr.bf16.mxu0 %v8203_v41  ;;  %v6409_v0 = vld [vmem:[%s8181_s3 + $0x8] sm:$0xff]  }
 0x1d3   : > { %v2701_v7 = vsel %vm808_vm13, %v2697_v23, %v2681_v38  ;;  %v6410_v23 = vld [vmem:[%s8181_s3 + $0x50] sm:$0xff]  }
 0x1d4   : > { %v2679_v56 = vpop.permute.xlu0 %2678  ;;  %5905 = vmatpush3.bf16.msra.mxu1 %v6400_v14 }
 0x1d5   : > { %5925 = vmatpush3.bf16.msra.mxu0 %v6401_v18  ;;  %5906 = vmatprep.subr.bf16.mxu1 %v8203_v41  ;;  %v2699_v51 = vsel %vm808_vm13, %v2694_v43, %v2679_v56  ;;  %v6411_v56 = vld [vmem:[%s8181_s3 + $0x10] sm:$0xff]   ;;  %v6417_v43 = vld [vmem:[%s8181_s3 + $0x28] sm:$0xff]  }
 0x1d6   : > { %v2691_v26 = vpop.permute.xlu1 %2690  ;;  %5926 = vmatprep.subr.bf16.mxu0 %v8203_v41 }
 0x1d7   : > { %v2705_v58 = vsel %vm813_vm12, %v2701_v7, %v2691_v26  ;;  %v6414_v26 = vld [vmem:[%s8181_s3 + $0x60] sm:$0xff]  }
 0x1d8   : > { %v5260_v40 = vcombine.low %v2705_v58, %v2705_v58  ;;  %v5261_v37 = vcombine.high %v2705_v58, %v2705_v58  ;;  %v2689_v61 = vpop.permute.xlu0 %2688  ;;  %5907 = vmatpush3.bf16.msra.mxu1 %v6402_v47  ;;  %v6413_v47 = vld [vmem:[%s8181_s3 + $0x18] sm:$0xff]   ;;  %v6416_v58 = vld [vmem:[%s8181_s3 + $0x68] sm:$0xff]  }
 0x1d9   : > { %v2703_v3 = vsel %vm813_vm12, %v2699_v51, %v2689_v61  ;;  %5927 = vmatpush3.bf16.msra.mxu0 %v6403_v48  ;;  %5908 = vmatprep.subr.bf16.mxu1 %v8203_v41  ;;  %v6415_v48 = vld [vmem:[%s8181_s3 + $0x20] sm:$0xff]   ;;  %v6420_v51 = vld [vmem:[%s8181_s3 + $0x78] sm:$0xff]   ;;  %v2007_v61 = vsel %vm808_vm13, %v2003_v60, %v7308_v62 }
 0x1da   : > { %v2731_v27 = vshrl.u32 %v5260_v40, 16  ;;  %v2734_v31 = vshll.u32 %v5260_v40, 16  ;;  %v5258_v54 = vcombine.low %v2703_v3, %v2703_v3  ;;  %v5259_v17 = vcombine.high %v2703_v3, %v2703_v3  ;;  %5928 = vmatprep.subr.bf16.mxu0 %v8203_v41  ;;  %v6418_v40 = vld [vmem:[%s8181_s3 + $0x70] sm:$0xff]   ;;  %v6423_v62 = vld [vmem:[%s8181_s3 + $0x40] sm:$0xff]   ;;  %v6432_v3 = vld [vmem:[%s8181_s3 + $0xa8] sm:$0xff]  }
 0x1db   : > { %v2740_v12 = vshll.u32 %v5261_v37, 16  ;;  %v6421_v37 = vld [vmem:[%s8181_s3 + $0x38] sm:$0xff]   ;;  %v2011_v44 = vsel %vm813_vm12, %v2007_v61, %v7320_v6  ;;  %v6424_v6 = vld [vmem:[%s8181_s3 + $0x88] sm:$0xff]  }
 0x1dc   : > { %v2733_v15 = vrot.slane %v2731_v27, 4  ;;  %v2736_v45 = vrot.slane %v2734_v31, 5  ;;  %v2717_v30 = vshrl.u32 %v5258_v54, 16  ;;  %v2720_v28 = vshll.u32 %v5258_v54, 16  ;;  %5909 = vmatpush3.bf16.msra.mxu1 %v6404_v8  ;;  %v6430_v27 = vld [vmem:[%s8181_s3 + $0xa0] sm:$0xff]   ;;  %v6433_v8 = vld [vmem:[%s8181_s3 + $0x68] sm:$0xff]  }
 0x1dd   : > { %5929 = vmatpush3.bf16.msra.mxu0 %v6405_v5  ;;  %v2726_v50 = vshll.u32 %v5259_v17, 16  ;;  %5934 = vmatprep.subr.bf16.mxu1 %v8203_v41  ;;  %v2742_v2 = vrot.slane %v2740_v12, 5  ;;  %v5200_v55 = vcombine.low %v2009_v32, %v2011_v44  ;;  %v6431_v31 = vld [vmem:[%s8181_s3 + $0x60] sm:$0xff]   ;;  %v6434_v5 = vld [vmem:[%s8181_s3 + $0xb0] sm:$0xff]   ;;  %v6436_v54 = vld [vmem:[%s8181_s3 + $0xb8] sm:$0xff]  }
 0x1de   : > { %v2737_v29 = vor.u32 %v2736_v45, %v2733_v15  ;;  %v2719_v39 = vrot.slane %v2717_v30, 4  ;;  %v2722_v57 = vrot.slane %v2720_v28, 5  ;;  %5954 = vmatprep.subr.bf16.mxu0 %v8203_v41  ;;  %v6437_v17 = vld [vmem:[%s8181_s3 + $0x78] sm:$0xff]   ;;  %v6440_v15 = vld [vmem:[%s8181_s3 + $0x8] sm:$0xff]   ;;  %v6443_v12 = vld [vmem:[%s8181_s3 + $0x90] sm:$0xff]  }
 0x1df   : > { %5911 = vmatmul.mubr.bf16.vlgmr.msra.gmra.mrb[8].mxu1 %v5113_v1  ;;  %v2728_v18 = vrot.slane %v2726_v50, 5  ;;  %v6441_v45 = vld [vmem:[%s8181_s3 + $0x88] sm:$0xff]   ;;  %v6444_v30 = vld [vmem:[%s8181_s3 + $0x18] sm:$0xff]   ;;  %v6447_v1 = vld [vmem:[%s8181_s3 + $0xa0] sm:$0xff]  }
 0x1e0   : > { %v2738_v19 = vrot.slane %v2737_v29, 4  ;;  %v2723_v42 = vor.u32 %v2722_v57, %v2719_v39  ;;  %5931 = vmatmul.mubr.bf16.vlgmr.msra.gmra.mrb[16].mxu0 %v7078_v63  ;;  %5935 = vmatpush3.bf16.msra.mxu1 %v6406_v16  ;;  %v6445_v28 = vld [vmem:[%s8181_s3 + $0x98] sm:$0xff]   ;;  %v2566_v29 = vpop.permute.xlu1 %2565  ;;  %v2576_v16 = vpop.permute.xlu0 %2575  ;;  %v6448_v39 = vld [vmem:[%s8181_s3 + $0x28] sm:$0xff]  }
 0x1e1   : > { %5955 = vmatpush3.bf16.msra.mxu0 %v6407_v13  ;;  %5936 = vmatprep.subr.bf16.mxu1 %v8203_v41  ;;  %v6446_v13 = vld [vmem:[%s8181_s3 + $0x20] sm:$0xff]   ;;  %v6449_v57 = vld [vmem:[%s8181_s3 + $0xa8] sm:$0xff]  }
 0x1e2   : > { %v7414_v14 = vsel %vm7158_vm1, %v2738_v19, %v2742_v2  ;;  %v2724_v38 = vrot.slane %v2723_v42, 4  ;;  %5956 = vmatprep.subr.bf16.mxu0 %v8203_v41  ;;  %5950 = vmatprep.mubr.msk.bf16.mxu1 %vm6571_vm11, %v8203_v41  ;;  %v6450_v2 = vld [vmem:[%s8181_s3 + $0x30] sm:$0xff]  }
 0x1e3   : > { %5970 = vmatprep.mubr.msk.bf16.mxu0 %vm6571_vm11, %v8203_v41  ;;  %v6451_v42 = vld [vmem:[%s8181_s3 + $0xb0] sm:$0xff]  }
 0x1e4   : > { %v7424_v63 = vsel %vm7158_vm1, %v2724_v38, %v2728_v18  ;;  %5937 = vmatpush3.bf16.msra.mxu1 %v6408_v10  ;;  %v2578_v50 = vpop.permute.xlu1 %2577  ;;  %v2564_v19 = vpop.permute.xlu0 %2563  ;;  %v2594_v38 = vsel %vm383_vm0, %v7118_v24, %v2566_v29  ;;  %v6452_v18 = vld [vmem:[%s8181_s3 + $0x38] sm:$0xff]   ;;  %vm3492_vm1 = vsmask.f32 5392 }
 0x1e5   : > { %5957 = vmatpush3.bf16.msra.mxu0 %v6409_v0  ;;  %v5278_v7 = vcombine.low %v7424_v63, %v7414_v14  ;;  %5938 = vmatprep.subr.bf16.mxu1 %v8203_v41  ;;  %v2591_v10 = vsel %vm383_vm0, %v7126_v46, %v2564_v19  ;;  %v6453_v63 = vld [vmem:[%s8181_s3 + $0xb8] sm:$0xff]   ;;  %v708_v46 = vld [vmem:[#allocation3 + $0x4] sm:$0x1]  ;;  %vm723_vm0 = vcmask 1042434  }
 0x1e6   : > { %5958 = vmatprep.subr.bf16.mxu0 %v8203_v41  ;;  %vm7644_vm5 = vmand %vm723_vm0, %vm724_vm3  ;;  %vm3494_vm3 = vsmask.f32 7448 }
 0x1e8   : > { %5939 = vmatpush3.bf16.msra.mxu1 %v6410_v23  ;;  %v2588_v0 = vpop.permute.xlu1 %2587  ;;  %v2586_v14 = vpop.permute.xlu0 %2585  ;;  %v2598_v23 = vsel %vm808_vm13, %v2594_v38, %v2578_v50 }
 0x1e9   : > { %5959 = vmatpush3.bf16.msra.mxu0 %v6411_v56  ;;  %5940 = vmatprep.subr.bf16.mxu1 %v8203_v41  ;;  %v2596_v56 = vsel %vm808_vm13, %v2591_v10, %v2576_v16  ;;  %v2602_v24 = vsel %vm813_vm12, %v2598_v23, %v2588_v0 }
 0x1ea   : > { %5960 = vmatprep.subr.bf16.mxu0 %v8203_v41 }
 0x1ec   : > { %5941 = vmatpush3.bf16.msra.mxu1 %v6412_v11  ;;  %v6478_v11 = vld [vmem:[%s8183_s5 + $0x20] sm:$0xff]  }
 0x1ed   : > { %5961 = vmatpush3.bf16.msra.mxu0 %v6413_v47  ;;  %5942 = vmatprep.subr.bf16.mxu1 %v8203_v41  ;;  %v709_v47 = vsel %vm6648_vm4, 0, %v708_v46 }
 0x1ee   : > { %5962 = vmatprep.subr.bf16.mxu0 %v8203_v41  ;;  %710 = vst [vmem:[#allocation3 + $0x4] sm:$0x1] %v709_v47 }
 0x1f0   : > { %5943 = vmatpush3.bf16.msra.mxu1 %v6414_v26 }
 0x1f1   : > { %5963 = vmatpush3.bf16.msra.mxu0 %v6415_v48  ;;  %5944 = vmatprep.subr.bf16.mxu1 %v8203_v41  ;;  %v729_v48 = vld [vmem:[#allocation3 + $0x4] sm:$0x4] }
 0x1f2   : > { %5964 = vmatprep.subr.bf16.mxu0 %v8203_v41 }
 0x1f4   : > { %5945 = vmatpush3.bf16.msra.mxu1 %v6416_v58  ;;  %v730_v58 = vsel %vm7644_vm5, 0, %v729_v48 }
 0x1f5   : > { %5965 = vmatpush3.bf16.msra.mxu0 %v6417_v43  ;;  %5946 = vmatprep.subr.bf16.mxu1 %v8203_v41  ;;  %731 = vst [vmem:[#allocation3 + $0x4] sm:$0x4] %v730_v58 }
 0x1f6   : > { %5966 = vmatprep.subr.bf16.mxu0 %v8203_v41 }
 0x1f8   : > { %5947 = vmatpush3.bf16.msra.mxu1 %v6418_v40  ;;  %v705_v40 = vld [vmem:[#allocation3] sm:$0x1] }
 0x1f9   : > { %5967 = vmatpush3.bf16.msra.mxu0 %v6419_v53  ;;  %5948 = vmatprep.subr.bf16.mxu1 %v8203_v41  ;;  %v726_v53 = vld [vmem:[#allocation3] sm:$0x4]  ;;  %v706_v60 = vsel %vm6648_vm4, 0, %v705_v40 }
 0x1fa   : > { %5968 = vmatprep.subr.bf16.mxu0 %v8203_v41  ;;  %v727_v59 = vsel %vm7644_vm5, 0, %v726_v53  ;;  %707 = vst [vmem:[#allocation3] sm:$0x1] %v706_v60 }
 0x1fb   : > { %728 = vst [vmem:[#allocation3] sm:$0x4] %v727_v59 }
 0x1fc   : > { %5949 = vmatpush3.bf16.msra.mxu1 %v6420_v51  ;;  %v711_v51 = vld [vmem:[#allocation3 + $0x8] sm:$0x1]  ;;  %v1345_v10 = vld [vmem:[#allocation3 + $0x4] sm:$0x7] }
 0x1fd   : > { %5969 = vmatpush3.bf16.msra.mxu0 %v6421_v37  ;;  %5974 = vmatprep.subr.bf16.mxu1 %v8203_v41  ;;  %v732_v37 = vld [vmem:[#allocation3 + $0x8] sm:$0x4] }
 0x1fe   : > { %5994 = vmatprep.subr.bf16.mxu0 %v8203_v41  ;;  %v733_v61 = vsel %vm7644_vm5, 0, %v732_v37 }
 0x1ff   : > { %5951 = vmatmul.mubr.bf16.vlgmr.msra.gmra.mrb[12].mxu1 %v5191_v33  ;;  %v6428_v33 = vld [vmem:[%s8181_s3 + $0x98] sm:$0xff]   ;;  %734 = vst [vmem:[#allocation3 + $0x8] sm:$0x4] %v733_v61 }
 0x200   : > { %5971 = vmatmul.mubr.bf16.vlgmr.msra.gmra.mrb[20].mxu0 %v5200_v55  ;;  %5975 = vmatpush3.bf16.msra.mxu1 %v6422_v49 }
 0x201   : > { %5995 = vmatpush3.bf16.msra.mxu0 %v6423_v62  ;;  %5976 = vmatprep.subr.bf16.mxu1 %v8203_v41  ;;  %v6455_v38 = vld [vmem:[#allocation3] ss:$0 sps:$4 sm:$0x77]  }
 0x202   : > { %5996 = vmatprep.subr.bf16.mxu0 %v8203_v41  ;;  %5990 = vmatprep.mubr.msk.bf16.mxu1 %vm6571_vm11, %v8203_v41  ;;  %v3132_v53 = vshrl.u32 %v6455_v38, 16 }
 0x203   : > { %6010 = vmatprep.mubr.msk.bf16.mxu0 %vm6571_vm11, %v8203_v41 }
 0x204   : > { %5977 = vmatpush3.bf16.msra.mxu1 %v6424_v6 }
 0x205   : > { %5997 = vmatpush3.bf16.msra.mxu0 %v6425_v35  ;;  %5978 = vmatprep.subr.bf16.mxu1 %v8203_v41 }
 0x206   : > { %5998 = vmatprep.subr.bf16.mxu0 %v8203_v41 }
 0x208   : > { %5979 = vmatpush3.bf16.msra.mxu1 %v6426_v9 }
 0x209   : > { %5999 = vmatpush3.bf16.msra.mxu0 %v6427_v22  ;;  %5980 = vmatprep.subr.bf16.mxu1 %v8203_v41 }
 0x20a   : > { %6000 = vmatprep.subr.bf16.mxu0 %v8203_v41 }
 0x20c   : > { %5981 = vmatpush3.bf16.msra.mxu1 %v6428_v33 }
 0x20d   : > { %6001 = vmatpush3.bf16.msra.mxu0 %v6429_v34  ;;  %5982 = vmatprep.subr.bf16.mxu1 %v8203_v41  ;;  %v7668_v34 = vld [vmem:[%s8182_s4] ss:$0 sm:$0xff] }
 0x20e   : > { %6002 = vmatprep.subr.bf16.mxu0 %v8203_v41 }
 0x210   : > { %5983 = vmatpush3.bf16.msra.mxu1 %v6430_v27 }
 0x211   : > { %6003 = vmatpush3.bf16.msra.mxu0 %v6431_v31  ;;  %5984 = vmatprep.subr.bf16.mxu1 %v8203_v41 }
 0x212   : > { %6004 = vmatprep.subr.bf16.mxu0 %v8203_v41 }
 0x214   : > { %5985 = vmatpush3.bf16.msra.mxu1 %v6432_v3 }
 0x215   : > { %6005 = vmatpush3.bf16.msra.mxu0 %v6433_v8  ;;  %5986 = vmatprep.subr.bf16.mxu1 %v8203_v41 }
 0x216   : > { %6006 = vmatprep.subr.bf16.mxu0 %v8203_v41 }
 0x218   : > { %5987 = vmatpush3.bf16.msra.mxu1 %v6434_v5 }
 0x219   : > { %6007 = vmatpush3.bf16.msra.mxu0 %v6435_v36  ;;  %5988 = vmatprep.subr.bf16.mxu1 %v8203_v41 }
 0x21a   : > { %6008 = vmatprep.subr.bf16.mxu0 %v8203_v41 }
 0x21c   : > { %5989 = vmatpush3.bf16.msra.mxu1 %v6436_v54 }
 0x21d   : > { %6009 = vmatpush3.bf16.msra.mxu0 %v6437_v17  ;;  %6014 = vmatprep.subr.bf16.mxu1 %v8203_v41 }
 0x21e   : > { %6034 = vmatprep.subr.bf16.mxu0 %v8203_v41 }
 0x21f   : > { %5991 = vmatmul.mubr.bf16.vlgmr.msra.gmra.mrb[16].mxu1 %v7087_v21  ;;  %v6442_v21 = vld [vmem:[%s8181_s3 + $0x10] sm:$0xff]  }
 0x220   : > { %6011 = vmatmul.mubr.bf16.vlgmr.msra.gmra.mrb[24].mxu0 %v5278_v7  ;;  %6015 = vmatpush3.bf16.msra.mxu1 %v6438_v4  ;;  %v2600_v7 = vsel %vm813_vm12, %v2596_v56, %v2586_v14  ;;  %vm3489_vm12 = vsmask.f32 1280 }
 0x221   : > { %6035 = vmatpush3.bf16.msra.mxu0 %v6439_v25  ;;  %6016 = vmatprep.subr.bf16.mxu1 %v8203_v41  ;;  %v5287_v43 = vcombine.low %v2600_v7, %v2602_v24  ;;  %v3134_v24 = vshll.u32 %v6455_v38, 16  ;;  %vm3491_vm15 = vmor %vm3489_vm12, %vm3490_vm14 }
 0x222   : > { %6036 = vmatprep.subr.bf16.mxu0 %v8203_v41  ;;  %6030 = vmatprep.mubr.msk.bf16.mxu1 %vm6571_vm11, %v8203_v41 }
 0x223   : > { %6050 = vmatprep.mubr.msk.bf16.mxu0 %vm6571_vm11, %v8203_v41  ;;  %v3136_v37 = vrot.slane %v3134_v24, 1 }
 0x224   : > { %6017 = vmatpush3.bf16.msra.mxu1 %v6440_v15 }
 0x225   : > { %6037 = vmatpush3.bf16.msra.mxu0 %v6441_v45  ;;  %6018 = vmatprep.subr.bf16.mxu1 %v8203_v41 }
 0x226   : > { %6038 = vmatprep.subr.bf16.mxu0 %v8203_v41 }
 0x228   : > { %6019 = vmatpush3.bf16.msra.mxu1 %v6442_v21 }
 0x229   : > { %6039 = vmatpush3.bf16.msra.mxu0 %v6443_v12  ;;  %6020 = vmatprep.subr.bf16.mxu1 %v8203_v41 }
 0x22a   : > { %6040 = vmatprep.subr.bf16.mxu0 %v8203_v41 }
 0x22c   : > { %6021 = vmatpush3.bf16.msra.mxu1 %v6444_v30  ;;  %v714_v30 = vld [vmem:[#allocation3 + $0xc] sm:$0x1] }
 0x22d   : > { %6041 = vmatpush3.bf16.msra.mxu0 %v6445_v28  ;;  %6022 = vmatprep.subr.bf16.mxu1 %v8203_v41  ;;  %v735_v28 = vld [vmem:[#allocation3 + $0xc] sm:$0x4]  ;;  %v715_v29 = vsel %vm6648_vm4, 0, %v714_v30 }
 0x22e   : > { %6042 = vmatprep.subr.bf16.mxu0 %v8203_v41  ;;  %v736_v16 = vsel %vm7644_vm5, 0, %v735_v28  ;;  %716 = vst [vmem:[#allocation3 + $0xc] sm:$0x1] %v715_v29  ;;  %v6476_v30 = vld [vmem:[%s8183_s5 + $0x58] sm:$0xff]   ;;  %v741_v29 = vld [vmem:[#allocation3 + $0x14] sm:$0x4] }
 0x22f   : > { %737 = vst [vmem:[#allocation3 + $0xc] sm:$0x4] %v736_v16  ;;  %v742_v16 = vsel %vm7644_vm5, 0, %v741_v29 }
 0x230   : > { %6023 = vmatpush3.bf16.msra.mxu1 %v6446_v13  ;;  %743 = vst [vmem:[#allocation3 + $0x14] sm:$0x4] %v742_v16 }
 0x231   : > { %6043 = vmatpush3.bf16.msra.mxu0 %v6447_v1  ;;  %6024 = vmatprep.subr.bf16.mxu1 %v8203_v41 }
 0x232   : > { %6044 = vmatprep.subr.bf16.mxu0 %v8203_v41 }
 0x234   : > { %6025 = vmatpush3.bf16.msra.mxu1 %v6448_v39 }
 0x235   : > { %6045 = vmatpush3.bf16.msra.mxu0 %v6449_v57  ;;  %6026 = vmatprep.subr.bf16.mxu1 %v8203_v41 }
 0x236   : > { %6046 = vmatprep.subr.bf16.mxu0 %v8203_v41 }
 0x238   : > { %6027 = vmatpush3.bf16.msra.mxu1 %v6450_v2 }
 0x239   : > { %6047 = vmatpush3.bf16.msra.mxu0 %v6451_v42  ;;  %6028 = vmatprep.subr.bf16.mxu1 %v8203_v41  ;;  %v6572_v42 = vmov 1983009808  }
 0x23a   : > { %6048 = vmatprep.subr.bf16.mxu0 %v8203_v41 }
 0x23c   : > { %6029 = vmatpush3.bf16.msra.mxu1 %v6452_v18 }
 0x23d   : > { %6049 = vmatpush3.bf16.msra.mxu0 %v6453_v63  ;;  %6054 = vmatprep.subr.bf16.mxu1 %v8203_v41 }
 0x23e   : > { %6074 = vmatprep.subr.bf16.mxu0 %v8203_v41 }
 0x23f   : > { %6031 = vmatmul.mubr.bf16.vlgmr.msra.gmra.mrb[20].mxu1 %v5287_v43 }
 0x240   : > { %6051 = vmatmul.mubr.bf16.vlgmr.msra.gmra.mrb[28].mxu0 %v7097_v20  ;;  %6070 = vmatprep.mubr.msk.bf16.mxu1 %vm6571_vm11, %v8203_v41  ;;  %v712_v20 = vsel %vm6648_vm4, 0, %v711_v51 }
 0x241   : > { %6090 = vmatprep.mubr.msk.bf16.mxu0 %vm6571_vm11, %v8203_v41  ;;  %713 = vst [vmem:[#allocation3 + $0x8] sm:$0x1] %v712_v20 }
 0x272   : > { %v1065_v52 = vpop.f32.mrb[0].mxu1 }
 0x273   : > { %v1160_v44 = vpop.f32.mrb[8].mxu0  ;;  %v5832_v32 = vpop.f32.mrb[1].mxu1 }
 0x274   : > { %v1161_v49 = vadd.f32 %v1160_v44, %v1065_v52  ;;  %v5852_v62 = vpop.f32.mrb[9].mxu0  ;;  %v1068_v55 = vpop.f32.mrb[2].mxu1 }
 0x275   : > { %v1163_v6 = vpop.f32.mrb[10].mxu0  ;;  %v5833_v35 = vpop.f32.mrb[3].mxu1  ;;  %v3137_v62 = vor.u32 %v3136_v37, %v3132_v53  ;;  %v6483_v53 = vld [vmem:[%s8183_s5 + $0x70] sm:$0xff]  }
 0x276   : > { %v1164_v9 = vadd.f32 %v1163_v6, %v1068_v55  ;;  %v5853_v22 = vpop.f32.mrb[11].mxu0 }
 0x277   : > { %v6466_v22 = vld [vmem:[%s8183_s5 + $0x40] sm:$0xff]  }
 0x278   : > { %6055 = vmatpush3.bf16.msra.mxu1 %v6466_v22 }
 0x279   : > { %6056 = vmatprep.subr.bf16.mxu1 %v8203_v41 }
 0x292   : > { %v1304_v33 = vpop.f32.mrb[4].mxu1 }
 0x293   : > { %v1664_v27 = vpop.f32.mrb[12].mxu0  ;;  %v1311_v31 = vadd.f32 %v1304_v33, %v1161_v49  ;;  %v5872_v3 = vpop.f32.mrb[5].mxu1  ;;  %v717_v33 = vld [vmem:[#allocation3 + $0x10] sm:$0x1] }
 0x294   : > { %v5892_v8 = vpop.f32.mrb[13].mxu0  ;;  %v1307_v5 = vpop.f32.mrb[6].mxu1 }
 0x295   : > { %v1667_v36 = vpop.f32.mrb[14].mxu0  ;;  %v1320_v54 = vadd.f32 %v7668_v34, %v1311_v31  ;;  %v1312_v17 = vadd.f32 %v1307_v5, %v1164_v9  ;;  %v5873_v4 = vpop.f32.mrb[7].mxu1  ;;  %v6465_v9 = vld [vmem:[%s8183_s5] sm:$0xff]   ;;  %v6468_v5 = vld [vmem:[%s8183_s5 + $0x8] sm:$0xff]  }
 0x296   : > { %v5893_v25 = vpop.f32.mrb[15].mxu0  ;;  %v738_v31 = vld [vmem:[#allocation3 + $0x10] sm:$0x4]  ;;  %6075 = vmatpush3.bf16.msra.mxu0 %v6465_v9 }
 0x297   : > { %v1321_v15 = vadd.f32 %v7668_v34, %v1312_v17  ;;  %v1322_v45 = vmax.f32 %v1320_v54, 0.0  ;;  %v739_v8 = vsel %vm7644_vm5, 0, %v738_v31  ;;  %6076 = vmatprep.subr.bf16.mxu0 %v8203_v41  ;;  %v6472_v54 = vld [vmem:[%s8183_s5 + $0x10] sm:$0xff]  }
 0x298   : > { %740 = vst [vmem:[#allocation3 + $0x10] sm:$0x4] %v739_v8  ;;  %v6473_v17 = vld [vmem:[%s8183_s5 + $0x50] sm:$0xff]  }
 0x299   : > { %v1323_v21 = vmax.f32 %v1321_v15, 0.0 }
 0x29a   : > { %6077 = vmatpush3.bf16.msra.mxu0 %v6468_v5 }
 0x29b   : > { %v1324_v12 = vmax.f32 %v1322_v45, %v1323_v21  ;;  %6078 = vmatprep.subr.bf16.mxu0 %v8203_v41  ;;  %v720_v45 = vld [vmem:[#allocation3 + $0x14] sm:$0x1] }
 0x29c   : > { %v721_v28 = vsel %vm6648_vm4, 0, %v720_v45 }
 0x29d   : > { %1325 = vst [vmem:[#allocation4] sm:$0xff] %v1324_v12  ;;  %v6475_v12 = vld [vmem:[%s8183_s5 + $0x18] sm:$0xff]   ;;  %722 = vst [vmem:[#allocation3 + $0x14] sm:$0x1] %v721_v28 }
 0x29e   : > { %6079 = vmatpush3.bf16.msra.mxu0 %v6472_v54 }
 0x29f   : > { %6080 = vmatprep.subr.bf16.mxu0 %v8203_v41 }
 0x2a2   : > { %6081 = vmatpush3.bf16.msra.mxu0 %v6475_v12 }
 0x2a3   : > { %6082 = vmatprep.subr.bf16.mxu0 %v8203_v41 }
 0x2a4   : > { %v1326_v13 = vld [vmem:[#allocation4] ss:$2 sm:$0xf]  ;;  %v1328_v1 = vld [vmem:[#allocation4 + $0x1] ss:$2 sm:$0xf] }
 0x2a5   : > { %v1329_v39 = vmax.f32 %v1326_v13, %v1328_v1 }
 0x2a6   : > { %6083 = vmatpush3.bf16.msra.mxu0 %v6478_v11 }
 0x2a7   : > { %v5585_v57 = vpack.c.bf16 %v1329_v39, %v1329_v39  ;;  %6084 = vmatprep.subr.bf16.mxu0 %v8203_v41 }
 0x2a9   : > { %v1335_v50 = vshrl.u32 %v5585_v57, 16  ;;  %v1338_v2 = vshll.u32 %v5585_v57, 16  ;;  %v6479_v57 = vld [vmem:[%s8183_s5 + $0x60] sm:$0xff]  }
 0x2ab   : > { %v1337_v19 = vrot.slane %v1335_v50, 7  ;;  %v1936_v50 = vld [vmem:[#allocation3 + $0x8] sm:$0x7] }
 0x2ad   : > { %v1340_v0 = vor.u32 %v1338_v2, %v1337_v19 }
 0x2af   : > { %v1346_v14 = vsel %vm7677_vm7, %v1340_v0, %v1345_v10  ;;  %v6480_v10 = vld [vmem:[%s8183_s5 + $0x28] sm:$0xff]  }
 0x2b0   : > { %1347 = vst [vmem:[#allocation3 + $0x4] sm:$0x7] %v1346_v14  ;;  %6085 = vmatpush3.bf16.msra.mxu0 %v6480_v10 }
 0x2b1   : > { %6086 = vmatprep.subr.bf16.mxu0 %v8203_v41 }
 0x2b2   : > { %v1759_v18 = vpop.f32.mrb[8].mxu1 }
 0x2b3   : > { %v1898_v63 = vpop.f32.mrb[16].mxu0  ;;  %v1760_v23 = vadd.f32 %v1759_v18, %v1664_v27  ;;  %v5912_v56 = vpop.f32.mrb[9].mxu1  ;;  %v718_v27 = vsel %vm6648_vm4, 0, %v717_v33  ;;  %vm3211_vm4 = vmor %vm588_vm2, %vm723_vm0 }
 0x2b4   : > { %v5932_v46 = vpop.f32.mrb[17].mxu0  ;;  %v1762_v7 = vpop.f32.mrb[10].mxu1  ;;  %719 = vst [vmem:[#allocation3 + $0x10] sm:$0x1] %v718_v27  ;;  %vm3213_vm9 = vmor %vm3211_vm4, %vm3212_vm8 }
 0x2b5   : > { %v1901_v47 = vpop.f32.mrb[18].mxu0  ;;  %v1905_v48 = vadd.f32 %v1898_v63, %v1760_v23  ;;  %v1763_v58 = vadd.f32 %v1762_v7, %v1667_v36  ;;  %v5913_v43 = vpop.f32.mrb[11].mxu1  ;;  %v6469_v36 = vld [vmem:[%s8183_s5 + $0x48] sm:$0xff]   ;;  %vm7793_vm2 = vmor %vm3213_vm9, %vm3214_vm10 }
 0x2b6   : > { %v5933_v40 = vpop.f32.mrb[19].mxu0  ;;  %6057 = vmatpush3.bf16.msra.mxu1 %v6469_v36  ;;  %vm3493_vm0 = vmor %vm3491_vm15, %vm3492_vm1 }
 0x2b7   : > { %v1914_v60 = vadd.f32 %v7668_v34, %v1905_v48  ;;  %v1906_v59 = vadd.f32 %v1901_v47, %v1763_v58  ;;  %v6454_v51 = vld [vmem:[#allocation3 + $0x4] ss:$0 sps:$4 sm:$0x33]   ;;  %6058 = vmatprep.subr.bf16.mxu1 %v8203_v41  ;;  %v6481_v48 = vld [vmem:[%s8183_s5 + $0x68] sm:$0xff]   ;;  %vm7865_vm5 = vmor %vm3493_vm0, %vm3494_vm3 }
 0x2b8   : > { %v6456_v20 = vld [vmem:[#allocation3 + $0x4] ss:$0 sps:$4 sm:$0x66]   ;;  %v3181_v52 = vrot.slane %v6454_v51, 7 }
 0x2b9   : > { %v1915_v61 = vadd.f32 %v7668_v34, %v1906_v59  ;;  %v3450_v44 = vshll.u32 %v6456_v20, 16  ;;  %v1916_v32 = vmax.f32 %v1914_v60, 0.0  ;;  %v3448_v35 = vshrl.u32 %v6456_v20, 16  ;;  %v6459_v19 = vld [vmem:[#allocation3 + $0x4] ss:$0 sps:$4 sm:$0x77]  }
 0x2ba   : > { %3183 = vrot.lane.b32.xlu0 %v3181_v52, %s6568_s20  ;;  %6059 = vmatpush3.bf16.msra.mxu1 %v6473_v17  ;;  %v3141_v46 = vshll.u32 %v6459_v19, 16  ;;  %v6482_v58 = vld [vmem:[%s8183_s5 + $0x30] sm:$0xff]   ;;  %v6484_v59 = vld [vmem:[%s8183_s5 + $0x38] sm:$0xff]  }
 0x2bb   : > { %v1917_v49 = vmax.f32 %v1915_v61, 0.0  ;;  %v3452_v6 = vrot.slane %v3450_v44, 1  ;;  %6060 = vmatprep.subr.bf16.mxu1 %v8203_v41  ;;  %6087 = vmatpush3.bf16.msra.mxu0 %v6482_v58  ;;  %v3139_v61 = vshrl.u32 %v6459_v19, 16 }
 0x2bc   : > { %v3143_v43 = vrot.slane %v3141_v46, 1  ;;  %6088 = vmatprep.subr.bf16.mxu0 %v8203_v41 }
 0x2bd   : > { %v1918_v55 = vmax.f32 %v1916_v32, %v1917_v49  ;;  %v3453_v3 = vor.u32 %v3452_v6, %v3448_v35  ;;  %v6485_v35 = vld [vmem:[%s8183_s5 + $0x78] sm:$0xff]  }
 0x2be   : > { %3145 = vrot.lane.b32.xlu0 %v3137_v62, %s6568_s20  ;;  %6061 = vmatpush3.bf16.msra.mxu1 %v6476_v30  ;;  %v3144_v49 = vor.u32 %v3143_v43, %v3139_v61 }
 0x2bf   : > { %1919 = vst [vmem:[#allocation4] sm:$0xff] %v1918_v55  ;;  %6062 = vmatprep.subr.bf16.mxu1 %v8203_v41  ;;  %6089 = vmatpush3.bf16.msra.mxu0 %v6484_v59 }
 0x2c0   : > { %6114 = vmatprep.subr.bf16.mxu0 %v8203_v41 }
 0x2c2   : > { %3461 = vrot.lane.b32.xlu0 %v3453_v3, %s6568_s20  ;;  %6063 = vmatpush3.bf16.msra.mxu1 %v6479_v57 }
 0x2c3   : > { %6064 = vmatprep.subr.bf16.mxu1 %v8203_v41 }
 0x2c6   : > { %v1920_v4 = vld [vmem:[#allocation4] ss:$2 sm:$0xf]  ;;  %v1921_v25 = vld [vmem:[#allocation4 + $0x1] ss:$2 sm:$0xf]  ;;  %6065 = vmatpush3.bf16.msra.mxu1 %v6481_v48 }
 0x2c7   : > { %v1922_v15 = vmax.f32 %v1920_v4, %v1921_v25  ;;  %6066 = vmatprep.subr.bf16.mxu1 %v8203_v41 }
 0x2c9   : > { %v5586_v21 = vpack.c.bf16 %v1922_v15, %v1922_v15 }
 0x2ca   : > { %6067 = vmatpush3.bf16.msra.mxu1 %v6483_v53 }
 0x2cb   : > { %v1928_v13 = vshrl.u32 %v5586_v21, 16  ;;  %v1931_v39 = vshll.u32 %v5586_v21, 16  ;;  %6068 = vmatprep.subr.bf16.mxu1 %v8203_v41 }
 0x2cd   : > { %v1930_v1 = vrot.slane %v1928_v13, 7 }
 0x2ce   : > { %6069 = vmatpush3.bf16.msra.mxu1 %v6485_v35 }
 0x2cf   : > { %v1933_v26 = vor.u32 %v1931_v39, %v1930_v1  ;;  %6094 = vmatprep.subr.bf16.mxu1 %v8203_v41  ;;  %v2527_v39 = vld [vmem:[#allocation3 + $0xc] sm:$0x7] }
 0x2d1   : > { %v1937_v2 = vsel %vm7677_vm7, %v1933_v26, %v1936_v50 }
 0x2d2   : > { %v2255_v0 = vpop.f32.mrb[12].mxu1  ;;  %1938 = vst [vmem:[#allocation3 + $0x8] sm:$0x7] %v1937_v2 }
 0x2d3   : > { %v2350_v14 = vpop.f32.mrb[20].mxu0  ;;  %v5952_v38 = vpop.f32.mrb[13].mxu1 }
 0x2d4   : > { %v2351_v18 = vadd.f32 %v2350_v14, %v2255_v0  ;;  %v5972_v63 = vpop.f32.mrb[21].mxu0  ;;  %v2258_v23 = vpop.f32.mrb[14].mxu1 }
 0x2d5   : > { %v2353_v56 = vpop.f32.mrb[22].mxu0  ;;  %v5953_v24 = vpop.f32.mrb[15].mxu1 }
 0x2d6   : > { %v2354_v7 = vadd.f32 %v2353_v56, %v2258_v23  ;;  %v5973_v47 = vpop.f32.mrb[23].mxu0 }
 0x2d9   : > { %v6457_v40 = vld [vmem:[#allocation3 + $0x8] ss:$0 sps:$4 sm:$0x33]  }
 0x2da   : > { %v6458_v60 = vld [vmem:[#allocation3 + $0x8] ss:$0 sps:$4 sm:$0x77]   ;;  %v3182_v51 = vrot.slane %v6457_v40, 7 }
 0x2db   : > { %v6460_v37 = vld [vmem:[#allocation3 + $0x8] ss:$0 sps:$4 sm:$0x66]   ;;  %v3652_v20 = vshll.u32 %v6458_v60, 16  ;;  %v3650_v44 = vshrl.u32 %v6458_v60, 16 }
 0x2dc   : > { %3185 = vrot.lane.b32.xlu1 %v3182_v51, %s6568_s20  ;;  %v3457_v52 = vshll.u32 %v6460_v37, 16  ;;  %v3455_v6 = vshrl.u32 %v6460_v37, 16  ;;  %v6464_v56 = vld [vmem:[#allocation3 + $0x8] ss:$0 sps:$4 sm:$0x77]  }
 0x2dd   : > { %v3654_v32 = vrot.slane %v3652_v20, 1  ;;  %v3977_v53 = vshll.u32 %v6464_v56, 16 }
 0x2de   : > { %v3459_v62 = vrot.slane %v3457_v52, 1 }
 0x2df   : > { %v3655_v55 = vor.u32 %v3654_v32, %v3650_v44 }
 0x2e0   : > { %3147 = vrot.lane.b32.xlu1 %v3144_v49, %s6568_s20  ;;  %v3460_v9 = vor.u32 %v3459_v62, %v3455_v6  ;;  %v3979_v49 = vrot.slane %v3977_v53, 1  ;;  %v3975_v62 = vshrl.u32 %v6464_v56, 16 }
 0x2e1   : > { %3663 = vrot.lane.b32.xlu0 %v3655_v55, %s6568_s20 }
 0x2e2   : > { %v3980_v55 = vor.u32 %v3979_v49, %v3975_v62 }
 0x2e4   : > { %3463 = vrot.lane.b32.xlu1 %v3460_v9, %s6568_s20 }
 0x2f2   : > { %v2489_v22 = vpop.f32.mrb[16].mxu1 }
 0x2f3   : > { %v2846_v33 = vpop.f32.mrb[24].mxu0  ;;  %v2496_v27 = vadd.f32 %v2489_v22, %v2351_v18  ;;  %v5992_v31 = vpop.f32.mrb[17].mxu1 }
 0x2f4   : > { %v6012_v3 = vpop.f32.mrb[25].mxu0  ;;  %v2492_v8 = vpop.f32.mrb[18].mxu1 }
 0x2f5   : > { %v2849_v5 = vpop.f32.mrb[26].mxu0  ;;  %v2505_v36 = vadd.f32 %v7668_v34, %v2496_v27  ;;  %v2497_v54 = vadd.f32 %v2492_v8, %v2354_v7  ;;  %v5993_v17 = vpop.f32.mrb[19].mxu1  ;;  %v3118_v3 = vld [vmem:[#allocation3 + $0x10] sm:$0x7] }
 0x2f6   : > { %v6013_v4 = vpop.f32.mrb[27].mxu0 }
 0x2f7   : > { %v2506_v25 = vadd.f32 %v7668_v34, %v2497_v54  ;;  %v2507_v15 = vmax.f32 %v2505_v36, 0.0  ;;  %v6477_v4 = vld [vmem:[#allocation3 + $0x14] ss:$0 sps:$4 sm:$0x77]  }
 0x2f9   : > { %v2508_v45 = vmax.f32 %v2506_v25, 0.0 }
 0x2fb   : > { %v2509_v21 = vmax.f32 %v2507_v15, %v2508_v45 }
 0x2fd   : > { %2510 = vst [vmem:[#allocation4] sm:$0xff] %v2509_v21 }
 0x304   : > { %v2511_v12 = vld [vmem:[#allocation4] ss:$2 sm:$0xf]  ;;  %v2512_v30 = vld [vmem:[#allocation4 + $0x1] ss:$2 sm:$0xf] }
 0x305   : > { %v2513_v28 = vmax.f32 %v2511_v12, %v2512_v30 }
 0x307   : > { %v5587_v29 = vpack.c.bf16 %v2513_v28, %v2513_v28 }
 0x309   : > { %v2519_v16 = vshrl.u32 %v5587_v29, 16  ;;  %v2522_v1 = vshll.u32 %v5587_v29, 16 }
 0x30b   : > { %v2521_v13 = vrot.slane %v2519_v16, 7 }
 0x30d   : > { %v2524_v11 = vor.u32 %v2522_v1, %v2521_v13  ;;  %v4488_v1 = vshll.u32 %v6477_v4, 16 }
 0x30f   : > { %v2528_v57 = vsel %vm7677_vm7, %v2524_v11, %v2527_v39  ;;  %v3196_v39 = vunpack.c.l.s4 %v6572_v42  ;;  %v3198_v11 = vlaneseq }
 0x310   : > { %2529 = vst [vmem:[#allocation3 + $0xc] sm:$0x7] %v2528_v57 }
 0x312   : > { %v2941_v50 = vpop.f32.mrb[20].mxu1 }
 0x313   : > { %v3080_v26 = vpop.f32.mrb[28].mxu0  ;;  %v2942_v19 = vadd.f32 %v2941_v50, %v2846_v33  ;;  %v6032_v2 = vpop.f32.mrb[21].mxu1 }
 0x314   : > { %v6052_v10 = vpop.f32.mrb[29].mxu0  ;;  %v2944_v0 = vpop.f32.mrb[22].mxu1  ;;  %v4490_v2 = vrot.slane %v4488_v1, 1 }
 0x315   : > { %v3083_v14 = vpop.f32.mrb[30].mxu0  ;;  %v3087_v38 = vadd.f32 %v3080_v26, %v2942_v19  ;;  %v2945_v18 = vadd.f32 %v2944_v0, %v2849_v5  ;;  %v6033_v63 = vpop.f32.mrb[23].mxu1  ;;  %v4486_v19 = vshrl.u32 %v6477_v4, 16  ;;  %v3171_v10 = vld [vmem:[#allocation3] sm:$0x6]  ;;  %v3197_v0 = vunpack.c.0.s8 %v3196_v39 }
 0x316   : > { %v6053_v23 = vpop.f32.mrb[31].mxu0 }
 0x317   : > { %v3096_v46 = vadd.f32 %v7668_v34, %v3087_v38  ;;  %v3088_v24 = vadd.f32 %v3083_v14, %v2945_v18  ;;  %v6461_v7 = vld [vmem:[#allocation3 + $0xc] ss:$0 sps:$4 sm:$0x33]   ;;  %v3199_v14 = vshrl.u32 %v3198_v11, 7  ;;  %v4491_v23 = vor.u32 %v4490_v2, %v4486_v19 }
 0x318   : > { %v6462_v47 = vld [vmem:[#allocation3 + $0xc] ss:$0 sps:$4 sm:$0x66]   ;;  %v4024_v58 = vrot.slane %v6461_v7, 7  ;;  %v3121_v7 = vld [vmem:[#allocation3] sm:$0x3] }
 0x319   : > { %v3097_v48 = vadd.f32 %v7668_v34, %v3088_v24  ;;  %v4287_v43 = vshll.u32 %v6462_v47, 16  ;;  %v6463_v40 = vld [vmem:[#allocation3 + $0xc] ss:$0 sps:$4 sm:$0x77]   ;;  %v3098_v60 = vmax.f32 %v3096_v46, 0.0  ;;  %v4285_v51 = vshrl.u32 %v6462_v47, 16 }
 0x31a   : > { %4026 = vrot.lane.b32.xlu0 %v4024_v58, %s6568_s20  ;;  %v3659_v20 = vshll.u32 %v6463_v40, 16  ;;  %v3657_v44 = vshrl.u32 %v6463_v40, 16  ;;  %v6474_v36 = vld [vmem:[#allocation3 + $0xc] ss:$0 sps:$4 sm:$0x77]   ;;  %v7783_v56 = vsub.s32 %v3197_v0, %v3199_v14  ;;  %v6491_v0 = vld [vmem:[%s8183_s5 + $0xa8] sm:$0xff]  }
 0x31b   : > { %v3099_v59 = vmax.f32 %v3097_v48, 0.0  ;;  %v4289_v37 = vrot.slane %v4287_v43, 1  ;;  %v3984_v28 = vshll.u32 %v6474_v36, 16  ;;  %v3982_v26 = vshrl.u32 %v6474_v36, 16  ;;  %v3172_v47 = vld [vmem:[#allocation3 + $0x4] sm:$0x6] }
 0x31c   : > { %v3661_v32 = vrot.slane %v3659_v20, 1  ;;  %v6487_v36 = vld [vmem:[%s8183_s5 + $0x88] sm:$0xff]   ;;  %v6505_v14 = vld [vmem:[%s8183_s5 + $0xf0] sm:$0xff]  }
 0x31d   : > { %v3100_v61 = vmax.f32 %v3098_v60, %v3099_v59  ;;  %v4290_v52 = vor.u32 %v4289_v37, %v4285_v51  ;;  %v3986_v50 = vrot.slane %v3984_v28, 1  ;;  %v3122_v51 = vld [vmem:[#allocation3 + $0x4] sm:$0x3] }
 0x31e   : > { %v3662_v34 = vor.u32 %v3661_v32, %v3657_v44 }
 0x31f   : > { %3101 = vst [vmem:[#allocation4] sm:$0xff] %v3100_v61  ;;  %4298 = vrot.lane.b32.xlu0 %v4290_v52, %s6568_s20  ;;  %v3987_v18 = vor.u32 %v3986_v50, %v3982_v26  ;;  %v6503_v50 = vld [vmem:[%s8183_s5 + $0xe8] sm:$0xff]  }
 0x320   : > { %3665 = vrot.lane.b32.xlu1 %v3662_v34, %s6568_s20  ;;  %v6494_v34 = vld [vmem:[%s8183_s5 + $0xc0] sm:$0xff]  }
 0x323   : > { %3988 = vrot.lane.b32.xlu0 %v3980_v55, %s6568_s20 }
 0x326   : > { %v3102_v6 = vld [vmem:[#allocation4] ss:$2 sm:$0xf]  ;;  %v3103_v35 = vld [vmem:[#allocation4 + $0x1] ss:$2 sm:$0xf] }
 0x327   : > { %v3104_v9 = vmax.f32 %v3102_v6, %v3103_v35 }
 0x329   : > { %v5588_v22 = vpack.c.bf16 %v3104_v9, %v3104_v9 }
 0x32b   : > { %v3110_v33 = vshrl.u32 %v5588_v22, 16  ;;  %v3113_v31 = vshll.u32 %v5588_v22, 16  ;;  %v6486_v22 = vld [vmem:[%s8183_s5 + $0x80] sm:$0xff]  }
 0x32c   : > { %v3184_v38 = vpop.permute.xlu0 %3183 }
 0x32d   : > { %v3112_v27 = vrot.slane %v3110_v33, 7  ;;  %v3189_v63 = vsel %vm808_vm13, %v3171_v10, %v3184_v38 }
 0x32e   : > { %v3201_v46 = vrot.slane %v3189_v63, %v7783_v56 }
 0x32f   : > { %v3115_v8 = vor.u32 %v3113_v31, %v3112_v27  ;;  %v6495_v27 = vld [vmem:[%s8183_s5 + $0xc8] sm:$0xff]  }
 0x330   : > { %v3202_v24 = vcombine.high %v3201_v46, %v3201_v46  ;;  %v3146_v43 = vpop.permute.xlu0 %3145  ;;  %v5335_v61 = vrot.slane %v3201_v46, 9  ;;  %v6492_v46 = vld [vmem:[%s8183_s5 + $0xb0] sm:$0xff]  }
 0x331   : > { %v3119_v5 = vsel %vm7677_vm7, %v3115_v8, %v3118_v3  ;;  %v3151_v53 = vsel %vm808_vm13, %v3121_v7, %v3146_v43  ;;  %v3438_v3 = vld [vmem:[#allocation3 + $0x8] sm:$0x7] }
 0x332   : > { %3120 = vst [vmem:[#allocation3 + $0x10] sm:$0x7] %v3119_v5  ;;  %v3218_v60 = vrot.slane %v3202_v24, 7  ;;  %v3437_v5 = vld [vmem:[#allocation3 + $0x4] sm:$0x7]  ;;  %v6507_v7 = vld [vmem:[%s8183_s5 + $0xf8] sm:$0xff]  }
 0x333   : > { %v6542_v24 = vld [vmem:[%s8183_s5 + $0x100] sm:$0xff]  }
 0x334   : > { %v3219_v62 = vsel %vm7793_vm2, %v5335_v61, %v3218_v60  ;;  %v3462_v31 = vpop.permute.xlu0 %3461 }
 0x339   : > { %v6467_v54 = vld [vmem:[#allocation3 + $0x10] ss:$0 sps:$4 sm:$0x33]  }
 0x33a   : > { %v6470_v17 = vld [vmem:[#allocation3 + $0x10] ss:$0 sps:$4 sm:$0x77]   ;;  %v4025_v25 = vrot.slane %v6467_v54, 7  ;;  %v3467_v54 = vsel %vm808_vm13, %v3437_v5, %v3462_v31  ;;  %v3639_v5 = vld [vmem:[#allocation3 + $0x8] sm:$0x3] }
 0x33b   : > { %v4481_v15 = vshll.u32 %v6470_v17, 16  ;;  %v6471_v45 = vld [vmem:[#allocation3 + $0x10] ss:$0 sps:$4 sm:$0x66]   ;;  %v4479_v21 = vshrl.u32 %v6470_v17, 16  ;;  %v6497_v17 = vld [vmem:[%s8183_s5 + $0xd0] sm:$0xff]  }
 0x33c   : > { %4028 = vrot.lane.b32.xlu1 %v4025_v25, %s6568_s20  ;;  %v4294_v30 = vshll.u32 %v6471_v45, 16  ;;  %v4292_v16 = vshrl.u32 %v6471_v45, 16  ;;  %v3479_v25 = vrot.slane %v3467_v54, %v7783_v56  ;;  %v6499_v45 = vld [vmem:[%s8183_s5 + $0xd8] sm:$0xff]  }
 0x33d   : > { %v4483_v12 = vrot.slane %v4481_v15, 1  ;;  %v6488_v15 = vld [vmem:[%s8183_s5 + $0x90] sm:$0xff]  }
 0x33e   : > { %v4296_v13 = vrot.slane %v4294_v30, 1  ;;  %v3497_v30 = vshrl.u32 %v3479_v25, 16  ;;  %v3500_v28 = vshll.u32 %v3479_v25, 16  ;;  %v3480_v26 = vcombine.high %v3479_v25, %v3479_v25  ;;  %v6509_v25 = vld [vmem:[%s8183_s5 + $0x138] sm:$0xff]  }
 0x33f   : > { %v4484_v29 = vor.u32 %v4483_v12, %v4479_v21 }
 0x340   : > { %v4297_v57 = vor.u32 %v4296_v13, %v4292_v16  ;;  %v6501_v16 = vld [vmem:[%s8183_s5 + $0xe0] sm:$0xff]   ;;  %v3499_v42 = vrot.slane %v3497_v30, 6  ;;  %v3502_v39 = vrot.slane %v3500_v28, 7  ;;  %v3506_v38 = vshll.u32 %v3480_v26, 16  ;;  %v4014_v26 = vld [vmem:[#allocation3 + $0x8] sm:$0x6] }
 0x341   : > { %4492 = vrot.lane.b32.xlu0 %v4484_v29, %s6568_s20  ;;  %v6489_v29 = vld [vmem:[%s8183_s5 + $0x98] sm:$0xff]   ;;  %v6511_v28 = vld [vmem:[%s8183_s5] sm:$0xff]  }
 0x342   : > { %4300 = vrot.lane.b32.xlu1 %v4297_v57, %s6568_s20  ;;  %v6490_v57 = vld [vmem:[%s8183_s5 + $0xa0] sm:$0xff]   ;;  %v3503_v2 = vor.u32 %v3502_v39, %v3499_v42  ;;  %v6515_v42 = vld [vmem:[%s8183_s5 + $0x10] sm:$0xff]   ;;  %v6516_v39 = vld [vmem:[%s8183_s5 + $0x58] sm:$0xff]  }
 0x344   : > { %v3504_v63 = vrot.slane %v3503_v2, 2  ;;  %v6519_v2 = vld [vmem:[%s8183_s5 + $0x20] sm:$0xff]  }
 0x346   : > { %3990 = vrot.lane.b32.xlu1 %v3987_v18, %s6568_s20 }
 0x34a   : > { %4494 = vrot.lane.b32.xlu1 %v4491_v23, %s6568_s20 }
 0x34e   : > { %v3186_v48 = vpop.permute.xlu1 %3185 }
 0x34f   : > { %v3192_v58 = vsel %vm808_vm13, %v3172_v47, %v3186_v48  ;;  %v3508_v47 = vrot.slane %v3506_v38, 7  ;;  %v6522_v38 = vld [vmem:[%s8183_s5 + $0x70] sm:$0xff]  }
 0x350   : > { %v3209_v40 = vrot.slane %v3192_v58, %v7783_v56  ;;  %v6493_v58 = vld [vmem:[%s8183_s5 + $0xb8] sm:$0xff]  }
 0x351   : > { %v3509_v43 = vsel %vm7865_vm5, %v3504_v63, %v3508_v47  ;;  %v4015_v63 = vld [vmem:[#allocation3 + $0xc] sm:$0x6] }
 0x352   : > { %v3210_v59 = vcombine.high %v3209_v40, %v3209_v40  ;;  %v3148_v37 = vpop.permute.xlu1 %3147  ;;  %v5336_v52 = vrot.slane %v3209_v40, 9 }
 0x353   : > { %v3154_v20 = vsel %vm808_vm13, %v3122_v51, %v3148_v37  ;;  %v6500_v51 = vld [vmem:[%s8183_s5 + $0x110] sm:$0xff]   ;;  %v3791_v37 = vld [vmem:[#allocation3 + $0xc] sm:$0x6]  ;;  %v3664_v31 = vpop.permute.xlu0 %3663 }
 0x354   : > { %v3222_v44 = vrot.slane %v3210_v59, 7  ;;  %v3340_v32 = vcombine.low %v3151_v53, %v3154_v20  ;;  %v6496_v53 = vld [vmem:[%s8183_s5 + $0x100] sm:$0xff]   ;;  %v6498_v59 = vld [vmem:[%s8183_s5 + $0x108] sm:$0xff]   ;;  %v3790_v20 = vld [vmem:[#allocation3 + $0x8] sm:$0x6]  ;;  %v3795_v61 = vsel %vm808_vm13, %v3791_v37, 0 }
 0x356   : > { %v3223_v55 = vsel %vm7793_vm2, %v5336_v52, %v3222_v44  ;;  %v3347_v6 = vrot.slane %v3340_v32, %v7783_v56  ;;  %v3464_v9 = vpop.permute.xlu1 %3463  ;;  %v6502_v52 = vld [vmem:[%s8183_s5 + $0x118] sm:$0xff]   ;;  %v3793_v44 = vsel %vm808_vm13, %v3790_v20, 0  ;;  %v3812_v32 = vrot.slane %v3795_v61, %v7783_v56 }
 0x357   : > { %v3241_v35 = vcombine.low %v3219_v62, %v3223_v55  ;;  %v3470_v8 = vsel %vm808_vm13, %v3438_v3, %v3464_v9  ;;  %v3804_v62 = vrot.slane %v3793_v44, %v7783_v56 }
 0x358   : > { %6091 = vmatmul.mubr.bf16.vlgmr.msra.gmra.mrb[32].mxu0 %v3347_v6  ;;  %v3487_v4 = vrot.slane %v3470_v8, %v7783_v56  ;;  %v3813_v55 = vcombine.high %v3812_v32, %v3812_v32  ;;  %v6506_v6 = vld [vmem:[%s8183_s5 + $0x128] sm:$0xff]  }
 0x359   : > { %v3248_v33 = vrot.slane %v3241_v35, %v7783_v56  ;;  %6115 = vmatpush3.bf16.msra.mxu0 %v6494_v34  ;;  %6130 = vmatprep.mubr.msk.bf16.mxu0 %vm6571_vm11, %v8203_v41  ;;  %v6504_v34 = vld [vmem:[%s8183_s5 + $0x120] sm:$0xff]   ;;  %v3805_v35 = vcombine.high %v3804_v62, %v3804_v62  ;;  %v5421_v3 = vrot.slane %v3804_v62, 9 }
 0x35a   : > { %6116 = vmatprep.subr.bf16.mxu0 %v8203_v41  ;;  %v3511_v21 = vshrl.u32 %v3487_v4, 16  ;;  %v3514_v12 = vshll.u32 %v3487_v4, 16  ;;  %v3488_v11 = vcombine.high %v3487_v4, %v3487_v4  ;;  %v3820_v9 = vrot.slane %v3813_v55, 7  ;;  %v6526_v55 = vld [vmem:[%s8183_s5 + $0x80] sm:$0xff]  }
 0x35b   : > { %6071 = vmatmul.mubr.bf16.vlgmr.msra.gmra.mrb[24].mxu1 %v3248_v33  ;;  %v3816_v33 = vrot.slane %v3805_v35, 7 }
 0x35c   : > { %6095 = vmatpush3.bf16.msra.mxu1 %v6486_v22  ;;  %6110 = vmatprep.mubr.msk.bf16.mxu1 %vm6571_vm11, %v8203_v41  ;;  %v3513_v13 = vrot.slane %v3511_v21, 6  ;;  %v3516_v1 = vrot.slane %v3514_v12, 7  ;;  %v3520_v10 = vshll.u32 %v3488_v11, 16  ;;  %v6508_v22 = vld [vmem:[%s8183_s5 + $0x130] sm:$0xff]   ;;  %v6510_v12 = vld [vmem:[%s8183_s5 + $0x40] sm:$0xff]   ;;  %v6517_v11 = vld [vmem:[%s8183_s5 + $0x18] sm:$0xff]  }
 0x35d   : > { %6096 = vmatprep.subr.bf16.mxu1 %v8203_v41  ;;  %6117 = vmatpush3.bf16.msra.mxu0 %v6495_v27  ;;  %v5422_v27 = vrot.slane %v3812_v32, 9  ;;  %v3964_v32 = vld [vmem:[#allocation3 + $0x8] sm:$0x3] }
 0x35e   : > { %6118 = vmatprep.subr.bf16.mxu0 %v8203_v41  ;;  %v3517_v19 = vor.u32 %v3516_v1, %v3513_v13  ;;  %v3522_v23 = vrot.slane %v3520_v10, 7  ;;  %v6513_v13 = vld [vmem:[%s8183_s5 + $0x8] sm:$0xff]   ;;  %v6514_v1 = vld [vmem:[%s8183_s5 + $0x50] sm:$0xff]  }
 0x35f   : > { %v3821_v8 = vsel %vm7793_vm2, %v5422_v27, %v3820_v9  ;;  %v6520_v10 = vld [vmem:[%s8183_s5 + $0x68] sm:$0xff]  }
 0x360   : > { %6097 = vmatpush3.bf16.msra.mxu1 %v6487_v36  ;;  %v3518_v18 = vrot.slane %v3517_v19, 2  ;;  %v3640_v36 = vld [vmem:[#allocation3 + $0xc] sm:$0x3] }
 0x361   : > { %6098 = vmatprep.subr.bf16.mxu1 %v8203_v41  ;;  %6119 = vmatpush3.bf16.msra.mxu0 %v6497_v17  ;;  %v3669_v17 = vsel %vm808_vm13, %v3639_v5, %v3664_v31  ;;  %v6527_v31 = vld [vmem:[%s8183_s5 + $0xc0] sm:$0xff]   ;;  %v6528_v5 = vld [vmem:[%s8183_s5 + $0x88] sm:$0xff]  }
 0x362   : > { %6120 = vmatprep.subr.bf16.mxu0 %v8203_v41  ;;  %v3523_v48 = vsel %vm7865_vm5, %v3518_v18, %v3522_v23 }
 0x363   : > { %v3541_v40 = vcombine.low %v3509_v43, %v3523_v48 }
 0x364   : > { %6099 = vmatpush3.bf16.msra.mxu1 %v6488_v15  ;;  %v3817_v15 = vsel %vm7793_vm2, %v5421_v3, %v3816_v33  ;;  %v4274_v3 = vld [vmem:[#allocation3 + $0xc] sm:$0x7] }
 0x365   : > { %6100 = vmatprep.subr.bf16.mxu1 %v8203_v41  ;;  %6121 = vmatpush3.bf16.msra.mxu0 %v6499_v45  ;;  %v3548_v60 = vrot.slane %v3541_v40, %v7783_v56  ;;  %v3839_v21 = vcombine.low %v3817_v15, %v3821_v8 }
 0x366   : > { %6122 = vmatprep.subr.bf16.mxu0 %v8203_v41 }
 0x368   : > { %6101 = vmatpush3.bf16.msra.mxu1 %v6489_v29  ;;  %v3846_v29 = vrot.slane %v3839_v21, %v7783_v56  ;;  %v6531_v21 = vld [vmem:[%s8183_s5 + $0xd0] sm:$0xff]  }
 0x369   : > { %6102 = vmatprep.subr.bf16.mxu1 %v8203_v41  ;;  %6123 = vmatpush3.bf16.msra.mxu0 %v6501_v16  ;;  %v6512_v16 = vld [vmem:[%s8183_s5 + $0x48] sm:$0xff]  }
 0x36a   : > { %6124 = vmatprep.subr.bf16.mxu0 %v8203_v41 }
 0x36c   : > { %6103 = vmatpush3.bf16.msra.mxu1 %v6490_v57 }
 0x36d   : > { %6104 = vmatprep.subr.bf16.mxu1 %v8203_v41  ;;  %6125 = vmatpush3.bf16.msra.mxu0 %v6503_v50  ;;  %v6518_v50 = vld [vmem:[%s8183_s5 + $0x60] sm:$0xff]  }
 0x36e   : > { %6126 = vmatprep.subr.bf16.mxu0 %v8203_v41 }
 0x370   : > { %6105 = vmatpush3.bf16.msra.mxu1 %v6491_v0 }
 0x371   : > { %6106 = vmatprep.subr.bf16.mxu1 %v8203_v41  ;;  %6127 = vmatpush3.bf16.msra.mxu0 %v6505_v14  ;;  %v6521_v14 = vld [vmem:[%s8183_s5 + $0x28] sm:$0xff]  }
 0x372   : > { %6128 = vmatprep.subr.bf16.mxu0 %v8203_v41 }
 0x374   : > { %6107 = vmatpush3.bf16.msra.mxu1 %v6492_v46 }
 0x375   : > { %6108 = vmatprep.subr.bf16.mxu1 %v8203_v41  ;;  %6129 = vmatpush3.bf16.msra.mxu0 %v6507_v7  ;;  %v6523_v7 = vld [vmem:[%s8183_s5 + $0x30] sm:$0xff]  }
 0x376   : > { %6154 = vmatprep.subr.bf16.mxu0 %v8203_v41 }
 0x378   : > { %6109 = vmatpush3.bf16.msra.mxu1 %v6493_v58  ;;  %v6524_v58 = vld [vmem:[%s8183_s5 + $0x78] sm:$0xff]  }
 0x379   : > { %6134 = vmatprep.subr.bf16.mxu1 %v8203_v41 }
 0x37b   : > { %6111 = vmatmul.mubr.bf16.vlgmr.msra.gmra.mrb[28].mxu1 %v3548_v60 }
 0x37c   : > { %6135 = vmatpush3.bf16.msra.mxu1 %v6496_v53  ;;  %6150 = vmatprep.mubr.msk.bf16.mxu1 %vm6571_vm11, %v8203_v41  ;;  %v6525_v53 = vld [vmem:[%s8183_s5 + $0x38] sm:$0xff]  }
 0x37d   : > { %6136 = vmatprep.subr.bf16.mxu1 %v8203_v41 }
 0x380   : > { %6137 = vmatpush3.bf16.msra.mxu1 %v6498_v59 }
 0x381   : > { %6138 = vmatprep.subr.bf16.mxu1 %v8203_v41 }
 0x384   : > { %6139 = vmatpush3.bf16.msra.mxu1 %v6500_v51 }
 0x385   : > { %6140 = vmatprep.subr.bf16.mxu1 %v8203_v41 }
 0x388   : > { %6141 = vmatpush3.bf16.msra.mxu1 %v6502_v52 }
 0x389   : > { %6142 = vmatprep.subr.bf16.mxu1 %v8203_v41 }
 0x38c   : > { %6143 = vmatpush3.bf16.msra.mxu1 %v6504_v34  ;;  %v4027_v57 = vpop.permute.xlu0 %4026  ;;  %v3965_v34 = vld [vmem:[#allocation3 + $0xc] sm:$0x3] }
 0x38d   : > { %6144 = vmatprep.subr.bf16.mxu1 %v8203_v41  ;;  %v4032_v19 = vsel %vm808_vm13, %v4014_v26, %v4027_v57  ;;  %v6535_v26 = vld [vmem:[%s8183_s5 + $0xe0] sm:$0xff]  }
 0x38e   : > { %v4044_v0 = vrot.slane %v4032_v19, %v7783_v56 }
 0x390   : > { %6145 = vmatpush3.bf16.msra.mxu1 %v6506_v6  ;;  %v4045_v18 = vcombine.high %v4044_v0, %v4044_v0  ;;  %v5452_v60 = vrot.slane %v4044_v0, 9 }
 0x391   : > { %6146 = vmatprep.subr.bf16.mxu1 %v8203_v41  ;;  %v4299_v47 = vpop.permute.xlu0 %4298 }
 0x392   : > { %v3666_v54 = vpop.permute.xlu1 %3665  ;;  %v4056_v43 = vrot.slane %v4045_v18, 7 }
 0x393   : > { %v3672_v4 = vsel %vm808_vm13, %v3640_v36, %v3666_v54  ;;  %v4304_v36 = vsel %vm808_vm13, %v4274_v3, %v4299_v47 }
 0x394   : > { %6147 = vmatpush3.bf16.msra.mxu1 %v6508_v22  ;;  %v3692_v45 = vcombine.low %v3669_v17, %v3672_v4  ;;  %v4057_v20 = vsel %vm7793_vm2, %v5452_v60, %v4056_v43  ;;  %v4275_v22 = vld [vmem:[#allocation3 + $0x10] sm:$0x7]  ;;  %v6529_v17 = vld [vmem:[%s8183_s5 + $0xc8] sm:$0xff]   ;;  %v4316_v4 = vrot.slane %v4304_v36, %v7783_v56 }
 0x395   : > { %6148 = vmatprep.subr.bf16.mxu1 %v8203_v41  ;;  %v3989_v61 = vpop.permute.xlu0 %3988 }
 0x396   : > { %v3699_v30 = vrot.slane %v3692_v45, %v7783_v56  ;;  %v3994_v6 = vsel %vm808_vm13, %v3964_v32, %v3989_v61  ;;  %v4317_v57 = vcombine.high %v4316_v4, %v4316_v4  ;;  %v6543_v32 = vld [vmem:[%s8183_s5 + $0x108] sm:$0xff]  }
 0x398   : > { %6149 = vmatpush3.bf16.msra.mxu1 %v6509_v25  ;;  %6131 = vmatmul.mubr.bf16.vlgmr.msra.gmra.mrb[36].mxu0 %v3699_v30  ;;  %v6530_v25 = vld [vmem:[%s8183_s5 + $0x90] sm:$0xff]   ;;  %v4330_v30 = vshll.u32 %v4316_v4, 16  ;;  %v4336_v0 = vshll.u32 %v4317_v57, 16 }
 0x399   : > { %6174 = vmatprep.subr.bf16.mxu1 %v8203_v41  ;;  %6155 = vmatpush3.bf16.msra.mxu0 %v6510_v12  ;;  %v4327_v12 = vshrl.u32 %v4316_v4, 16 }
 0x39a   : > { %6170 = vmatprep.mubr.msk.bf16.mxu0 %vm6571_vm11, %v8203_v41  ;;  %6156 = vmatprep.subr.bf16.mxu0 %v8203_v41 }
 0x39b   : > { %6151 = vmatmul.mubr.bf16.vlgmr.msra.gmra.mrb[32].mxu1 %v3846_v29 }
 0x39c   : > { %6175 = vmatpush3.bf16.msra.mxu1 %v6511_v28  ;;  %6190 = vmatprep.mubr.msk.bf16.mxu1 %vm6571_vm11, %v8203_v41  ;;  %v6532_v28 = vld [vmem:[%s8183_s5 + $0x98] sm:$0xff]  }
 0x39d   : > { %6176 = vmatprep.subr.bf16.mxu1 %v8203_v41  ;;  %6157 = vmatpush3.bf16.msra.mxu0 %v6512_v16 }
 0x39e   : > { %6158 = vmatprep.subr.bf16.mxu0 %v8203_v41 }
 0x3a0   : > { %6177 = vmatpush3.bf16.msra.mxu1 %v6513_v13  ;;  %v6533_v13 = vld [vmem:[%s8183_s5 + $0xd8] sm:$0xff]  }
 0x3a1   : > { %6178 = vmatprep.subr.bf16.mxu1 %v8203_v41  ;;  %6159 = vmatpush3.bf16.msra.mxu0 %v6514_v1  ;;  %v4329_v1 = vrot.slane %v4327_v12, 6 }
 0x3a2   : > { %6160 = vmatprep.subr.bf16.mxu0 %v8203_v41 }
 0x3a4   : > { %6179 = vmatpush3.bf16.msra.mxu1 %v6515_v42  ;;  %v4332_v42 = vrot.slane %v4330_v30, 7 }
 0x3a5   : > { %6180 = vmatprep.subr.bf16.mxu1 %v8203_v41  ;;  %6161 = vmatpush3.bf16.msra.mxu0 %v6516_v39 }
 0x3a6   : > { %6162 = vmatprep.subr.bf16.mxu0 %v8203_v41  ;;  %v4333_v19 = vor.u32 %v4332_v42, %v4329_v1 }
 0x3a8   : > { %6181 = vmatpush3.bf16.msra.mxu1 %v6517_v11  ;;  %v6534_v11 = vld [vmem:[%s8183_s5 + $0xa0] sm:$0xff]   ;;  %v4334_v18 = vrot.slane %v4333_v19, 2 }
 0x3a9   : > { %6182 = vmatprep.subr.bf16.mxu1 %v8203_v41  ;;  %6163 = vmatpush3.bf16.msra.mxu0 %v6518_v50 }
 0x3aa   : > { %6164 = vmatprep.subr.bf16.mxu0 %v8203_v41 }
 0x3ac   : > { %6183 = vmatpush3.bf16.msra.mxu1 %v6519_v2 }
 0x3ad   : > { %6184 = vmatprep.subr.bf16.mxu1 %v8203_v41  ;;  %6165 = vmatpush3.bf16.msra.mxu0 %v6520_v10  ;;  %v6536_v10 = vld [vmem:[%s8183_s5 + $0xa8] sm:$0xff]  }
 0x3ae   : > { %v4029_v23 = vpop.permute.xlu1 %4028  ;;  %6166 = vmatprep.subr.bf16.mxu0 %v8203_v41 }
 0x3af   : > { %v4035_v46 = vsel %vm808_vm13, %v4015_v63, %v4029_v23  ;;  %v6538_v23 = vld [vmem:[%s8183_s5 + $0xb0] sm:$0xff]  }
 0x3b0   : > { %6185 = vmatpush3.bf16.msra.mxu1 %v6521_v14  ;;  %v4052_v48 = vrot.slane %v4035_v46, %v7783_v56  ;;  %v4338_v46 = vrot.slane %v4336_v0, 7  ;;  %v6553_v0 = vld [vmem:[%s8185_s7 + $0x18] sm:$0xff]  }
 0x3b1   : > { %6186 = vmatprep.subr.bf16.mxu1 %v8203_v41  ;;  %6167 = vmatpush3.bf16.msra.mxu0 %v6522_v38  ;;  %v6537_v38 = vld [vmem:[%s8183_s5 + $0xe8] sm:$0xff]  }
 0x3b2   : > { %v4053_v40 = vcombine.high %v4052_v48, %v4052_v48  ;;  %6168 = vmatprep.subr.bf16.mxu0 %v8203_v41  ;;  %v5453_v59 = vrot.slane %v4052_v48, 9 }
 0x3b3   : > { %v4493_v43 = vpop.permute.xlu0 %4492 }
 0x3b4   : > { %6187 = vmatpush3.bf16.msra.mxu1 %v6523_v7  ;;  %v4060_v51 = vrot.slane %v4053_v40, 7  ;;  %v4301_v37 = vpop.permute.xlu1 %4300  ;;  %v4469_v7 = vld [vmem:[#allocation3 + $0x14] sm:$0x3]  ;;  %v6540_v40 = vld [vmem:[%s8183_s5 + $0xb8] sm:$0xff]  }
 0x3b5   : > { %6188 = vmatprep.subr.bf16.mxu1 %v8203_v41  ;;  %6169 = vmatpush3.bf16.msra.mxu0 %v6524_v58  ;;  %v4307_v27 = vsel %vm808_vm13, %v4275_v22, %v4301_v37  ;;  %v6539_v58 = vld [vmem:[%s8183_s5 + $0xf0] sm:$0xff]  }
 0x3b6   : > { %v4061_v52 = vsel %vm7793_vm2, %v5453_v59, %v4060_v51  ;;  %6194 = vmatprep.subr.bf16.mxu0 %v8203_v41  ;;  %v4324_v54 = vrot.slane %v4307_v27, %v7783_v56  ;;  %v4468_v51 = vld [vmem:[#allocation3 + $0x10] sm:$0x3] }
 0x3b7   : > { %v4078_v44 = vcombine.low %v4057_v20, %v4061_v52  ;;  %v4498_v37 = vsel %vm808_vm13, %v4468_v51, %v4493_v43  ;;  %v6541_v20 = vld [vmem:[%s8183_s5 + $0xf8] sm:$0xff]   ;;  %v6546_v27 = vld [vmem:[%s8183_s5 + $0x120] sm:$0xff]  }
 0x3b8   : > { %6189 = vmatpush3.bf16.msra.mxu1 %v6525_v53  ;;  %v3991_v62 = vpop.permute.xlu1 %3990  ;;  %v4341_v15 = vshrl.u32 %v4324_v54, 16  ;;  %v4344_v45 = vshll.u32 %v4324_v54, 16  ;;  %v4325_v39 = vcombine.high %v4324_v54, %v4324_v54  ;;  %v4339_v53 = vsel %vm7865_vm5, %v4334_v18, %v4338_v46  ;;  %v6555_v18 = vld [vmem:[%s8185_s7 + $0x28] sm:$0xff]  }
 0x3b9   : > { %6214 = vmatprep.subr.bf16.mxu1 %v8203_v41  ;;  %v3997_v35 = vsel %vm808_vm13, %v3965_v34, %v3991_v62  ;;  %v4085_v9 = vrot.slane %v4078_v44, %v7783_v56  ;;  %v6544_v34 = vld [vmem:[%s8183_s5 + $0x110] sm:$0xff]   ;;  %v4618_v62 = vld [vmem:[#allocation3 + $0x10] sm:$0x6] }
 0x3ba   : > { %v4177_v33 = vcombine.low %v3994_v6, %v3997_v35  ;;  %v4343_v29 = vrot.slane %v4341_v15, 6  ;;  %v4346_v16 = vrot.slane %v4344_v45, 7  ;;  %v4350_v2 = vshll.u32 %v4325_v39, 16  ;;  %v6549_v45 = vld [vmem:[%s8183_s5 + $0x138] sm:$0xff]  }
 0x3bb   : > { %6171 = vmatmul.mubr.bf16.vlgmr.msra.gmra.mrb[40].mxu0 %v4085_v9  ;;  %v4621_v6 = vsel %vm808_vm13, %v4618_v62, 0  ;;  %v6545_v9 = vld [vmem:[%s8183_s5 + $0x118] sm:$0xff]  }
 0x3bc   : > { %v4184_v8 = vrot.slane %v4177_v33, %v7783_v56  ;;  %6195 = vmatpush3.bf16.msra.mxu0 %v6526_v55  ;;  %6210 = vmatprep.mubr.msk.bf16.mxu0 %vm6571_vm11, %v8203_v41  ;;  %v4347_v50 = vor.u32 %v4346_v16, %v4343_v29  ;;  %v4352_v63 = vrot.slane %v4350_v2, 7  ;;  %v4495_v47 = vpop.permute.xlu1 %4494  ;;  %v4619_v55 = vld [vmem:[#allocation3 + $0x14] sm:$0x6]  ;;  %v4632_v22 = vrot.slane %v4621_v6, %v7783_v56 }
 0x3bd   : > { %6196 = vmatprep.subr.bf16.mxu0 %v8203_v41  ;;  %v4501_v60 = vsel %vm808_vm13, %v4469_v7, %v4495_v47  ;;  %v4623_v35 = vsel %vm808_vm13, %v4619_v55, 0  ;;  %v6550_v2 = vld [vmem:[%s8185_s7] sm:$0xff]  }
 0x3be   : > { %6191 = vmatmul.mubr.bf16.vlgmr.msra.gmra.mrb[36].mxu1 %v4184_v8  ;;  %v4348_v14 = vrot.slane %v4347_v50, 2  ;;  %v4520_v61 = vcombine.low %v4498_v37, %v4501_v60  ;;  %v4640_v33 = vrot.slane %v4623_v35, %v7783_v56  ;;  %v6547_v8 = vld [vmem:[%s8183_s5 + $0x128] sm:$0xff]   ;;  %v5538_v4 = vrot.slane %v4632_v22, 9  ;;  %v5447_v47 = vld [vmem:[%s8184_s6] ss:$0 sm:$0xff]  ;;  %v6557_v37 = vld [vmem:[%s8185_s7 + $0x38] sm:$0xff]  }
 0x3bf   : > { %6215 = vmatpush3.bf16.msra.mxu1 %v6527_v31  ;;  %6230 = vmatprep.mubr.msk.bf16.mxu1 %vm6571_vm11, %v8203_v41  ;;  %v4633_v31 = vcombine.high %v4632_v22, %v4632_v22 }
 0x3c0   : > { %6197 = vmatpush3.bf16.msra.mxu0 %v6528_v5  ;;  %6216 = vmatprep.subr.bf16.mxu1 %v8203_v41  ;;  %v4353_v48 = vsel %vm7865_vm5, %v4348_v14, %v4352_v63  ;;  %v4527_v44 = vrot.slane %v4520_v61, %v7783_v56  ;;  %v4641_v3 = vcombine.high %v4640_v33, %v4640_v33  ;;  %v5539_v36 = vrot.slane %v4640_v33, 9  ;;  %v6554_v14 = vld [vmem:[%s8185_s7 + $0x20] sm:$0xff]  }
 0x3c1   : > { %6198 = vmatprep.subr.bf16.mxu0 %v8203_v41  ;;  %v4370_v59 = vcombine.low %v4339_v53, %v4353_v48  ;;  %v4644_v5 = vrot.slane %v4633_v31, 7  ;;  %v6556_v53 = vld [vmem:[%s8185_s7 + $0x30] sm:$0xff]  }
 0x3c2   : > { %v4648_v54 = vrot.slane %v4641_v3, 7 }
 0x3c3   : > { %6217 = vmatpush3.bf16.msra.mxu1 %v6529_v17  ;;  %v4377_v52 = vrot.slane %v4370_v59, %v7783_v56  ;;  %v6548_v17 = vld [vmem:[%s8183_s5 + $0x130] sm:$0xff]  }
 0x3c4   : > { %6199 = vmatpush3.bf16.msra.mxu0 %v6530_v25  ;;  %6218 = vmatprep.subr.bf16.mxu1 %v8203_v41  ;;  %v4645_v25 = vsel %vm7793_vm2, %v5538_v4, %v4644_v5  ;;  %v4649_v15 = vsel %vm7793_vm2, %v5539_v36, %v4648_v54 }
 0x3c5   : > { %6200 = vmatprep.subr.bf16.mxu0 %v8203_v41 }
 0x3c7   : > { %6219 = vmatpush3.bf16.msra.mxu1 %v6531_v21  ;;  %v4666_v21 = vcombine.low %v4645_v25, %v4649_v15 }
 0x3c8   : > { %6201 = vmatpush3.bf16.msra.mxu0 %v6532_v28  ;;  %6220 = vmatprep.subr.bf16.mxu1 %v8203_v41 }
 0x3c9   : > { %6202 = vmatprep.subr.bf16.mxu0 %v8203_v41  ;;  %v4673_v12 = vrot.slane %v4666_v21, %v7783_v56  ;;  %v6551_v56 = vld [vmem:[%s8185_s7 + $0x8] sm:$0xff]  }
 0x3cb   : > { %6221 = vmatpush3.bf16.msra.mxu1 %v6533_v13 }
 0x3cc   : > { %6203 = vmatpush3.bf16.msra.mxu0 %v6534_v11  ;;  %6222 = vmatprep.subr.bf16.mxu1 %v8203_v41 }
 0x3cd   : > { %6204 = vmatprep.subr.bf16.mxu0 %v8203_v41 }
 0x3cf   : > { %6223 = vmatpush3.bf16.msra.mxu1 %v6535_v26 }
 0x3d0   : > { %6205 = vmatpush3.bf16.msra.mxu0 %v6536_v10  ;;  %6224 = vmatprep.subr.bf16.mxu1 %v8203_v41  ;;  %v6552_v10 = vld [vmem:[%s8185_s7 + $0x10] sm:$0xff]  }
 0x3d1   : > { %6206 = vmatprep.subr.bf16.mxu0 %v8203_v41 }
 0x3d3   : > { %6225 = vmatpush3.bf16.msra.mxu1 %v6537_v38 }
 0x3d4   : > { %6207 = vmatpush3.bf16.msra.mxu0 %v6538_v23  ;;  %6226 = vmatprep.subr.bf16.mxu1 %v8203_v41 }
 0x3d5   : > { %6208 = vmatprep.subr.bf16.mxu0 %v8203_v41 }
 0x3d7   : > { %6227 = vmatpush3.bf16.msra.mxu1 %v6539_v58 }
 0x3d8   : > { %6209 = vmatpush3.bf16.msra.mxu0 %v6540_v40  ;;  %6228 = vmatprep.subr.bf16.mxu1 %v8203_v41 }
 0x3d9   : > { %6234 = vmatprep.subr.bf16.mxu0 %v8203_v41 }
 0x3db   : > { %6229 = vmatpush3.bf16.msra.mxu1 %v6541_v20  ;;  %6211 = vmatmul.mubr.bf16.vlgmr.msra.gmra.mrb[44].mxu0 %v4377_v52 }
 0x3dc   : > { %6235 = vmatpush3.bf16.msra.mxu0 %v6542_v24  ;;  %6250 = vmatprep.mubr.msk.bf16.mxu0 %vm6571_vm11, %v8203_v41 }
 0x3dd   : > { %6236 = vmatprep.subr.bf16.mxu0 %v8203_v41  ;;  %6254 = vmatprep.subr.bf16.mxu1 %v8203_v41 }
 0x3de   : > { %6231 = vmatmul.mubr.bf16.vlgmr.msra.gmra.mrb[40].mxu1 %v4527_v44 }
 0x3df   : > { %6270 = vmatprep.mubr.msk.bf16.mxu1 %vm6571_vm11, %v8203_v41  ;;  %6255 = vmatpush3.bf16.msra.mxu1 %v6550_v2  ;;  %vm3955_vm11 = vcmask 1041408  }
 0x3e0   : > { %6237 = vmatpush3.bf16.msra.mxu0 %v6543_v32  ;;  %6256 = vmatprep.subr.bf16.mxu1 %v8203_v41 }
 0x3e1   : > { %6238 = vmatprep.subr.bf16.mxu0 %v8203_v41 }
 0x3e3   : > { %6257 = vmatpush3.bf16.msra.mxu1 %v6551_v56 }
 0x3e4   : > { %6239 = vmatpush3.bf16.msra.mxu0 %v6544_v34  ;;  %6258 = vmatprep.subr.bf16.mxu1 %v8203_v41 }
 0x3e5   : > { %6240 = vmatprep.subr.bf16.mxu0 %v8203_v41 }
 0x3e7   : > { %6259 = vmatpush3.bf16.msra.mxu1 %v6552_v10 }
 0x3e8   : > { %6241 = vmatpush3.bf16.msra.mxu0 %v6545_v9  ;;  %6260 = vmatprep.subr.bf16.mxu1 %v8203_v41 }
 0x3e9   : > { %6242 = vmatprep.subr.bf16.mxu0 %v8203_v41 }
 0x3eb   : > { %6261 = vmatpush3.bf16.msra.mxu1 %v6553_v0 }
 0x3ec   : > { %6243 = vmatpush3.bf16.msra.mxu0 %v6546_v27  ;;  %6262 = vmatprep.subr.bf16.mxu1 %v8203_v41 }
 0x3ed   : > { %6244 = vmatprep.subr.bf16.mxu0 %v8203_v41 }
 0x3ef   : > { %6263 = vmatpush3.bf16.msra.mxu1 %v6554_v14 }
 0x3f0   : > { %6245 = vmatpush3.bf16.msra.mxu0 %v6547_v8  ;;  %6264 = vmatprep.subr.bf16.mxu1 %v8203_v41 }
 0x3f1   : > { %6246 = vmatprep.subr.bf16.mxu0 %v8203_v41 }
 0x3f3   : > { %6265 = vmatpush3.bf16.msra.mxu1 %v6555_v18 }
 0x3f4   : > { %6247 = vmatpush3.bf16.msra.mxu0 %v6548_v17  ;;  %6266 = vmatprep.subr.bf16.mxu1 %v8203_v41 }
 0x3f5   : > { %6248 = vmatprep.subr.bf16.mxu0 %v8203_v41 }
 0x3f7   : > { %6267 = vmatpush3.bf16.msra.mxu1 %v6556_v53 }
 0x3f8   : > { %6249 = vmatpush3.bf16.msra.mxu0 %v6549_v45  ;;  %6268 = vmatprep.subr.bf16.mxu1 %v8203_v41 }
 0x3fb   : > { %6251 = vmatmul.mubr.bf16.vlgmr.msra.gmra.mrb[48].mxu0 %v4673_v12  ;;  %6269 = vmatpush3.bf16.msra.mxu1 %v6557_v37 }
 0x42b   : > { %v3431_v30 = vpop.f32.mrb[32].mxu0 }
 0x42c   : > { %v6092_v28 = vpop.f32.mrb[33].mxu0 }
 0x42d   : > { %v3434_v29 = vpop.f32.mrb[34].mxu0 }
 0x42e   : > { %v3332_v16 = vpop.f32.mrb[24].mxu1  ;;  %v6093_v13 = vpop.f32.mrb[35].mxu0 }
 0x42f   : > { %v3432_v1 = vadd.f32 %v3431_v30, %v3332_v16  ;;  %v6072_v49 = vpop.f32.mrb[25].mxu1 }
 0x430   : > { %v3335_v42 = vpop.f32.mrb[26].mxu1 }
 0x431   : > { %v6073_v39 = vpop.f32.mrb[27].mxu1 }
 0x44e   : > { %v3632_v11 = vpop.f32.mrb[28].mxu1 }
 0x44f   : > { %v3638_v57 = vadd.f32 %v3632_v11, %v3432_v1  ;;  %v6112_v50 = vpop.f32.mrb[29].mxu1 }
 0x450   : > { %v3635_v26 = vpop.f32.mrb[30].mxu1 }
 0x451   : > { %v6113_v19 = vpop.f32.mrb[31].mxu1 }
 0x46b   : > { %v3783_v38 = vpop.f32.mrb[36].mxu0 }
 0x46c   : > { %v3789_v63 = vadd.f32 %v3783_v38, %v3638_v57  ;;  %v6132_v23 = vpop.f32.mrb[37].mxu0 }
 0x46d   : > { %v3786_v46 = vpop.f32.mrb[38].mxu0 }
 0x46e   : > { %v3930_v7 = vpop.f32.mrb[32].mxu1  ;;  %v6133_v48 = vpop.f32.mrb[39].mxu0 }
 0x46f   : > { %v3936_v58 = vadd.f32 %v3930_v7, %v3789_v63  ;;  %v6152_v43 = vpop.f32.mrb[33].mxu1  ;;  %v5565_v7 = vld [vmem:[%s8186_s8] ss:$0 sm:$0xff] }
 0x470   : > { %v3933_v40 = vpop.f32.mrb[34].mxu1 }
 0x471   : > { %v3944_v60 = vadd.f32 %v5447_v47, %v3936_v58  ;;  %v6153_v59 = vpop.f32.mrb[35].mxu1 }
 0x473   : > { %v3945_v51 = vmax.f32 %v3944_v60, 0.0 }
 0x475   : > { %v3947_v20 = vcombine.high %v3945_v51, %v3945_v51 }
 0x477   : > { %v3949_v61 = vmax.f32 %v3945_v51, %v3947_v20 }
 0x479   : > { %3950 = vst [vmem:[#allocation5] sm:$0xf] %v3949_v61 }
 0x480   : > { %v3951_v17 = vld [vmem:[#allocation5] ss:$2 sm:$0x3]  ;;  %v3953_v15 = vld [vmem:[#allocation5 + $0x1] ss:$2 sm:$0x3] }
 0x481   : > { %v3954_v28 = vmax.f32 %v3951_v17, %v3953_v15 }
 0x483   : > { %v3956_v13 = vsel %vm3955_vm11, %v3954_v28, 0.0 }
 0x484   : > { %v3957_v1 = vrot.slane %v3956_v13, 4 }
 0x486   : > { %v3958_v49 = vadd.f32 %v3957_v1, %v3956_v13 }
 0x488   : > { %v3959_v57 = vrot.slane %v3958_v49, 2 }
 0x48a   : > { %v3960_v19 = vadd.f32 %v3959_v57, %v3958_v49 }
 0x48c   : > { %v3961_v10 = vrot.slane %v3960_v19, 1 }
 0x48e   : > { %v4169_v24 = vpop.f32.mrb[40].mxu0  ;;  %v3962_v38 = vadd.f32 %v3961_v10, %v3960_v19 }
 0x48f   : > { %v6172_v52 = vpop.f32.mrb[41].mxu0 }
 0x490   : > { %v4172_v44 = vpop.f32.mrb[42].mxu0 }
 0x491   : > { %v4268_v32 = vpop.f32.mrb[36].mxu1  ;;  %v6173_v34 = vpop.f32.mrb[43].mxu0 }
 0x492   : > { %v4269_v62 = vadd.f32 %v4268_v32, %v4169_v24  ;;  %v6192_v55 = vpop.f32.mrb[37].mxu1 }
 0x493   : > { %v4271_v6 = vpop.f32.mrb[38].mxu1 }
 0x494   : > { %v6193_v35 = vpop.f32.mrb[39].mxu1 }
 0x4ae   : > { %v4461_v9 = vpop.f32.mrb[44].mxu0 }
 0x4af   : > { %v4467_v22 = vadd.f32 %v4461_v9, %v4269_v62  ;;  %v6212_v33 = vpop.f32.mrb[45].mxu0 }
 0x4b0   : > { %v4464_v27 = vpop.f32.mrb[46].mxu0 }
 0x4b1   : > { %v4611_v31 = vpop.f32.mrb[40].mxu1  ;;  %v6213_v3 = vpop.f32.mrb[47].mxu0 }
 0x4b2   : > { %v4617_v8 = vadd.f32 %v4611_v31, %v4467_v22  ;;  %v6232_v41 = vpop.f32.mrb[41].mxu1 }
 0x4b3   : > { %v4614_v5 = vpop.f32.mrb[42].mxu1 }
 0x4b4   : > { %v6233_v36 = vpop.f32.mrb[43].mxu1 }
 0x4ce   : > { %v4757_v54 = vpop.f32.mrb[48].mxu0 }
 0x4cf   : > { %v4763_v4 = vadd.f32 %v4757_v54, %v4617_v8  ;;  %v6252_v25 = vpop.f32.mrb[49].mxu0 }
 0x4d0   : > { %v4760_v45 = vpop.f32.mrb[50].mxu0 }
 0x4d1   : > { %v4771_v21 = vadd.f32 %v5447_v47, %v4763_v4  ;;  %v6253_v12 = vpop.f32.mrb[51].mxu0 }
 0x4d3   : > { %v4772_v30 = vmax.f32 %v4771_v21, 0.0 }
 0x4d5   : > { %v4774_v29 = vcombine.high %v4772_v30, %v4772_v30 }
 0x4d7   : > { %v4776_v16 = vmax.f32 %v4772_v30, %v4774_v29 }
 0x4d9   : > { %4777 = vst [vmem:[#allocation5] sm:$0xf] %v4776_v16 }
 0x4e0   : > { %v4778_v42 = vld [vmem:[#allocation5] ss:$2 sm:$0x3]  ;;  %v4779_v39 = vld [vmem:[#allocation5 + $0x1] ss:$2 sm:$0x3] }
 0x4e1   : > { %v4780_v11 = vmax.f32 %v4778_v42, %v4779_v39 }
 0x4e3   : > { %v4781_v50 = vsel %vm3955_vm11, %v4780_v11, 0.0 }
 0x4e4   : > { %v4782_v26 = vrot.slane %v4781_v50, 4 }
 0x4e6   : > { %v4783_v2 = vadd.f32 %v4782_v26, %v4781_v50 }
 0x4e8   : > { %v4784_v56 = vrot.slane %v4783_v2, 2 }
 0x4ea   : > { %v4785_v0 = vadd.f32 %v4784_v56, %v4783_v2 }
 0x4ec   : > { %v4786_v14 = vrot.slane %v4785_v0, 1 }
 0x4ee   : > { %v4787_v18 = vadd.f32 %v4786_v14, %v4785_v0 }
 0x4f0   : > { %v4788_v63 = vadd.f32 %v4787_v18, %v3962_v38 }
 0x4f2   : > { %v4789_v23 = vmul.f32 0.25, %v4788_v63 }
 0x4f4   : > { %v4790_v46 = vpack.c.bf16 %v4789_v23, %v4789_v23 }
 0x4f6   : > { %6271 = vmatmul.mubr.bf16.vlgmr.msra.gmra.mrb[44].mxu1 %v4790_v46 }
 0x5c9   : > { %v4896_v47 = vpop.f32.mrb[44].mxu1 }
 0x5ca   : > { %v4897_v48 = vadd.f32 %v5565_v7, %v4896_v47  ;;  %v6272_v58 = vpop.f32.mrb[45].mxu1 }
 0x5cb   : > { %v4899_v43 = vpop.f32.mrb[46].mxu1 }
 0x5cc   : > { %4902 = vst [vmem:[%s330_s13] sm:$0xff] %v4897_v48  ;;  %v6273_v40 = vpop.f32.mrb[47].mxu1 }
 0x5cd PF: > { %s19_s30 = sadd.s32 1, %s6564_s30  }
 0x5ce   : > { %p16_p4 = scmp.ge.s32.totalorder %s19_s30, 4  }
 0x5d0   :  { %18 = sbr.rel (!%p16_p4) target bundleno = 1 (0x1), region = 108 }

</bundles_post_ra>
